<compile_context>
chip_gen: v7x
topology: tpu7x:2x2x1
jax: 0.10.0
libtpu: 0.0.40
codegen_flags: <defaults>
</compile_context>

<pallas_src>
import math

import numpy as np
import jax
import jax.numpy as jnp
from jax.experimental import pallas as pl
from jax.experimental.pallas import tpu as pltpu

# ---- ModelConfig-consistent (scaled-down) sizes ----
INPUT_DIM = 64          # config.input_dim
EMBED_DIM = 32          # config.embedding_dim
LINEAR_DIM = 16         # config.linear_dim
NUM_LAYERS = 3          # config.num_attention_layers
NUM_HEADS = 4           # config.num_heads
FFN_DIM = EMBED_DIM * 4
HEAD_DIM = EMBED_DIM // NUM_HEADS

BATCH = 16              # demo batch (protein pairs)
BATCH_TILE = 8          # pairs per grid step (2*BATCH_TILE sublane rows/step)

LANES = 128
LN_EPS = 1e-5
# True  -> erf-based GELU (close to torch F.gelu default; rational-approx erf)
# False -> tanh-approx GELU (EUP path, ~1e-3 numeric difference, faster)
EXACT_GELU = False
_SQRT_2_OVER_PI = 0.7978845608028654


# ----------------------------------------------------------------------------
# small math helpers (shared by kernel and pure-JAX reference)
# ----------------------------------------------------------------------------
def _erf(x):
    # Abramowitz & Stegun 7.1.26 rational approximation (|err| <= 1.5e-7).
    a1, a2, a3, a4, a5 = 0.254829592, -0.284496736, 1.421413741, -1.453152027, 1.061405429
    p = 0.3275911
    ax = jnp.abs(x)
    t = 1.0 / (1.0 + p * ax)
    poly = ((((a5 * t + a4) * t + a3) * t + a2) * t + a1) * t
    return jnp.sign(x) * (1.0 - poly * jnp.exp(-ax * ax))


def _gelu(x):
    if EXACT_GELU:
        return 0.5 * x * (1.0 + _erf(x * (1.0 / math.sqrt(2.0))))
    return 0.5 * x * (1.0 + jnp.tanh(_SQRT_2_OVER_PI * (x + 0.044715 * x * x * x)))


def _layer_norm_ref(x, w, b, eps=LN_EPS):
    mu = jnp.mean(x, axis=-1, keepdims=True)
    var = jnp.mean(jnp.square(x - mu), axis=-1, keepdims=True)
    return (x - mu) * jax.lax.rsqrt(var + eps) * w + b


# ----------------------------------------------------------------------------
# parameter slab layout (static, computed at import time)
#   each matrix gets a 128-row (or 64-row for proj_w), 128-lane zero-padded
#   block so every in-kernel read is a full-lane, tile-aligned slice.
# ----------------------------------------------------------------------------
def _round8(n):
    return ((n + 7) // 8) * 8


def _build_layout():
    # (name, true_rows, true_cols, read_rows)
    entries = [
        ("proj_w", INPUT_DIM, EMBED_DIM, INPUT_DIM),
        ("proj_b", 1, EMBED_DIM, 1),
        # precomputed block-diagonal head-segment matrices (constants)
        ("seg_score", EMBED_DIM, NUM_HEADS, LANES),   # includes 1/sqrt(HEAD_DIM)
        ("seg_expand", NUM_HEADS, EMBED_DIM, LANES),
    ]
    for l in range(NUM_LAYERS):
        entries += [
            (f"ln1_w_{l}", 1, EMBED_DIM, 1), (f"ln1_b_{l}", 1, EMBED_DIM, 1),
            (f"wq_{l}", EMBED_DIM, EMBED_DIM, LANES), (f"bq_{l}", 1, EMBED_DIM, 1),
            (f"wk_{l}", EMBED_DIM, EMBED_DIM, LANES), (f"bk_{l}", 1, EMBED_DIM, 1),
            (f"wv_{l}", EMBED_DIM, EMBED_DIM, LANES), (f"bv_{l}", 1, EMBED_DIM, 1),
            (f"wo_{l}", EMBED_DIM, EMBED_DIM, LANES), (f"bo_{l}", 1, EMBED_DIM, 1),
            (f"ln2_w_{l}", 1, EMBED_DIM, 1), (f"ln2_b_{l}", 1, EMBED_DIM, 1),
            (f"w1_{l}", EMBED_DIM, FFN_DIM, LANES), (f"b1_{l}", 1, FFN_DIM, 1),
            (f"w2_{l}", FFN_DIM, EMBED_DIM, LANES), (f"b2_{l}", 1, EMBED_DIM, 1),
        ]
    entries += [
        ("hln_w", 1, EMBED_DIM, 1), ("hln_b", 1, EMBED_DIM, 1),
        ("h1_w", EMBED_DIM, LINEAR_DIM, LANES), ("h1_b", 1, LINEAR_DIM, 1),
        ("h2_w", LINEAR_DIM, LINEAR_DIM // 2, LANES), ("h2_b", 1, LINEAR_DIM // 2, 1),
        ("h3_w", LINEAR_DIM // 2, 1, LANES), ("h3_b", 1, 1, 1),
    ]
    layout, off = {}, 0
    for name, tr, tc, rr in entries:
        assert tc <= LANES and tr <= max(rr, 8)
        layout[name] = (off, rr, tr, tc)
        off += _round8(max(tr, rr))          # 8-aligned storage blocks
    return layout, off


_LAYOUT, _SLAB_ROWS = _build_layout()


def pack_params(pd):
    """Pack the structured parameter dict into one (rows, 128) f32 slab.

    Real values live in [off:off+true_rows, :true_cols]; everything else is
    zero, so full-lane / 128-row reads contract correctly against
    lane-padded activations.
    """
    slab = np.zeros((_SLAB_ROWS, LANES), np.float32)
    for name, (off, _rr, tr, tc) in _LAYOUT.items():
        a = np.asarray(pd[name], np.float32).reshape(tr, tc)
        slab[off:off + tr, :tc] = a
    return jnp.asarray(slab)


# ----------------------------------------------------------------------------
# Pallas kernel (one batch-tile of BATCH_TILE protein pairs per grid step)
# ----------------------------------------------------------------------------
def _affinity_kernel(p1_ref, p2_ref, slab_ref, out_ref):
    TB = p1_ref.shape[0]                 # pairs in this tile

    def mat(name):                       # full-lane weight block
        off, rr, _, _ = _LAYOUT[name]
        return slab_ref[off:off + rr, :]

    def vec(name):                       # (1, 128) bias / LN param row
        off = _LAYOUT[name][0]
        return slab_ref[off:off + 1, :]

    def dot(a, b):
        return jnp.dot(a, b, preferred_element_type=jnp.float32)

    def ln(x, wname, bname):
        # moments over the E real lanes; padded lanes end up exactly zero
        # because the packed LN gain/bias are zero there.
        mu = jnp.sum(x, axis=-1, keepdims=True) * (1.0 / EMBED_DIM)
        ex2 = jnp.sum(x * x, axis=-1, keepdims=True) * (1.0 / EMBED_DIM)
        var = ex2 - mu * mu
        return (x - mu) * jax.lax.rsqrt(var + LN_EPS) * vec(wname) + vec(bname)

    def swap_tokens(a):
        # swap the two token halves along the sublane axis (XLU rotate)
        return pltpu.roll(a, shift=TB, axis=0)

    seg_score = mat("seg_score")    # (128,128): block-diag * 1/sqrt(HEAD_DIM) in [0:E,0:H]
    seg_expand = mat("seg_expand")  # (128,128): block-diag 0/1 in [0:H,0:E]

    # stack the two tokens on sublanes: rows [0:TB]=protein1, [TB:2TB]=protein2
    x_in = jnp.concatenate([p1_ref[...], p2_ref[...]], axis=0)        # (2TB, INPUT_DIM)
    # shared protein_projection; result is lane-padded (2TB, 128), zeros >= E
    x = dot(x_in, mat("proj_w")) + vec("proj_b")

    for l in range(NUM_LAYERS):
        # ---- self-attention block (norm_first) ----
        h = ln(x, f"ln1_w_{l}", f"ln1_b_{l}")
        q = dot(h, mat(f"wq_{l}")) + vec(f"bq_{l}")
        k = dot(h, mat(f"wk_{l}")) + vec(f"bk_{l}")
        v = dot(h, mat(f"wv_{l}")) + vec(f"bv_{l}")
        k_sw = swap_tokens(k)
        v_sw = swap_tokens(v)

        # per-head scores via segment matmul: (2TB,128) @ (128,128) -> heads in lanes 0..H-1
        s_same = dot(q * k, seg_score)       # query vs key of same token
        s_cross = dot(q * k_sw, seg_score)   # query vs key of other token

        # closed-form 2-way softmax over the (length-2) key axis
        m = jnp.maximum(s_same, s_cross)
        e_same = jnp.exp(s_same - m)
        e_cross = jnp.exp(s_cross - m)
        r = pl.reciprocal(e_same + e_cross, approx=True)
        # expand per-head weights back to embedding lanes and combine values
        w_same = dot(e_same * r, seg_expand)
        w_cross = dot(e_cross * r, seg_expand)
        ctx = w_same * v + w_cross * v_sw

        x = x + dot(ctx, mat(f"wo_{l}")) + vec(f"bo_{l}")

        # ---- feed-forward block (norm_first) ----
        g = ln(x, f"ln2_w_{l}", f"ln2_b_{l}")
        f1 = _gelu(dot(g, mat(f"w1_{l}")) + vec(f"b1_{l}"))
        x = x + dot(f1, mat(f"w2_{l}")) + vec(f"b2_{l}")

    # transformed.mean(dim=1) over the stacked sequence of length 2
    pooled = 0.5 * (x[:TB, :] + x[TB:, :])

    # affinity head: LN -> Linear -> GELU -> Linear -> GELU -> Linear(->1)
    # (Dropout layers are identity at inference.)
    z = ln(pooled, "hln_w", "hln_b")
    z = _gelu(dot(z, mat("h1_w")) + vec("h1_b"))
    z = _gelu(dot(z, mat("h2_w")) + vec("h2_b"))
    # lane-dense store: affinity lands in lane 0, remaining lanes are zero
    out_ref[...] = dot(z, mat("h3_w")) + vec("h3_b")


@jax.jit
def protein_affinity_forward(p1, p2, slab):
    batch = p1.shape[0]
    assert batch % BATCH_TILE == 0, "batch must be a multiple of BATCH_TILE"
    n_tiles = batch // BATCH_TILE
    rows = 2 * BATCH_TILE

    n_matmuls = 1 + NUM_LAYERS * 10 + 3
    cost = pl.CostEstimate(
        flops=int(n_tiles * n_matmuls * 2 * rows * LANES * LANES),
        transcendentals=int(n_tiles * (NUM_LAYERS * 3 + 3) * rows * LANES),
        bytes_accessed=int(slab.size * 4 + p1.size * 4 + p2.size * 4
                           + batch * LANES * 4),
    )

    out_padded = pl.pallas_call(
        _affinity_kernel,
        out_shape=jax.ShapeDtypeStruct((batch, LANES), jnp.float32),
        grid=(n_tiles,),
        in_specs=[
            pl.BlockSpec((BATCH_TILE, INPUT_DIM), lambda i: (i, 0)),
            pl.BlockSpec((BATCH_TILE, INPUT_DIM), lambda i: (i, 0)),
            # constant index_map -> slab DMA'd once, resident across steps
            pl.BlockSpec((_SLAB_ROWS, LANES), lambda i: (0, 0)),
        ],
        out_specs=pl.BlockSpec((BATCH_TILE, LANES), lambda i: (i, 0)),
        compiler_params=pltpu.CompilerParams(
            dimension_semantics=("parallel",)),
        cost_estimate=cost,
    )(p1, p2, slab)
    return out_padded[:, :1]


# ----------------------------------------------------------------------------
# parameter init + pure-JAX reference (independent per-head softmax math)
# ----------------------------------------------------------------------------
def init_params(key):
    kit = iter(jax.random.split(key, 64))

    def w(shape, scale=0.05):
        return (scale * jax.random.normal(next(kit), shape)).astype(jnp.float32)

    ones = lambda s: jnp.ones(s, jnp.float32)
    zeros = lambda s: jnp.zeros(s, jnp.float32)

    pd = {
        "proj_w": w((INPUT_DIM, EMBED_DIM)), "proj_b": w((1, EMBED_DIM)),
        "hln_w": ones((1, EMBED_DIM)), "hln_b": zeros((1, EMBED_DIM)),
        "h1_w": w((EMBED_DIM, LINEAR_DIM)), "h1_b": w((1, LINEAR_DIM)),
        "h2_w": w((LINEAR_DIM, LINEAR_DIM // 2)), "h2_b": w((1, LINEAR_DIM // 2)),
        "h3_w": w((LINEAR_DIM // 2, 1)), "h3_b": w((1, 1)),
    }
    for l in range(NUM_LAYERS):
        pd[f"ln1_w_{l}"] = ones((1, EMBED_DIM)); pd[f"ln1_b_{l}"] = zeros((1, EMBED_DIM))
        pd[f"wq_{l}"] = w((EMBED_DIM, EMBED_DIM)); pd[f"bq_{l}"] = w((1, EMBED_DIM))
        pd[f"wk_{l}"] = w((EMBED_DIM, EMBED_DIM)); pd[f"bk_{l}"] = w((1, EMBED_DIM))
        pd[f"wv_{l}"] = w((EMBED_DIM, EMBED_DIM)); pd[f"bv_{l}"] = w((1, EMBED_DIM))
        pd[f"wo_{l}"] = w((EMBED_DIM, EMBED_DIM)); pd[f"bo_{l}"] = w((1, EMBED_DIM))
        pd[f"ln2_w_{l}"] = ones((1, EMBED_DIM)); pd[f"ln2_b_{l}"] = zeros((1, EMBED_DIM))
        pd[f"w1_{l}"] = w((EMBED_DIM, FFN_DIM)); pd[f"b1_{l}"] = w((1, FFN_DIM))
        pd[f"w2_{l}"] = w((FFN_DIM, EMBED_DIM)); pd[f"b2_{l}"] = w((1, EMBED_DIM))

    # constant block-diagonal head-segment matrices
    lane_head = np.arange(EMBED_DIM) // HEAD_DIM
    seg = (lane_head[:, None] == np.arange(NUM_HEADS)[None, :]).astype(np.float32)
    pd["seg_score"] = jnp.asarray(seg / math.sqrt(HEAD_DIM))   # (E, H)
    pd["seg_expand"] = jnp.asarray(seg.T)                      # (H, E)
    return pd


def _reference_forward(p1, p2, pd):
    """Independent pure-JAX reference (standard per-head softmax attention)."""
    hp = jax.lax.Precision.HIGHEST

    def dot(a, b):
        return jnp.dot(a, b, precision=hp, preferred_element_type=jnp.float32)

    def ein(s, *xs):
        return jnp.einsum(s, *xs, precision=hp)

    x0 = dot(p1, pd["proj_w"]) + pd["proj_b"]
    x1 = dot(p2, pd["proj_w"]) + pd["proj_b"]
    x = jnp.stack([x0, x1], axis=1)                            # (B, 2, E)
    b = x.shape[0]
    for l in range(NUM_LAYERS):
        h = _layer_norm_ref(x, pd[f"ln1_w_{l}"], pd[f"ln1_b_{l}"])
        q = ein("bse,ef->bsf", h, pd[f"wq_{l}"]) + pd[f"bq_{l}"]
        k = ein("bse,ef->bsf", h, pd[f"wk_{l}"]) + pd[f"bk_{l}"]
        v = ein("bse,ef->bsf", h, pd[f"wv_{l}"]) + pd[f"bv_{l}"]
        qh = q.reshape(b, 2, NUM_HEADS, HEAD_DIM)
        kh = k.reshape(b, 2, NUM_HEADS, HEAD_DIM)
        vh = v.reshape(b, 2, NUM_HEADS, HEAD_DIM)
        s = ein("bqhd,bkhd->bhqk", qh, kh) / math.sqrt(HEAD_DIM)
        a = jax.nn.softmax(s, axis=-1)
        ctx = ein("bhqk,bkhd->bqhd", a, vh).reshape(b, 2, EMBED_DIM)
        x = x + ein("bse,ef->bsf", ctx, pd[f"wo_{l}"]) + pd[f"bo_{l}"]
        g = _layer_norm_ref(x, pd[f"ln2_w_{l}"], pd[f"ln2_b_{l}"])
        f = ein("bse,ef->bsf",
                _gelu(ein("bse,ef->bsf", g, pd[f"w1_{l}"]) + pd[f"b1_{l}"]),
                pd[f"w2_{l}"]) + pd[f"b2_{l}"]
        x = x + f
    pooled = x.mean(axis=1)
    z = _layer_norm_ref(pooled, pd["hln_w"], pd["hln_b"])
    z = _gelu(dot(z, pd["h1_w"]) + pd["h1_b"])
    z = _gelu(dot(z, pd["h2_w"]) + pd["h2_b"])
    return dot(z, pd["h3_w"]) + pd["h3_b"]


if __name__ == "__main__":
    key = jax.random.PRNGKey(0)
    k1, k2, kp = jax.random.split(key, 3)
    p1 = jax.random.normal(k1, (BATCH, INPUT_DIM), dtype=jnp.float32)
    p2 = jax.random.normal(k2, (BATCH, INPUT_DIM), dtype=jnp.float32)

    pd = init_params(kp)
    slab = pack_params(pd)     # single (rows, 128) f32 parameter slab (~1.7 MiB)

    out = jax.block_until_ready(protein_affinity_forward(p1, p2, slab))

    # independent pure-JAX reference (standard multi-head softmax attention)
    ref = jax.block_until_ready(_reference_forward(p1, p2, pd))
    np.testing.assert_allclose(np.asarray(out), np.asarray(ref), rtol=2e-2, atol=2e-3)
    assert out.shape == (BATCH, 1)
    # TODO(synk): exact torch-parity (erf GELU / HIGHEST-precision dots) needs
    # EXACT_GELU=True and precision=HIGHEST in the kernel dots; not required here.
    print("KERNEL_OK")
</pallas_src>

<mosaic_0001>
module attributes {stable_mosaic.version = 11 : i64} {
  func.func @_affinity_kernel(%arg0: i32, %arg1: memref<8x64xf32, #tpu.memory_space<vmem>>, %arg2: memref<8x64xf32, #tpu.memory_space<vmem>>, %arg3: memref<3296x128xf32, #tpu.memory_space<vmem>>, %arg4: memref<8x128xf32, #tpu.memory_space<vmem>>) attributes {dimension_semantics = [#tpu.dimension_semantics<parallel>], iteration_bounds = array<i64: 2>, scalar_prefetch = 0 : i64, scratch_operands = 0 : i64, tpu.core_type = #tpu.core_type<tc>, window_params = [{transform_indices = @transform_0, window_bounds = array<i64: 8, 64>}, {transform_indices = @transform_1, window_bounds = array<i64: 8, 64>}, {pipeline_mode = #tpu.pipeline_mode<synchronous>, transform_indices = @transform_2, window_bounds = array<i64: 3296, 128>}, {transform_indices = @transform_3, window_bounds = array<i64: 8, 128>}]} {
    %c72 = arith.constant 72 : index
    %c0 = arith.constant 0 : index
    %0 = vector.load %arg3[%c72, %c0] : memref<3296x128xf32, #tpu.memory_space<vmem>>, vector<128x128xf32>
    %c200 = arith.constant 200 : index
    %c0_0 = arith.constant 0 : index
    %1 = vector.load %arg3[%c200, %c0_0] : memref<3296x128xf32, #tpu.memory_space<vmem>>, vector<128x128xf32>
    %c0_1 = arith.constant 0 : index
    %c0_2 = arith.constant 0 : index
    %2 = vector.load %arg1[%c0_1, %c0_2] : memref<8x64xf32, #tpu.memory_space<vmem>>, vector<8x64xf32>
    %c0_3 = arith.constant 0 : index
    %c0_4 = arith.constant 0 : index
    %3 = vector.load %arg2[%c0_3, %c0_4] : memref<8x64xf32, #tpu.memory_space<vmem>>, vector<8x64xf32>
    %4 = tpu.concatenate %2, %3 in 0 : vector<8x64xf32>, vector<8x64xf32> -> vector<16x64xf32>
    %c0_5 = arith.constant 0 : index
    %c0_6 = arith.constant 0 : index
    %5 = vector.load %arg3[%c0_5, %c0_6] : memref<3296x128xf32, #tpu.memory_space<vmem>>, vector<64x128xf32>
    %cst = arith.constant dense<0.000000e+00> : vector<16x128xf32>
    %6 = tpu.matmul %4, %5, %cst {dimension_numbers = #tpu.dot_dimension_numbers<[1], [0], [0], [1], [0, 0, 1, 1], [], []>} : vector<16x64xf32>, vector<64x128xf32>, vector<16x128xf32> -> vector<16x128xf32>
    %c64 = arith.constant 64 : index
    %c0_7 = arith.constant 0 : index
    %7 = vector.load %arg3[%c64, %c0_7] : memref<3296x128xf32, #tpu.memory_space<vmem>>, vector<1x128xf32>
    %8 = vector.broadcast %7 : vector<1x128xf32> to vector<16x128xf32>
    %9 = arith.addf %6, %8 : vector<16x128xf32>
    %cst_8 = arith.constant dense<0.000000e+00> : vector<16xf32>
    %10 = vector.multi_reduction <add>, %9, %cst_8 [1] : vector<16x128xf32> to vector<16xf32>
    %11 = vector.shape_cast %10 : vector<16xf32> to vector<16x1xf32>
    %cst_9 = arith.constant 3.125000e-02 : f32
    %12 = vector.broadcast %cst_9 : f32 to vector<16x1xf32>
    %13 = arith.mulf %11, %12 : vector<16x1xf32>
    %14 = arith.mulf %9, %9 : vector<16x128xf32>
    %cst_10 = arith.constant dense<0.000000e+00> : vector<16xf32>
    %15 = vector.multi_reduction <add>, %14, %cst_10 [1] : vector<16x128xf32> to vector<16xf32>
    %16 = vector.shape_cast %15 : vector<16xf32> to vector<16x1xf32>
    %cst_11 = arith.constant 3.125000e-02 : f32
    %17 = vector.broadcast %cst_11 : f32 to vector<16x1xf32>
    %18 = arith.mulf %16, %17 : vector<16x1xf32>
    %19 = arith.mulf %13, %13 : vector<16x1xf32>
    %20 = arith.subf %18, %19 : vector<16x1xf32>
    %21 = vector.broadcast %13 : vector<16x1xf32> to vector<16x128xf32>
    %22 = arith.subf %9, %21 : vector<16x128xf32>
    %cst_12 = arith.constant 9.99999974E-6 : f32
    %23 = vector.broadcast %cst_12 : f32 to vector<16x1xf32>
    %24 = arith.addf %20, %23 : vector<16x1xf32>
    %25 = math.rsqrt %24 : vector<16x1xf32>
    %26 = vector.broadcast %25 : vector<16x1xf32> to vector<16x128xf32>
    %27 = arith.mulf %22, %26 : vector<16x128xf32>
    %c328 = arith.constant 328 : index
    %c0_13 = arith.constant 0 : index
    %28 = vector.load %arg3[%c328, %c0_13] : memref<3296x128xf32, #tpu.memory_space<vmem>>, vector<1x128xf32>
    %29 = vector.broadcast %28 : vector<1x128xf32> to vector<16x128xf32>
    %30 = arith.mulf %27, %29 : vector<16x128xf32>
    %c336 = arith.constant 336 : index
    %c0_14 = arith.constant 0 : index
    %31 = vector.load %arg3[%c336, %c0_14] : memref<3296x128xf32, #tpu.memory_space<vmem>>, vector<1x128xf32>
    %32 = vector.broadcast %31 : vector<1x128xf32> to vector<16x128xf32>
    %33 = arith.addf %30, %32 : vector<16x128xf32>
    %c344 = arith.constant 344 : index
    %c0_15 = arith.constant 0 : index
    %34 = vector.load %arg3[%c344, %c0_15] : memref<3296x128xf32, #tpu.memory_space<vmem>>, vector<128x128xf32>
    %cst_16 = arith.constant dense<0.000000e+00> : vector<16x128xf32>
    %35 = tpu.matmul %33, %34, %cst_16 {dimension_numbers = #tpu.dot_dimension_numbers<[1], [0], [0], [1], [0, 0, 1, 1], [], []>} : vector<16x128xf32>, vector<128x128xf32>, vector<16x128xf32> -> vector<16x128xf32>
    %c472 = arith.constant 472 : index
    %c0_17 = arith.constant 0 : index
    %36 = vector.load %arg3[%c472, %c0_17] : memref<3296x128xf32, #tpu.memory_space<vmem>>, vector<1x128xf32>
    %37 = vector.broadcast %36 : vector<1x128xf32> to vector<16x128xf32>
    %38 = arith.addf %35, %37 : vector<16x128xf32>
    %c480 = arith.constant 480 : index
    %c0_18 = arith.constant 0 : index
    %39 = vector.load %arg3[%c480, %c0_18] : memref<3296x128xf32, #tpu.memory_space<vmem>>, vector<128x128xf32>
    %cst_19 = arith.constant dense<0.000000e+00> : vector<16x128xf32>
    %40 = tpu.matmul %33, %39, %cst_19 {dimension_numbers = #tpu.dot_dimension_numbers<[1], [0], [0], [1], [0, 0, 1, 1], [], []>} : vector<16x128xf32>, vector<128x128xf32>, vector<16x128xf32> -> vector<16x128xf32>
    %c608 = arith.constant 608 : index
    %c0_20 = arith.constant 0 : index
    %41 = vector.load %arg3[%c608, %c0_20] : memref<3296x128xf32, #tpu.memory_space<vmem>>, vector<1x128xf32>
    %42 = vector.broadcast %41 : vector<1x128xf32> to vector<16x128xf32>
    %43 = arith.addf %40, %42 : vector<16x128xf32>
    %c616 = arith.constant 616 : index
    %c0_21 = arith.constant 0 : index
    %44 = vector.load %arg3[%c616, %c0_21] : memref<3296x128xf32, #tpu.memory_space<vmem>>, vector<128x128xf32>
    %cst_22 = arith.constant dense<0.000000e+00> : vector<16x128xf32>
    %45 = tpu.matmul %33, %44, %cst_22 {dimension_numbers = #tpu.dot_dimension_numbers<[1], [0], [0], [1], [0, 0, 1, 1], [], []>} : vector<16x128xf32>, vector<128x128xf32>, vector<16x128xf32> -> vector<16x128xf32>
    %c744 = arith.constant 744 : index
    %c0_23 = arith.constant 0 : index
    %46 = vector.load %arg3[%c744, %c0_23] : memref<3296x128xf32, #tpu.memory_space<vmem>>, vector<1x128xf32>
    %47 = vector.broadcast %46 : vector<1x128xf32> to vector<16x128xf32>
    %48 = arith.addf %45, %47 : vector<16x128xf32>
    %c8_i32 = arith.constant 8 : i32
    %49 = tpu.dynamic_rotate %43 by %c8_i32 dim 0 : vector<16x128xf32>, i32 -> vector<16x128xf32>
    %c8_i32_24 = arith.constant 8 : i32
    %50 = tpu.dynamic_rotate %48 by %c8_i32_24 dim 0 : vector<16x128xf32>, i32 -> vector<16x128xf32>
    %51 = arith.mulf %38, %43 : vector<16x128xf32>
    %cst_25 = arith.constant dense<0.000000e+00> : vector<16x128xf32>
    %52 = tpu.matmul %51, %0, %cst_25 {dimension_numbers = #tpu.dot_dimension_numbers<[1], [0], [0], [1], [0, 0, 1, 1], [], []>} : vector<16x128xf32>, vector<128x128xf32>, vector<16x128xf32> -> vector<16x128xf32>
    %53 = arith.mulf %38, %49 : vector<16x128xf32>
    %cst_26 = arith.constant dense<0.000000e+00> : vector<16x128xf32>
    %54 = tpu.matmul %53, %0, %cst_26 {dimension_numbers = #tpu.dot_dimension_numbers<[1], [0], [0], [1], [0, 0, 1, 1], [], []>} : vector<16x128xf32>, vector<128x128xf32>, vector<16x128xf32> -> vector<16x128xf32>
    %55 = arith.maximumf %52, %54 : vector<16x128xf32>
    %56 = arith.subf %52, %55 : vector<16x128xf32>
    %57 = math.exp %56 : vector<16x128xf32>
    %58 = arith.subf %54, %55 : vector<16x128xf32>
    %59 = math.exp %58 : vector<16x128xf32>
    %60 = arith.addf %57, %59 : vector<16x128xf32>
    %61 = tpu.reciprocal %60 {approx = true} : vector<16x128xf32> -> vector<16x128xf32>
    %62 = arith.mulf %57, %61 : vector<16x128xf32>
    %cst_27 = arith.constant dense<0.000000e+00> : vector<16x128xf32>
    %63 = tpu.matmul %62, %1, %cst_27 {dimension_numbers = #tpu.dot_dimension_numbers<[1], [0], [0], [1], [0, 0, 1, 1], [], []>} : vector<16x128xf32>, vector<128x128xf32>, vector<16x128xf32> -> vector<16x128xf32>
    %64 = arith.mulf %59, %61 : vector<16x128xf32>
    %cst_28 = arith.constant dense<0.000000e+00> : vector<16x128xf32>
    %65 = tpu.matmul %64, %1, %cst_28 {dimension_numbers = #tpu.dot_dimension_numbers<[1], [0], [0], [1], [0, 0, 1, 1], [], []>} : vector<16x128xf32>, vector<128x128xf32>, vector<16x128xf32> -> vector<16x128xf32>
    %66 = arith.mulf %63, %48 : vector<16x128xf32>
    %67 = arith.mulf %65, %50 : vector<16x128xf32>
    %68 = arith.addf %66, %67 : vector<16x128xf32>
    %c752 = arith.constant 752 : index
    %c0_29 = arith.constant 0 : index
    %69 = vector.load %arg3[%c752, %c0_29] : memref<3296x128xf32, #tpu.memory_space<vmem>>, vector<128x128xf32>
    %cst_30 = arith.constant dense<0.000000e+00> : vector<16x128xf32>
    %70 = tpu.matmul %68, %69, %cst_30 {dimension_numbers = #tpu.dot_dimension_numbers<[1], [0], [0], [1], [0, 0, 1, 1], [], []>} : vector<16x128xf32>, vector<128x128xf32>, vector<16x128xf32> -> vector<16x128xf32>
    %71 = arith.addf %9, %70 : vector<16x128xf32>
    %c880 = arith.constant 880 : index
    %c0_31 = arith.constant 0 : index
    %72 = vector.load %arg3[%c880, %c0_31] : memref<3296x128xf32, #tpu.memory_space<vmem>>, vector<1x128xf32>
    %73 = vector.broadcast %72 : vector<1x128xf32> to vector<16x128xf32>
    %74 = arith.addf %71, %73 : vector<16x128xf32>
    %cst_32 = arith.constant dense<0.000000e+00> : vector<16xf32>
    %75 = vector.multi_reduction <add>, %74, %cst_32 [1] : vector<16x128xf32> to vector<16xf32>
    %76 = vector.shape_cast %75 : vector<16xf32> to vector<16x1xf32>
    %cst_33 = arith.constant 3.125000e-02 : f32
    %77 = vector.broadcast %cst_33 : f32 to vector<16x1xf32>
    %78 = arith.mulf %76, %77 : vector<16x1xf32>
    %79 = arith.mulf %74, %74 : vector<16x128xf32>
    %cst_34 = arith.constant dense<0.000000e+00> : vector<16xf32>
    %80 = vector.multi_reduction <add>, %79, %cst_34 [1] : vector<16x128xf32> to vector<16xf32>
    %81 = vector.shape_cast %80 : vector<16xf32> to vector<16x1xf32>
    %cst_35 = arith.constant 3.125000e-02 : f32
    %82 = vector.broadcast %cst_35 : f32 to vector<16x1xf32>
    %83 = arith.mulf %81, %82 : vector<16x1xf32>
    %84 = arith.mulf %78, %78 : vector<16x1xf32>
    %85 = arith.subf %83, %84 : vector<16x1xf32>
    %86 = vector.broadcast %78 : vector<16x1xf32> to vector<16x128xf32>
    %87 = arith.subf %74, %86 : vector<16x128xf32>
    %cst_36 = arith.constant 9.99999974E-6 : f32
    %88 = vector.broadcast %cst_36 : f32 to vector<16x1xf32>
    %89 = arith.addf %85, %88 : vector<16x1xf32>
    %90 = math.rsqrt %89 : vector<16x1xf32>
    %91 = vector.broadcast %90 : vector<16x1xf32> to vector<16x128xf32>
    %92 = arith.mulf %87, %91 : vector<16x128xf32>
    %c888 = arith.constant 888 : index
    %c0_37 = arith.constant 0 : index
    %93 = vector.load %arg3[%c888, %c0_37] : memref<3296x128xf32, #tpu.memory_space<vmem>>, vector<1x128xf32>
    %94 = vector.broadcast %93 : vector<1x128xf32> to vector<16x128xf32>
    %95 = arith.mulf %92, %94 : vector<16x128xf32>
    %c896 = arith.constant 896 : index
    %c0_38 = arith.constant 0 : index
    %96 = vector.load %arg3[%c896, %c0_38] : memref<3296x128xf32, #tpu.memory_space<vmem>>, vector<1x128xf32>
    %97 = vector.broadcast %96 : vector<1x128xf32> to vector<16x128xf32>
    %98 = arith.addf %95, %97 : vector<16x128xf32>
    %c904 = arith.constant 904 : index
    %c0_39 = arith.constant 0 : index
    %99 = vector.load %arg3[%c904, %c0_39] : memref<3296x128xf32, #tpu.memory_space<vmem>>, vector<128x128xf32>
    %cst_40 = arith.constant dense<0.000000e+00> : vector<16x128xf32>
    %100 = tpu.matmul %98, %99, %cst_40 {dimension_numbers = #tpu.dot_dimension_numbers<[1], [0], [0], [1], [0, 0, 1, 1], [], []>} : vector<16x128xf32>, vector<128x128xf32>, vector<16x128xf32> -> vector<16x128xf32>
    %c1032 = arith.constant 1032 : index
    %c0_41 = arith.constant 0 : index
    %101 = vector.load %arg3[%c1032, %c0_41] : memref<3296x128xf32, #tpu.memory_space<vmem>>, vector<1x128xf32>
    %102 = vector.broadcast %101 : vector<1x128xf32> to vector<16x128xf32>
    %103 = arith.addf %100, %102 : vector<16x128xf32>
    %cst_42 = arith.constant 5.000000e-01 : f32
    %104 = vector.broadcast %cst_42 : f32 to vector<16x128xf32>
    %105 = arith.mulf %104, %103 : vector<16x128xf32>
    %cst_43 = arith.constant 4.471500e-02 : f32
    %106 = vector.broadcast %cst_43 : f32 to vector<16x128xf32>
    %107 = arith.mulf %106, %103 : vector<16x128xf32>
    %108 = arith.mulf %107, %103 : vector<16x128xf32>
    %109 = arith.mulf %108, %103 : vector<16x128xf32>
    %110 = arith.addf %103, %109 : vector<16x128xf32>
    %cst_44 = arith.constant 0.797884583 : f32
    %111 = vector.broadcast %cst_44 : f32 to vector<16x128xf32>
    %112 = arith.mulf %111, %110 : vector<16x128xf32>
    %113 = math.tanh %112 : vector<16x128xf32>
    %cst_45 = arith.constant 1.000000e+00 : f32
    %114 = vector.broadcast %cst_45 : f32 to vector<16x128xf32>
    %115 = arith.addf %114, %113 : vector<16x128xf32>
    %116 = arith.mulf %105, %115 : vector<16x128xf32>
    %c1040 = arith.constant 1040 : index
    %c0_46 = arith.constant 0 : index
    %117 = vector.load %arg3[%c1040, %c0_46] : memref<3296x128xf32, #tpu.memory_space<vmem>>, vector<128x128xf32>
    %cst_47 = arith.constant dense<0.000000e+00> : vector<16x128xf32>
    %118 = tpu.matmul %116, %117, %cst_47 {dimension_numbers = #tpu.dot_dimension_numbers<[1], [0], [0], [1], [0, 0, 1, 1], [], []>} : vector<16x128xf32>, vector<128x128xf32>, vector<16x128xf32> -> vector<16x128xf32>
    %119 = arith.addf %74, %118 : vector<16x128xf32>
    %c1168 = arith.constant 1168 : index
    %c0_48 = arith.constant 0 : index
    %120 = vector.load %arg3[%c1168, %c0_48] : memref<3296x128xf32, #tpu.memory_space<vmem>>, vector<1x128xf32>
    %121 = vector.broadcast %120 : vector<1x128xf32> to vector<16x128xf32>
    %122 = arith.addf %119, %121 : vector<16x128xf32>
    %cst_49 = arith.constant dense<0.000000e+00> : vector<16xf32>
    %123 = vector.multi_reduction <add>, %122, %cst_49 [1] : vector<16x128xf32> to vector<16xf32>
    %124 = vector.shape_cast %123 : vector<16xf32> to vector<16x1xf32>
    %cst_50 = arith.constant 3.125000e-02 : f32
    %125 = vector.broadcast %cst_50 : f32 to vector<16x1xf32>
    %126 = arith.mulf %124, %125 : vector<16x1xf32>
    %127 = arith.mulf %122, %122 : vector<16x128xf32>
    %cst_51 = arith.constant dense<0.000000e+00> : vector<16xf32>
    %128 = vector.multi_reduction <add>, %127, %cst_51 [1] : vector<16x128xf32> to vector<16xf32>
    %129 = vector.shape_cast %128 : vector<16xf32> to vector<16x1xf32>
    %cst_52 = arith.constant 3.125000e-02 : f32
    %130 = vector.broadcast %cst_52 : f32 to vector<16x1xf32>
    %131 = arith.mulf %129, %130 : vector<16x1xf32>
    %132 = arith.mulf %126, %126 : vector<16x1xf32>
    %133 = arith.subf %131, %132 : vector<16x1xf32>
    %134 = vector.broadcast %126 : vector<16x1xf32> to vector<16x128xf32>
    %135 = arith.subf %122, %134 : vector<16x128xf32>
    %cst_53 = arith.constant 9.99999974E-6 : f32
    %136 = vector.broadcast %cst_53 : f32 to vector<16x1xf32>
    %137 = arith.addf %133, %136 : vector<16x1xf32>
    %138 = math.rsqrt %137 : vector<16x1xf32>
    %139 = vector.broadcast %138 : vector<16x1xf32> to vector<16x128xf32>
    %140 = arith.mulf %135, %139 : vector<16x128xf32>
    %c1176 = arith.constant 1176 : index
    %c0_54 = arith.constant 0 : index
    %141 = vector.load %arg3[%c1176, %c0_54] : memref<3296x128xf32, #tpu.memory_space<vmem>>, vector<1x128xf32>
    %142 = vector.broadcast %141 : vector<1x128xf32> to vector<16x128xf32>
    %143 = arith.mulf %140, %142 : vector<16x128xf32>
    %c1184 = arith.constant 1184 : index
    %c0_55 = arith.constant 0 : index
    %144 = vector.load %arg3[%c1184, %c0_55] : memref<3296x128xf32, #tpu.memory_space<vmem>>, vector<1x128xf32>
    %145 = vector.broadcast %144 : vector<1x128xf32> to vector<16x128xf32>
    %146 = arith.addf %143, %145 : vector<16x128xf32>
    %c1192 = arith.constant 1192 : index
    %c0_56 = arith.constant 0 : index
    %147 = vector.load %arg3[%c1192, %c0_56] : memref<3296x128xf32, #tpu.memory_space<vmem>>, vector<128x128xf32>
    %cst_57 = arith.constant dense<0.000000e+00> : vector<16x128xf32>
    %148 = tpu.matmul %146, %147, %cst_57 {dimension_numbers = #tpu.dot_dimension_numbers<[1], [0], [0], [1], [0, 0, 1, 1], [], []>} : vector<16x128xf32>, vector<128x128xf32>, vector<16x128xf32> -> vector<16x128xf32>
    %c1320 = arith.constant 1320 : index
    %c0_58 = arith.constant 0 : index
    %149 = vector.load %arg3[%c1320, %c0_58] : memref<3296x128xf32, #tpu.memory_space<vmem>>, vector<1x128xf32>
    %150 = vector.broadcast %149 : vector<1x128xf32> to vector<16x128xf32>
    %151 = arith.addf %148, %150 : vector<16x128xf32>
    %c1328 = arith.constant 1328 : index
    %c0_59 = arith.constant 0 : index
    %152 = vector.load %arg3[%c1328, %c0_59] : memref<3296x128xf32, #tpu.memory_space<vmem>>, vector<128x128xf32>
    %cst_60 = arith.constant dense<0.000000e+00> : vector<16x128xf32>
    %153 = tpu.matmul %146, %152, %cst_60 {dimension_numbers = #tpu.dot_dimension_numbers<[1], [0], [0], [1], [0, 0, 1, 1], [], []>} : vector<16x128xf32>, vector<128x128xf32>, vector<16x128xf32> -> vector<16x128xf32>
    %c1456 = arith.constant 1456 : index
    %c0_61 = arith.constant 0 : index
    %154 = vector.load %arg3[%c1456, %c0_61] : memref<3296x128xf32, #tpu.memory_space<vmem>>, vector<1x128xf32>
    %155 = vector.broadcast %154 : vector<1x128xf32> to vector<16x128xf32>
    %156 = arith.addf %153, %155 : vector<16x128xf32>
    %c1464 = arith.constant 1464 : index
    %c0_62 = arith.constant 0 : index
    %157 = vector.load %arg3[%c1464, %c0_62] : memref<3296x128xf32, #tpu.memory_space<vmem>>, vector<128x128xf32>
    %cst_63 = arith.constant dense<0.000000e+00> : vector<16x128xf32>
    %158 = tpu.matmul %146, %157, %cst_63 {dimension_numbers = #tpu.dot_dimension_numbers<[1], [0], [0], [1], [0, 0, 1, 1], [], []>} : vector<16x128xf32>, vector<128x128xf32>, vector<16x128xf32> -> vector<16x128xf32>
    %c1592 = arith.constant 1592 : index
    %c0_64 = arith.constant 0 : index
    %159 = vector.load %arg3[%c1592, %c0_64] : memref<3296x128xf32, #tpu.memory_space<vmem>>, vector<1x128xf32>
    %160 = vector.broadcast %159 : vector<1x128xf32> to vector<16x128xf32>
    %161 = arith.addf %158, %160 : vector<16x128xf32>
    %c8_i32_65 = arith.constant 8 : i32
    %162 = tpu.dynamic_rotate %156 by %c8_i32_65 dim 0 : vector<16x128xf32>, i32 -> vector<16x128xf32>
    %c8_i32_66 = arith.constant 8 : i32
    %163 = tpu.dynamic_rotate %161 by %c8_i32_66 dim 0 : vector<16x128xf32>, i32 -> vector<16x128xf32>
    %164 = arith.mulf %151, %156 : vector<16x128xf32>
    %cst_67 = arith.constant dense<0.000000e+00> : vector<16x128xf32>
    %165 = tpu.matmul %164, %0, %cst_67 {dimension_numbers = #tpu.dot_dimension_numbers<[1], [0], [0], [1], [0, 0, 1, 1], [], []>} : vector<16x128xf32>, vector<128x128xf32>, vector<16x128xf32> -> vector<16x128xf32>
    %166 = arith.mulf %151, %162 : vector<16x128xf32>
    %cst_68 = arith.constant dense<0.000000e+00> : vector<16x128xf32>
    %167 = tpu.matmul %166, %0, %cst_68 {dimension_numbers = #tpu.dot_dimension_numbers<[1], [0], [0], [1], [0, 0, 1, 1], [], []>} : vector<16x128xf32>, vector<128x128xf32>, vector<16x128xf32> -> vector<16x128xf32>
    %168 = arith.maximumf %165, %167 : vector<16x128xf32>
    %169 = arith.subf %165, %168 : vector<16x128xf32>
    %170 = math.exp %169 : vector<16x128xf32>
    %171 = arith.subf %167, %168 : vector<16x128xf32>
    %172 = math.exp %171 : vector<16x128xf32>
    %173 = arith.addf %170, %172 : vector<16x128xf32>
    %174 = tpu.reciprocal %173 {approx = true} : vector<16x128xf32> -> vector<16x128xf32>
    %175 = arith.mulf %170, %174 : vector<16x128xf32>
    %cst_69 = arith.constant dense<0.000000e+00> : vector<16x128xf32>
    %176 = tpu.matmul %175, %1, %cst_69 {dimension_numbers = #tpu.dot_dimension_numbers<[1], [0], [0], [1], [0, 0, 1, 1], [], []>} : vector<16x128xf32>, vector<128x128xf32>, vector<16x128xf32> -> vector<16x128xf32>
    %177 = arith.mulf %172, %174 : vector<16x128xf32>
    %cst_70 = arith.constant dense<0.000000e+00> : vector<16x128xf32>
    %178 = tpu.matmul %177, %1, %cst_70 {dimension_numbers = #tpu.dot_dimension_numbers<[1], [0], [0], [1], [0, 0, 1, 1], [], []>} : vector<16x128xf32>, vector<128x128xf32>, vector<16x128xf32> -> vector<16x128xf32>
    %179 = arith.mulf %176, %161 : vector<16x128xf32>
    %180 = arith.mulf %178, %163 : vector<16x128xf32>
    %181 = arith.addf %179, %180 : vector<16x128xf32>
    %c1600 = arith.constant 1600 : index
    %c0_71 = arith.constant 0 : index
    %182 = vector.load %arg3[%c1600, %c0_71] : memref<3296x128xf32, #tpu.memory_space<vmem>>, vector<128x128xf32>
    %cst_72 = arith.constant dense<0.000000e+00> : vector<16x128xf32>
    %183 = tpu.matmul %181, %182, %cst_72 {dimension_numbers = #tpu.dot_dimension_numbers<[1], [0], [0], [1], [0, 0, 1, 1], [], []>} : vector<16x128xf32>, vector<128x128xf32>, vector<16x128xf32> -> vector<16x128xf32>
    %184 = arith.addf %122, %183 : vector<16x128xf32>
    %c1728 = arith.constant 1728 : index
    %c0_73 = arith.constant 0 : index
    %185 = vector.load %arg3[%c1728, %c0_73] : memref<3296x128xf32, #tpu.memory_space<vmem>>, vector<1x128xf32>
    %186 = vector.broadcast %185 : vector<1x128xf32> to vector<16x128xf32>
    %187 = arith.addf %184, %186 : vector<16x128xf32>
    %cst_74 = arith.constant dense<0.000000e+00> : vector<16xf32>
    %188 = vector.multi_reduction <add>, %187, %cst_74 [1] : vector<16x128xf32> to vector<16xf32>
    %189 = vector.shape_cast %188 : vector<16xf32> to vector<16x1xf32>
    %cst_75 = arith.constant 3.125000e-02 : f32
    %190 = vector.broadcast %cst_75 : f32 to vector<16x1xf32>
    %191 = arith.mulf %189, %190 : vector<16x1xf32>
    %192 = arith.mulf %187, %187 : vector<16x128xf32>
    %cst_76 = arith.constant dense<0.000000e+00> : vector<16xf32>
    %193 = vector.multi_reduction <add>, %192, %cst_76 [1] : vector<16x128xf32> to vector<16xf32>
    %194 = vector.shape_cast %193 : vector<16xf32> to vector<16x1xf32>
    %cst_77 = arith.constant 3.125000e-02 : f32
    %195 = vector.broadcast %cst_77 : f32 to vector<16x1xf32>
    %196 = arith.mulf %194, %195 : vector<16x1xf32>
    %197 = arith.mulf %191, %191 : vector<16x1xf32>
    %198 = arith.subf %196, %197 : vector<16x1xf32>
    %199 = vector.broadcast %191 : vector<16x1xf32> to vector<16x128xf32>
    %200 = arith.subf %187, %199 : vector<16x128xf32>
    %cst_78 = arith.constant 9.99999974E-6 : f32
    %201 = vector.broadcast %cst_78 : f32 to vector<16x1xf32>
    %202 = arith.addf %198, %201 : vector<16x1xf32>
    %203 = math.rsqrt %202 : vector<16x1xf32>
    %204 = vector.broadcast %203 : vector<16x1xf32> to vector<16x128xf32>
    %205 = arith.mulf %200, %204 : vector<16x128xf32>
    %c1736 = arith.constant 1736 : index
    %c0_79 = arith.constant 0 : index
    %206 = vector.load %arg3[%c1736, %c0_79] : memref<3296x128xf32, #tpu.memory_space<vmem>>, vector<1x128xf32>
    %207 = vector.broadcast %206 : vector<1x128xf32> to vector<16x128xf32>
    %208 = arith.mulf %205, %207 : vector<16x128xf32>
    %c1744 = arith.constant 1744 : index
    %c0_80 = arith.constant 0 : index
    %209 = vector.load %arg3[%c1744, %c0_80] : memref<3296x128xf32, #tpu.memory_space<vmem>>, vector<1x128xf32>
    %210 = vector.broadcast %209 : vector<1x128xf32> to vector<16x128xf32>
    %211 = arith.addf %208, %210 : vector<16x128xf32>
    %c1752 = arith.constant 1752 : index
    %c0_81 = arith.constant 0 : index
    %212 = vector.load %arg3[%c1752, %c0_81] : memref<3296x128xf32, #tpu.memory_space<vmem>>, vector<128x128xf32>
    %cst_82 = arith.constant dense<0.000000e+00> : vector<16x128xf32>
    %213 = tpu.matmul %211, %212, %cst_82 {dimension_numbers = #tpu.dot_dimension_numbers<[1], [0], [0], [1], [0, 0, 1, 1], [], []>} : vector<16x128xf32>, vector<128x128xf32>, vector<16x128xf32> -> vector<16x128xf32>
    %c1880 = arith.constant 1880 : index
    %c0_83 = arith.constant 0 : index
    %214 = vector.load %arg3[%c1880, %c0_83] : memref<3296x128xf32, #tpu.memory_space<vmem>>, vector<1x128xf32>
    %215 = vector.broadcast %214 : vector<1x128xf32> to vector<16x128xf32>
    %216 = arith.addf %213, %215 : vector<16x128xf32>
    %cst_84 = arith.constant 5.000000e-01 : f32
    %217 = vector.broadcast %cst_84 : f32 to vector<16x128xf32>
    %218 = arith.mulf %217, %216 : vector<16x128xf32>
    %cst_85 = arith.constant 4.471500e-02 : f32
    %219 = vector.broadcast %cst_85 : f32 to vector<16x128xf32>
    %220 = arith.mulf %219, %216 : vector<16x128xf32>
    %221 = arith.mulf %220, %216 : vector<16x128xf32>
    %222 = arith.mulf %221, %216 : vector<16x128xf32>
    %223 = arith.addf %216, %222 : vector<16x128xf32>
    %cst_86 = arith.constant 0.797884583 : f32
    %224 = vector.broadcast %cst_86 : f32 to vector<16x128xf32>
    %225 = arith.mulf %224, %223 : vector<16x128xf32>
    %226 = math.tanh %225 : vector<16x128xf32>
    %cst_87 = arith.constant 1.000000e+00 : f32
    %227 = vector.broadcast %cst_87 : f32 to vector<16x128xf32>
    %228 = arith.addf %227, %226 : vector<16x128xf32>
    %229 = arith.mulf %218, %228 : vector<16x128xf32>
    %c1888 = arith.constant 1888 : index
    %c0_88 = arith.constant 0 : index
    %230 = vector.load %arg3[%c1888, %c0_88] : memref<3296x128xf32, #tpu.memory_space<vmem>>, vector<128x128xf32>
    %cst_89 = arith.constant dense<0.000000e+00> : vector<16x128xf32>
    %231 = tpu.matmul %229, %230, %cst_89 {dimension_numbers = #tpu.dot_dimension_numbers<[1], [0], [0], [1], [0, 0, 1, 1], [], []>} : vector<16x128xf32>, vector<128x128xf32>, vector<16x128xf32> -> vector<16x128xf32>
    %232 = arith.addf %187, %231 : vector<16x128xf32>
    %c2016 = arith.constant 2016 : index
    %c0_90 = arith.constant 0 : index
    %233 = vector.load %arg3[%c2016, %c0_90] : memref<3296x128xf32, #tpu.memory_space<vmem>>, vector<1x128xf32>
    %234 = vector.broadcast %233 : vector<1x128xf32> to vector<16x128xf32>
    %235 = arith.addf %232, %234 : vector<16x128xf32>
    %cst_91 = arith.constant dense<0.000000e+00> : vector<16xf32>
    %236 = vector.multi_reduction <add>, %235, %cst_91 [1] : vector<16x128xf32> to vector<16xf32>
    %237 = vector.shape_cast %236 : vector<16xf32> to vector<16x1xf32>
    %cst_92 = arith.constant 3.125000e-02 : f32
    %238 = vector.broadcast %cst_92 : f32 to vector<16x1xf32>
    %239 = arith.mulf %237, %238 : vector<16x1xf32>
    %240 = arith.mulf %235, %235 : vector<16x128xf32>
    %cst_93 = arith.constant dense<0.000000e+00> : vector<16xf32>
    %241 = vector.multi_reduction <add>, %240, %cst_93 [1] : vector<16x128xf32> to vector<16xf32>
    %242 = vector.shape_cast %241 : vector<16xf32> to vector<16x1xf32>
    %cst_94 = arith.constant 3.125000e-02 : f32
    %243 = vector.broadcast %cst_94 : f32 to vector<16x1xf32>
    %244 = arith.mulf %242, %243 : vector<16x1xf32>
    %245 = arith.mulf %239, %239 : vector<16x1xf32>
    %246 = arith.subf %244, %245 : vector<16x1xf32>
    %247 = vector.broadcast %239 : vector<16x1xf32> to vector<16x128xf32>
    %248 = arith.subf %235, %247 : vector<16x128xf32>
    %cst_95 = arith.constant 9.99999974E-6 : f32
    %249 = vector.broadcast %cst_95 : f32 to vector<16x1xf32>
    %250 = arith.addf %246, %249 : vector<16x1xf32>
    %251 = math.rsqrt %250 : vector<16x1xf32>
    %252 = vector.broadcast %251 : vector<16x1xf32> to vector<16x128xf32>
    %253 = arith.mulf %248, %252 : vector<16x128xf32>
    %c2024 = arith.constant 2024 : index
    %c0_96 = arith.constant 0 : index
    %254 = vector.load %arg3[%c2024, %c0_96] : memref<3296x128xf32, #tpu.memory_space<vmem>>, vector<1x128xf32>
    %255 = vector.broadcast %254 : vector<1x128xf32> to vector<16x128xf32>
    %256 = arith.mulf %253, %255 : vector<16x128xf32>
    %c2032 = arith.constant 2032 : index
    %c0_97 = arith.constant 0 : index
    %257 = vector.load %arg3[%c2032, %c0_97] : memref<3296x128xf32, #tpu.memory_space<vmem>>, vector<1x128xf32>
    %258 = vector.broadcast %257 : vector<1x128xf32> to vector<16x128xf32>
    %259 = arith.addf %256, %258 : vector<16x128xf32>
    %c2040 = arith.constant 2040 : index
    %c0_98 = arith.constant 0 : index
    %260 = vector.load %arg3[%c2040, %c0_98] : memref<3296x128xf32, #tpu.memory_space<vmem>>, vector<128x128xf32>
    %cst_99 = arith.constant dense<0.000000e+00> : vector<16x128xf32>
    %261 = tpu.matmul %259, %260, %cst_99 {dimension_numbers = #tpu.dot_dimension_numbers<[1], [0], [0], [1], [0, 0, 1, 1], [], []>} : vector<16x128xf32>, vector<128x128xf32>, vector<16x128xf32> -> vector<16x128xf32>
    %c2168 = arith.constant 2168 : index
    %c0_100 = arith.constant 0 : index
    %262 = vector.load %arg3[%c2168, %c0_100] : memref<3296x128xf32, #tpu.memory_space<vmem>>, vector<1x128xf32>
    %263 = vector.broadcast %262 : vector<1x128xf32> to vector<16x128xf32>
    %264 = arith.addf %261, %263 : vector<16x128xf32>
    %c2176 = arith.constant 2176 : index
    %c0_101 = arith.constant 0 : index
    %265 = vector.load %arg3[%c2176, %c0_101] : memref<3296x128xf32, #tpu.memory_space<vmem>>, vector<128x128xf32>
    %cst_102 = arith.constant dense<0.000000e+00> : vector<16x128xf32>
    %266 = tpu.matmul %259, %265, %cst_102 {dimension_numbers = #tpu.dot_dimension_numbers<[1], [0], [0], [1], [0, 0, 1, 1], [], []>} : vector<16x128xf32>, vector<128x128xf32>, vector<16x128xf32> -> vector<16x128xf32>
    %c2304 = arith.constant 2304 : index
    %c0_103 = arith.constant 0 : index
    %267 = vector.load %arg3[%c2304, %c0_103] : memref<3296x128xf32, #tpu.memory_space<vmem>>, vector<1x128xf32>
    %268 = vector.broadcast %267 : vector<1x128xf32> to vector<16x128xf32>
    %269 = arith.addf %266, %268 : vector<16x128xf32>
    %c2312 = arith.constant 2312 : index
    %c0_104 = arith.constant 0 : index
    %270 = vector.load %arg3[%c2312, %c0_104] : memref<3296x128xf32, #tpu.memory_space<vmem>>, vector<128x128xf32>
    %cst_105 = arith.constant dense<0.000000e+00> : vector<16x128xf32>
    %271 = tpu.matmul %259, %270, %cst_105 {dimension_numbers = #tpu.dot_dimension_numbers<[1], [0], [0], [1], [0, 0, 1, 1], [], []>} : vector<16x128xf32>, vector<128x128xf32>, vector<16x128xf32> -> vector<16x128xf32>
    %c2440 = arith.constant 2440 : index
    %c0_106 = arith.constant 0 : index
    %272 = vector.load %arg3[%c2440, %c0_106] : memref<3296x128xf32, #tpu.memory_space<vmem>>, vector<1x128xf32>
    %273 = vector.broadcast %272 : vector<1x128xf32> to vector<16x128xf32>
    %274 = arith.addf %271, %273 : vector<16x128xf32>
    %c8_i32_107 = arith.constant 8 : i32
    %275 = tpu.dynamic_rotate %269 by %c8_i32_107 dim 0 : vector<16x128xf32>, i32 -> vector<16x128xf32>
    %c8_i32_108 = arith.constant 8 : i32
    %276 = tpu.dynamic_rotate %274 by %c8_i32_108 dim 0 : vector<16x128xf32>, i32 -> vector<16x128xf32>
    %277 = arith.mulf %264, %269 : vector<16x128xf32>
    %cst_109 = arith.constant dense<0.000000e+00> : vector<16x128xf32>
    %278 = tpu.matmul %277, %0, %cst_109 {dimension_numbers = #tpu.dot_dimension_numbers<[1], [0], [0], [1], [0, 0, 1, 1], [], []>} : vector<16x128xf32>, vector<128x128xf32>, vector<16x128xf32> -> vector<16x128xf32>
    %279 = arith.mulf %264, %275 : vector<16x128xf32>
    %cst_110 = arith.constant dense<0.000000e+00> : vector<16x128xf32>
    %280 = tpu.matmul %279, %0, %cst_110 {dimension_numbers = #tpu.dot_dimension_numbers<[1], [0], [0], [1], [0, 0, 1, 1], [], []>} : vector<16x128xf32>, vector<128x128xf32>, vector<16x128xf32> -> vector<16x128xf32>
    %281 = arith.maximumf %278, %280 : vector<16x128xf32>
    %282 = arith.subf %278, %281 : vector<16x128xf32>
    %283 = math.exp %282 : vector<16x128xf32>
    %284 = arith.subf %280, %281 : vector<16x128xf32>
    %285 = math.exp %284 : vector<16x128xf32>
    %286 = arith.addf %283, %285 : vector<16x128xf32>
    %287 = tpu.reciprocal %286 {approx = true} : vector<16x128xf32> -> vector<16x128xf32>
    %288 = arith.mulf %283, %287 : vector<16x128xf32>
    %cst_111 = arith.constant dense<0.000000e+00> : vector<16x128xf32>
    %289 = tpu.matmul %288, %1, %cst_111 {dimension_numbers = #tpu.dot_dimension_numbers<[1], [0], [0], [1], [0, 0, 1, 1], [], []>} : vector<16x128xf32>, vector<128x128xf32>, vector<16x128xf32> -> vector<16x128xf32>
    %290 = arith.mulf %285, %287 : vector<16x128xf32>
    %cst_112 = arith.constant dense<0.000000e+00> : vector<16x128xf32>
    %291 = tpu.matmul %290, %1, %cst_112 {dimension_numbers = #tpu.dot_dimension_numbers<[1], [0], [0], [1], [0, 0, 1, 1], [], []>} : vector<16x128xf32>, vector<128x128xf32>, vector<16x128xf32> -> vector<16x128xf32>
    %292 = arith.mulf %289, %274 : vector<16x128xf32>
    %293 = arith.mulf %291, %276 : vector<16x128xf32>
    %294 = arith.addf %292, %293 : vector<16x128xf32>
    %c2448 = arith.constant 2448 : index
    %c0_113 = arith.constant 0 : index
    %295 = vector.load %arg3[%c2448, %c0_113] : memref<3296x128xf32, #tpu.memory_space<vmem>>, vector<128x128xf32>
    %cst_114 = arith.constant dense<0.000000e+00> : vector<16x128xf32>
    %296 = tpu.matmul %294, %295, %cst_114 {dimension_numbers = #tpu.dot_dimension_numbers<[1], [0], [0], [1], [0, 0, 1, 1], [], []>} : vector<16x128xf32>, vector<128x128xf32>, vector<16x128xf32> -> vector<16x128xf32>
    %297 = arith.addf %235, %296 : vector<16x128xf32>
    %c2576 = arith.constant 2576 : index
    %c0_115 = arith.constant 0 : index
    %298 = vector.load %arg3[%c2576, %c0_115] : memref<3296x128xf32, #tpu.memory_space<vmem>>, vector<1x128xf32>
    %299 = vector.broadcast %298 : vector<1x128xf32> to vector<16x128xf32>
    %300 = arith.addf %297, %299 : vector<16x128xf32>
    %cst_116 = arith.constant dense<0.000000e+00> : vector<16xf32>
    %301 = vector.multi_reduction <add>, %300, %cst_116 [1] : vector<16x128xf32> to vector<16xf32>
    %302 = vector.shape_cast %301 : vector<16xf32> to vector<16x1xf32>
    %cst_117 = arith.constant 3.125000e-02 : f32
    %303 = vector.broadcast %cst_117 : f32 to vector<16x1xf32>
    %304 = arith.mulf %302, %303 : vector<16x1xf32>
    %305 = arith.mulf %300, %300 : vector<16x128xf32>
    %cst_118 = arith.constant dense<0.000000e+00> : vector<16xf32>
    %306 = vector.multi_reduction <add>, %305, %cst_118 [1] : vector<16x128xf32> to vector<16xf32>
    %307 = vector.shape_cast %306 : vector<16xf32> to vector<16x1xf32>
    %cst_119 = arith.constant 3.125000e-02 : f32
    %308 = vector.broadcast %cst_119 : f32 to vector<16x1xf32>
    %309 = arith.mulf %307, %308 : vector<16x1xf32>
    %310 = arith.mulf %304, %304 : vector<16x1xf32>
    %311 = arith.subf %309, %310 : vector<16x1xf32>
    %312 = vector.broadcast %304 : vector<16x1xf32> to vector<16x128xf32>
    %313 = arith.subf %300, %312 : vector<16x128xf32>
    %cst_120 = arith.constant 9.99999974E-6 : f32
    %314 = vector.broadcast %cst_120 : f32 to vector<16x1xf32>
    %315 = arith.addf %311, %314 : vector<16x1xf32>
    %316 = math.rsqrt %315 : vector<16x1xf32>
    %317 = vector.broadcast %316 : vector<16x1xf32> to vector<16x128xf32>
    %318 = arith.mulf %313, %317 : vector<16x128xf32>
    %c2584 = arith.constant 2584 : index
    %c0_121 = arith.constant 0 : index
    %319 = vector.load %arg3[%c2584, %c0_121] : memref<3296x128xf32, #tpu.memory_space<vmem>>, vector<1x128xf32>
    %320 = vector.broadcast %319 : vector<1x128xf32> to vector<16x128xf32>
    %321 = arith.mulf %318, %320 : vector<16x128xf32>
    %c2592 = arith.constant 2592 : index
    %c0_122 = arith.constant 0 : index
    %322 = vector.load %arg3[%c2592, %c0_122] : memref<3296x128xf32, #tpu.memory_space<vmem>>, vector<1x128xf32>
    %323 = vector.broadcast %322 : vector<1x128xf32> to vector<16x128xf32>
    %324 = arith.addf %321, %323 : vector<16x128xf32>
    %c2600 = arith.constant 2600 : index
    %c0_123 = arith.constant 0 : index
    %325 = vector.load %arg3[%c2600, %c0_123] : memref<3296x128xf32, #tpu.memory_space<vmem>>, vector<128x128xf32>
    %cst_124 = arith.constant dense<0.000000e+00> : vector<16x128xf32>
    %326 = tpu.matmul %324, %325, %cst_124 {dimension_numbers = #tpu.dot_dimension_numbers<[1], [0], [0], [1], [0, 0, 1, 1], [], []>} : vector<16x128xf32>, vector<128x128xf32>, vector<16x128xf32> -> vector<16x128xf32>
    %c2728 = arith.constant 2728 : index
    %c0_125 = arith.constant 0 : index
    %327 = vector.load %arg3[%c2728, %c0_125] : memref<3296x128xf32, #tpu.memory_space<vmem>>, vector<1x128xf32>
    %328 = vector.broadcast %327 : vector<1x128xf32> to vector<16x128xf32>
    %329 = arith.addf %326, %328 : vector<16x128xf32>
    %cst_126 = arith.constant 5.000000e-01 : f32
    %330 = vector.broadcast %cst_126 : f32 to vector<16x128xf32>
    %331 = arith.mulf %330, %329 : vector<16x128xf32>
    %cst_127 = arith.constant 4.471500e-02 : f32
    %332 = vector.broadcast %cst_127 : f32 to vector<16x128xf32>
    %333 = arith.mulf %332, %329 : vector<16x128xf32>
    %334 = arith.mulf %333, %329 : vector<16x128xf32>
    %335 = arith.mulf %334, %329 : vector<16x128xf32>
    %336 = arith.addf %329, %335 : vector<16x128xf32>
    %cst_128 = arith.constant 0.797884583 : f32
    %337 = vector.broadcast %cst_128 : f32 to vector<16x128xf32>
    %338 = arith.mulf %337, %336 : vector<16x128xf32>
    %339 = math.tanh %338 : vector<16x128xf32>
    %cst_129 = arith.constant 1.000000e+00 : f32
    %340 = vector.broadcast %cst_129 : f32 to vector<16x128xf32>
    %341 = arith.addf %340, %339 : vector<16x128xf32>
    %342 = arith.mulf %331, %341 : vector<16x128xf32>
    %c2736 = arith.constant 2736 : index
    %c0_130 = arith.constant 0 : index
    %343 = vector.load %arg3[%c2736, %c0_130] : memref<3296x128xf32, #tpu.memory_space<vmem>>, vector<128x128xf32>
    %cst_131 = arith.constant dense<0.000000e+00> : vector<16x128xf32>
    %344 = tpu.matmul %342, %343, %cst_131 {dimension_numbers = #tpu.dot_dimension_numbers<[1], [0], [0], [1], [0, 0, 1, 1], [], []>} : vector<16x128xf32>, vector<128x128xf32>, vector<16x128xf32> -> vector<16x128xf32>
    %345 = arith.addf %300, %344 : vector<16x128xf32>
    %c2864 = arith.constant 2864 : index
    %c0_132 = arith.constant 0 : index
    %346 = vector.load %arg3[%c2864, %c0_132] : memref<3296x128xf32, #tpu.memory_space<vmem>>, vector<1x128xf32>
    %347 = vector.broadcast %346 : vector<1x128xf32> to vector<16x128xf32>
    %348 = arith.addf %345, %347 : vector<16x128xf32>
    %349 = vector.extract_strided_slice %348 {offsets = [0, 0], sizes = [8, 128], strides = [1, 1]} : vector<16x128xf32> to vector<8x128xf32>
    %350 = vector.extract_strided_slice %348 {offsets = [8, 0], sizes = [8, 128], strides = [1, 1]} : vector<16x128xf32> to vector<8x128xf32>
    %351 = arith.addf %349, %350 : vector<8x128xf32>
    %cst_133 = arith.constant 5.000000e-01 : f32
    %352 = vector.broadcast %cst_133 : f32 to vector<8x128xf32>
    %353 = arith.mulf %352, %351 : vector<8x128xf32>
    %cst_134 = arith.constant dense<0.000000e+00> : vector<8xf32>
    %354 = vector.multi_reduction <add>, %353, %cst_134 [1] : vector<8x128xf32> to vector<8xf32>
    %355 = vector.shape_cast %354 : vector<8xf32> to vector<8x1xf32>
    %cst_135 = arith.constant 3.125000e-02 : f32
    %356 = vector.broadcast %cst_135 : f32 to vector<8x1xf32>
    %357 = arith.mulf %355, %356 : vector<8x1xf32>
    %358 = arith.mulf %353, %353 : vector<8x128xf32>
    %cst_136 = arith.constant dense<0.000000e+00> : vector<8xf32>
    %359 = vector.multi_reduction <add>, %358, %cst_136 [1] : vector<8x128xf32> to vector<8xf32>
    %360 = vector.shape_cast %359 : vector<8xf32> to vector<8x1xf32>
    %cst_137 = arith.constant 3.125000e-02 : f32
    %361 = vector.broadcast %cst_137 : f32 to vector<8x1xf32>
    %362 = arith.mulf %360, %361 : vector<8x1xf32>
    %363 = arith.mulf %357, %357 : vector<8x1xf32>
    %364 = arith.subf %362, %363 : vector<8x1xf32>
    %365 = vector.broadcast %357 : vector<8x1xf32> to vector<8x128xf32>
    %366 = arith.subf %353, %365 : vector<8x128xf32>
    %cst_138 = arith.constant 9.99999974E-6 : f32
    %367 = vector.broadcast %cst_138 : f32 to vector<8x1xf32>
    %368 = arith.addf %364, %367 : vector<8x1xf32>
    %369 = math.rsqrt %368 : vector<8x1xf32>
    %370 = vector.broadcast %369 : vector<8x1xf32> to vector<8x128xf32>
    %371 = arith.mulf %366, %370 : vector<8x128xf32>
    %c2872 = arith.constant 2872 : index
    %c0_139 = arith.constant 0 : index
    %372 = vector.load %arg3[%c2872, %c0_139] : memref<3296x128xf32, #tpu.memory_space<vmem>>, vector<1x128xf32>
    %373 = vector.broadcast %372 : vector<1x128xf32> to vector<8x128xf32>
    %374 = arith.mulf %371, %373 : vector<8x128xf32>
    %c2880 = arith.constant 2880 : index
    %c0_140 = arith.constant 0 : index
    %375 = vector.load %arg3[%c2880, %c0_140] : memref<3296x128xf32, #tpu.memory_space<vmem>>, vector<1x128xf32>
    %376 = vector.broadcast %375 : vector<1x128xf32> to vector<8x128xf32>
    %377 = arith.addf %374, %376 : vector<8x128xf32>
    %c2888 = arith.constant 2888 : index
    %c0_141 = arith.constant 0 : index
    %378 = vector.load %arg3[%c2888, %c0_141] : memref<3296x128xf32, #tpu.memory_space<vmem>>, vector<128x128xf32>
    %cst_142 = arith.constant dense<0.000000e+00> : vector<8x128xf32>
    %379 = tpu.matmul %377, %378, %cst_142 {dimension_numbers = #tpu.dot_dimension_numbers<[1], [0], [0], [1], [0, 0, 1, 1], [], []>} : vector<8x128xf32>, vector<128x128xf32>, vector<8x128xf32> -> vector<8x128xf32>
    %c3016 = arith.constant 3016 : index
    %c0_143 = arith.constant 0 : index
    %380 = vector.load %arg3[%c3016, %c0_143] : memref<3296x128xf32, #tpu.memory_space<vmem>>, vector<1x128xf32>
    %381 = vector.broadcast %380 : vector<1x128xf32> to vector<8x128xf32>
    %382 = arith.addf %379, %381 : vector<8x128xf32>
    %cst_144 = arith.constant 5.000000e-01 : f32
    %383 = vector.broadcast %cst_144 : f32 to vector<8x128xf32>
    %384 = arith.mulf %383, %382 : vector<8x128xf32>
    %cst_145 = arith.constant 4.471500e-02 : f32
    %385 = vector.broadcast %cst_145 : f32 to vector<8x128xf32>
    %386 = arith.mulf %385, %382 : vector<8x128xf32>
    %387 = arith.mulf %386, %382 : vector<8x128xf32>
    %388 = arith.mulf %387, %382 : vector<8x128xf32>
    %389 = arith.addf %382, %388 : vector<8x128xf32>
    %cst_146 = arith.constant 0.797884583 : f32
    %390 = vector.broadcast %cst_146 : f32 to vector<8x128xf32>
    %391 = arith.mulf %390, %389 : vector<8x128xf32>
    %392 = math.tanh %391 : vector<8x128xf32>
    %cst_147 = arith.constant 1.000000e+00 : f32
    %393 = vector.broadcast %cst_147 : f32 to vector<8x128xf32>
    %394 = arith.addf %393, %392 : vector<8x128xf32>
    %395 = arith.mulf %384, %394 : vector<8x128xf32>
    %c3024 = arith.constant 3024 : index
    %c0_148 = arith.constant 0 : index
    %396 = vector.load %arg3[%c3024, %c0_148] : memref<3296x128xf32, #tpu.memory_space<vmem>>, vector<128x128xf32>
    %cst_149 = arith.constant dense<0.000000e+00> : vector<8x128xf32>
    %397 = tpu.matmul %395, %396, %cst_149 {dimension_numbers = #tpu.dot_dimension_numbers<[1], [0], [0], [1], [0, 0, 1, 1], [], []>} : vector<8x128xf32>, vector<128x128xf32>, vector<8x128xf32> -> vector<8x128xf32>
    %c3152 = arith.constant 3152 : index
    %c0_150 = arith.constant 0 : index
    %398 = vector.load %arg3[%c3152, %c0_150] : memref<3296x128xf32, #tpu.memory_space<vmem>>, vector<1x128xf32>
    %399 = vector.broadcast %398 : vector<1x128xf32> to vector<8x128xf32>
    %400 = arith.addf %397, %399 : vector<8x128xf32>
    %cst_151 = arith.constant 5.000000e-01 : f32
    %401 = vector.broadcast %cst_151 : f32 to vector<8x128xf32>
    %402 = arith.mulf %401, %400 : vector<8x128xf32>
    %cst_152 = arith.constant 4.471500e-02 : f32
    %403 = vector.broadcast %cst_152 : f32 to vector<8x128xf32>
    %404 = arith.mulf %403, %400 : vector<8x128xf32>
    %405 = arith.mulf %404, %400 : vector<8x128xf32>
    %406 = arith.mulf %405, %400 : vector<8x128xf32>
    %407 = arith.addf %400, %406 : vector<8x128xf32>
    %cst_153 = arith.constant 0.797884583 : f32
    %408 = vector.broadcast %cst_153 : f32 to vector<8x128xf32>
    %409 = arith.mulf %408, %407 : vector<8x128xf32>
    %410 = math.tanh %409 : vector<8x128xf32>
    %cst_154 = arith.constant 1.000000e+00 : f32
    %411 = vector.broadcast %cst_154 : f32 to vector<8x128xf32>
    %412 = arith.addf %411, %410 : vector<8x128xf32>
    %413 = arith.mulf %402, %412 : vector<8x128xf32>
    %c3160 = arith.constant 3160 : index
    %c0_155 = arith.constant 0 : index
    %414 = vector.load %arg3[%c3160, %c0_155] : memref<3296x128xf32, #tpu.memory_space<vmem>>, vector<128x128xf32>
    %cst_156 = arith.constant dense<0.000000e+00> : vector<8x128xf32>
    %415 = tpu.matmul %413, %414, %cst_156 {dimension_numbers = #tpu.dot_dimension_numbers<[1], [0], [0], [1], [0, 0, 1, 1], [], []>} : vector<8x128xf32>, vector<128x128xf32>, vector<8x128xf32> -> vector<8x128xf32>
    %c3288 = arith.constant 3288 : index
    %c0_157 = arith.constant 0 : index
    %416 = vector.load %arg3[%c3288, %c0_157] : memref<3296x128xf32, #tpu.memory_space<vmem>>, vector<1x128xf32>
    %417 = vector.broadcast %416 : vector<1x128xf32> to vector<8x128xf32>
    %418 = arith.addf %415, %417 : vector<8x128xf32>
    %c0_158 = arith.constant 0 : index
    %c0_159 = arith.constant 0 : index
    %419 = vector.load %arg4[%c0_158, %c0_159] : memref<8x128xf32, #tpu.memory_space<vmem>>, vector<8x128xf32>
    tpu.vector_store %arg4[%c0_158, %c0_159], %418 {strides = array<i32>} : memref<8x128xf32, #tpu.memory_space<vmem>>, vector<8x128xf32>,
    return
  }
  func.func @transform_0(%arg0: i32) -> (i32, i32) {
    %c0_i32 = arith.constant 0 : i32
    %c0_i32_0 = arith.constant 0 : i32
    return %arg0, %c0_i32 : i32, i32
  }
  func.func @transform_1(%arg0: i32) -> (i32, i32) {
    %c0_i32 = arith.constant 0 : i32
    %c0_i32_0 = arith.constant 0 : i32
    return %arg0, %c0_i32 : i32, i32
  }
  func.func @transform_2(%arg0: i32) -> (i32, i32) {
    %c0_i32 = arith.constant 0 : i32
    %c0_i32_0 = arith.constant 0 : i32
    %c0_i32_1 = arith.constant 0 : i32
    return %c0_i32, %c0_i32_0 : i32, i32
  }
  func.func @transform_3(%arg0: i32) -> (i32, i32) {
    %c0_i32 = arith.constant 0 : i32
    %c0_i32_0 = arith.constant 0 : i32
    return %arg0, %c0_i32 : i32, i32
  }
}

</mosaic_0001>

<bundles_post_ra>
// kernel: protein_affinity_forward.1
= control target key start
LH: loop header
LB: loop body
LE: loop exit
PB: predicated region body
PF: predicated region fallthrough
CT: control target
= control target key end

     0   :  { %8 = vsyncpa [#allocation3], 0  ;;  %s7537_s0 = inlined_call_operand.hbm [shape: f32[16,64], index: 0, kind: input, shape index: {}]   ;;  %s7538_s1 = inlined_call_operand.hbm [shape: f32[16,64], index: 1, kind: input, shape index: {}]   ;;  %s7539_s2 = inlined_call_operand.hbm [shape: f32[3296,128], index: 2, kind: input, shape index: {}]   ;;  %s7540_s3 = inlined_call_operand.vmem [shape: f32[16,128], index: 3, kind: output, shape index: {}]  }
   0x1   :  { %10 = vsyncpa [#allocation3 + $0x1], 0 }
   0x2   :  { %11 = vsyncpa [#allocation5], 0 }
   0x3   :  { %13 = vsyncpa [#allocation5 + $0x1], 0  ;;  %s6998_s12 = smov 0   ;;  %s7000_s13 = smov 0  }
   0x4   :  { %s7002_s14 = smov 0   ;;  %s7004_s15 = smov 0  }
   0x5 LB: > { %s7017_s16 = sadd.s32 4294967295, %s6968_s15   ;;  %p39_p0 = scmp.ne.s32.totalorder %s6960_s13, %s6956_s12  ;;  %s6968_s15 = sphi %s7004_s15, %s7555_s15   ;;  %s6964_s14 = sphi %s7002_s14, %s7554_s14   ;;  %s6960_s13 = sphi %s7000_s13, %s7553_s13   ;;  %s6956_s12 = sphi %s6998_s12, %s7552_s12  }
   0x6   : > { %p7541_p1 = scmp.eq.s32.totalorder %s7017_s16, 0  ;;  %p3825_p2 = scmp.ge.s32.totalorder %s6968_s15, 1 }
   0x7   : > { %p123_p3 = scmp.lt.s32.totalorder %s6968_s15, 3  ;;  %s6970_s19 = smov [#allocation6]  }
   0x8   : > { %p7025_p4 = por %p7541_p1, %p39_p0  ;;  %s135_s20 = sshll.u32 %s6970_s19, 4  ;;  %s136_s20 = int_to_ptr.vmem [resolvable:$true] %s135_s20 }
   0x9   : > { %p7029_p5 = pnand %p3825_p2, %p123_p3  ;;  %s7042_s22 = sadd.s32 1, %s6968_s15  }
   0xa   : > { %s7544_s17 = scalar_select %p7025_p4, 1, 0 }
   0xb   : > { %s7545_s18 = scalar_select %p7029_p5, 1, 0 }
   0xc   : > { %p6708_p6 = pneg %p7029_p5  ;;  %s26_s23 = sadd.s32 1, %s6964_s14 }
   0xd   : > { %s23_s24 = ssub.s32 %s6968_s15, %s7042_s22  ;;  %s6838_s27 = scalar_lea.hbm %s7539_s2, 52736 }
   0xe   : > { %p7037_p7 = pnand %p6708_p6, %p7541_p1  ;;  %p6839_p8 = scmp.ne.s32.totalorder %s7539_s2, %s6838_s27 }
   0xf   : > { %p6845_p12 = scmp.lt.u32.totalorder %s6838_s27, %s7539_s2 }
  0x10   : > { %p6840_p9 = pneg %p7037_p7 }
  0x12   : > { %p6841_p10 = pnand %p6840_p9, %p6839_p8 }
  0x14   : > { %p6842_p11 = pneg %p6841_p10 }
  0x16   : > { %p6847_p13 = pnand %p6845_p12, %p6842_p11 }
  0x18   : > { %6850 = shalt.err (!%p6847_p13)
}
  0x19   : > { %s6851_s5 = scalar_lea.vmem %s136_s20, 52736  ;;  %p6859_p6 = scmp.lt.s32.totalorder %s136_s20, %s136_s20 }
  0x1a   : > { %p6852_p0 = scmp.ne.s32.totalorder %s136_s20, %s6851_s5  ;;  %p6860_p1 = scmp.lt.s32.totalorder %s6851_s5, %s6851_s5 }
  0x1c   : > { %p6854_p2 = pnand %p6852_p0, %p6840_p9  ;;  %p6861_p4 = por %p6860_p1, %p6859_p6 }
  0x1e   : > { %p6855_p3 = pneg %p6854_p2 }
  0x20   : > { %p6862_p5 = pnand %p6861_p4, %p6855_p3 }
  0x22   : > { %6865 = shalt.err (!%p6862_p5)
}
  0x23   : > { %s6971_s6 = smov 128   ;;  %s6972_s7 = smov 8  }
  0x24   : > { %6711 = dma.hbm_to_vmem [thread:$0]  (!%p7037_p7), %s7539_s2, 52736, %s136_s20, [#allocation5], %s6971_s6, %s6971_s6, %s6972_s7  }
  0x25   : > { %p24_p8 = scmp.eq.s32.totalorder %s23_s24, 0  ;;  %p33_p1 = scmp.ne.s32.totalorder %s6964_s14, %s6960_s13 }
  0x26   : > { %p34_p4 = scmp.eq.s32.totalorder %s6968_s15, 0  ;;  %p6720_p5 = scmp.lt.s32.totalorder %s6968_s15, 2 }
  0x27   : > { %s7068_s10 = scalar_select %p24_p8, %s6964_s14, %s26_s23  }
  0x28   : > { %p35_p9 = por %p34_p4, %p33_p1  ;;  %s149_s11 = sand.u32 1, %s6964_s14  }
  0x29   : > { %s7071_s12 = sshll.u32 %s149_s11, 3  ;;  %s3829_s19 = sshll.u32 %s6968_s15, 7 }
  0x2a   : > { %s7077_s21 = scalar_lea.hbm %s7537_s0, %s3829_s19  ;;  %s153_s20 = scalar_lea.vmem [#allocation2], %s7071_s12 }
  0x2b   : > { %s160_s24 = sshll.u32 %s153_s20, 4  ;;  %p7082_p7 = pnand %p6720_p5, %p35_p9  ;;  %s7080_s24 = int_to_ptr.vmem [resolvable:$true] %s160_s24 }
  0x2c   : > { %s7089_s29 = scalar_lea.hbm %s7538_s1, %s3829_s19  ;;  %s167_s30 = sand.u32 1, %s6968_s15  }
  0x2d   : > { %s150_s4 = scalar_lea.sflag [#allocation3], %s149_s11  ;;  %s6866_s5 = scalar_lea.hbm %s7077_s21, 128 }
  0x2e   : > { %p6867_p10 = scmp.ne.s32.totalorder %s7077_s21, %s6866_s5  ;;  %p6868_p11 = pneg %p7082_p7 }
  0x2f   : > { %s6871_s8 = scalar_lea.hbm %s7537_s0, 256  ;;  %p6872_p0 = scmp.lt.u32.totalorder %s7077_s21, %s7537_s0 }
  0x30   : > { %p6869_p12 = pnand %p6868_p11, %p6867_p10  ;;  %p6873_p2 = scmp.lt.u32.totalorder %s6871_s8, %s6866_s5 }
  0x31   : > { %p6875_p6 = scmp.lt.u32.totalorder %s6866_s5, %s7077_s21 }
  0x32   : > { %p6870_p13 = pneg %p6869_p12  ;;  %p6874_p3 = por %p6873_p2, %p6872_p0 }
  0x34   : > { %p6876_p8 = por %p6875_p6, %p6874_p3 }
  0x36   : > { %p6877_p1 = pnand %p6876_p8, %p6870_p13 }
  0x38   : > { %6880 = shalt.err (!%p6877_p1)
}
  0x39   : > { %s6881_s11 = scalar_lea.vmem %s7080_s24, 128  ;;  %s6973_s19 = smov [#allocation2]  }
  0x3a   : > { %p6882_p4 = scmp.ne.s32.totalorder %s7080_s24, %s6881_s11  ;;  %s6886_s26 = sshll.u32 %s6973_s19, 4  ;;  %s6887_s26 = int_to_ptr.vmem [resolvable:$false] %s6886_s26 }
  0x3b   : > { %s6888_s20 = scalar_lea.vmem %s6887_s26, 256  ;;  %p6889_p10 = scmp.lt.s32.totalorder %s7080_s24, %s6887_s26 }
  0x3c   : > { %p6884_p5 = pnand %p6882_p4, %p6868_p11  ;;  %p6890_p12 = scmp.lt.s32.totalorder %s6888_s20, %s6881_s11 }
  0x3e   : > { %p6885_p9 = pneg %p6884_p5  ;;  %p6891_p0 = por %p6890_p12, %p6889_p10 }
  0x40   : > { %p6892_p2 = pnand %p6891_p0, %p6885_p9 }
  0x42   : > { %6895 = shalt.err (!%p6892_p2)
}
  0x43   : > { %6715 = dma.hbm_to_vmem [thread:$0]  (!%p7082_p7), %s7077_s21, 128, %s7080_s24, %s150_s4  }
  0x44   : > { %s171_s27 = scalar_lea.vmem [#allocation4], %s7071_s12  ;;  %s168_s5 = scalar_lea.sflag [#allocation5], %s167_s30 }
  0x45   : > { %s178_s28 = sshll.u32 %s171_s27, 4  ;;  %s6896_s6 = scalar_lea.hbm %s7089_s29, 128  ;;  %s179_s28 = int_to_ptr.vmem [resolvable:$true] %s178_s28 }
  0x46   : > { %p6897_p13 = scmp.ne.s32.totalorder %s7089_s29, %s6896_s6  ;;  %s6901_s9 = scalar_lea.hbm %s7538_s1, 256 }
  0x47   : > { %p6902_p8 = scmp.lt.u32.totalorder %s7089_s29, %s7538_s1  ;;  %p6903_p1 = scmp.lt.u32.totalorder %s6901_s9, %s6896_s6 }
  0x48   : > { %p6899_p3 = pnand %p6897_p13, %p6868_p11  ;;  %p6905_p5 = scmp.lt.u32.totalorder %s6896_s6, %s7089_s29 }
  0x49   : > { %p6904_p4 = por %p6903_p1, %p6902_p8 }
  0x4a   : > { %p6900_p6 = pneg %p6899_p3 }
  0x4b   : > { %p6906_p9 = por %p6905_p5, %p6904_p4 }
  0x4d   : > { %p6907_p10 = pnand %p6906_p9, %p6900_p6 }
  0x4f   : > { %6910 = shalt.err (!%p6907_p10)
}
  0x50   : > { %s6911_s15 = scalar_lea.vmem %s179_s28, 128  ;;  %s6974_s12 = smov [#allocation4]  }
  0x51   : > { %p6912_p12 = scmp.ne.s32.totalorder %s179_s28, %s6911_s15  ;;  %s6916_s21 = sshll.u32 %s6974_s12, 4  ;;  %s6917_s21 = int_to_ptr.vmem [resolvable:$false] %s6916_s21 }
  0x52   : > { %s6918_s24 = scalar_lea.vmem %s6917_s21, 256  ;;  %p6919_p13 = scmp.lt.s32.totalorder %s179_s28, %s6917_s21 }
  0x53   : > { %p6914_p0 = pnand %p6912_p12, %p6868_p11  ;;  %p6920_p3 = scmp.lt.s32.totalorder %s6918_s24, %s6911_s15 }
  0x55   : > { %p6915_p2 = pneg %p6914_p0  ;;  %p6921_p1 = por %p6920_p3, %p6919_p13 }
  0x57   : > { %p6922_p8 = pnand %p6921_p1, %p6915_p2 }
  0x59   : > { %6925 = shalt.err (!%p6922_p8)
}
  0x5a   : > { %6718 = dma.hbm_to_vmem [thread:$0]  (!%p7082_p7), %s7089_s29, 128, %s179_s28, %s168_s5  }
  0x5b   : > { %p7548_p6 = scmp.ne.s32.totalorder %s7545_s18, 0 }
  0x5c   : > { %s189_s30 = sand.u32 (!%p7548_p6), 1, %s6960_s13   ;;  %p7549_p11 = scmp.ne.s32.totalorder (!%p7548_p6), %s7544_s17, 0 }
  0x5d   : > { %187 = sbr.rel (%p7548_p6) target bundleno = 6303 (0x189f), region = 32  ;;  %s7142_s4 = sshll.u32 (!%p7548_p6), %s189_s30, 3 }
  0x5e   : > { %s190_s19 = scalar_lea.sflag (!%p7548_p6), [#allocation3], %s189_s30  ;;  %s193_s26 = scalar_lea.vmem (!%p7548_p6), [#allocation2], %s7142_s4 }
  0x64   : > { %6943 = dma.done.wait (%p7549_p11), %s190_s19, 128  }
  0x65   : > { %6945 = vsyncadd (%p7549_p11), %s190_s19, 4294967168  ;;  %s198_s23 = sand.u32 1, %s7017_s16   ;;  %s202_s18 = scalar_lea.vmem [#allocation4], %s7142_s4 }
  0x66   : > { %s199_s29 = scalar_lea.sflag [#allocation5], %s198_s23 }
  0x67   : > { %6947 = dma.done.wait (%p7549_p11), %s199_s29, 128  }
  0x68   : > { %6949 = vsyncadd (%p7549_p11), %s199_s29, 4294967168  ;;  %p7550_p7 = scmp.eq.s32.totalorder %s7017_s16, 0 }
  0x6a   : > { %6951 = dma.done.wait (%p7550_p7), [#allocation5], 52736   ;;  %p7551_p4 = pmov %p7550_p7 }
  0x6b   : > { %v271_v0 = vld [vmem:[#allocation6] sm:$0xff]  ;;  %v272_v1 = vld [vmem:[#allocation6 + $0x8] sm:$0xff]  ;;  %v273_v2 = vld [vmem:[#allocation6 + $0x10] sm:$0xff]  ;;  %vm284_vm0 = vcmask 523264   ;;  %vm6976_vm1 = vmmov 0   ;;  %p233_p5 = scmp.lt.s32.totalorder %s7017_s16, 1 }
  0x6c   : > { %6953 = vsyncadd (%p7551_p4), [#allocation5], 4294914560  ;;  %v5652_v3 = vpack.c.bf16 %v272_v1, %v271_v0  ;;  %v274_v4 = vld [vmem:[#allocation6 + $0x18] sm:$0xff]  ;;  %v275_v6 = vld [vmem:[#allocation6 + $0x20] sm:$0xff] }
  0x6d   : > { %v5656_v5 = vpack.c.bf16 %v274_v4, %v273_v2  ;;  %v276_v7 = vld [vmem:[#allocation6 + $0x28] sm:$0xff]  ;;  %v277_v10 = vld [vmem:[#allocation6 + $0x30] sm:$0xff]  ;;  %v278_v11 = vld [vmem:[#allocation6 + $0x38] sm:$0xff]  ;;  %s7557_s16 = smov (!%p233_p5, %s7017_s16), 1 }
  0x6e   : > { %v269_v8 = vld [vmem:[%s193_s26] sm:$0xff]  ;;  %5653 = vmatprep.subr.bf16.mxu0 %v5652_v3  ;;  %v5660_v9 = vpack.c.bf16 %v276_v7, %v275_v6  ;;  %v5664_v12 = vpack.c.bf16 %v278_v11, %v277_v10  ;;  %v270_v13 = vld [vmem:[%s202_s18] sm:$0xff]  ;;  %s3836_s17 = sshll.u32 %s7557_s16, 3 }
  0x6f   : > { %4494 = vmatprep.mubr.msk.f32.mxu0 %vm284_vm0, %v269_v8  ;;  %5655 = vmatpush3.bf16.msra.mxu0 %v5652_v3  ;;  %v406_v14 = vld [vmem:[#allocation6 + $0x158] sm:$0xff]  ;;  %v407_v15 = vld [vmem:[#allocation6 + $0x160] sm:$0xff]  ;;  %v503_v18 = vld [vmem:[#allocation6 + $0x1e8] sm:$0xff]  ;;  %s236_s28 = scalar_lea.vmem %s7540_s3, %s3836_s17 }
  0x70   : > { %5657 = vmatprep.subr.bf16.mxu0 %v5656_v5  ;;  %v502_v16 = vld [vmem:[#allocation6 + $0x1e0] sm:$0xff]  ;;  %v5668_v17 = vpack.c.bf16 %v407_v15, %v406_v14  ;;  %v408_v27 = vld [vmem:[#allocation6 + $0x168] sm:$0xff]  ;;  %v409_v28 = vld [vmem:[#allocation6 + $0x170] sm:$0xff] }
  0x71   : > { %v5700_v19 = vpack.c.bf16 %v503_v18, %v502_v16  ;;  %v3837_v20 = vld [vmem:[#allocation6 + $0x40] ss:$0 sm:$0xff]  ;;  %v5672_v29 = vpack.c.bf16 %v409_v28, %v408_v27  ;;  %v504_v30 = vld [vmem:[#allocation6 + $0x1f0] sm:$0xff]  ;;  %v505_v31 = vld [vmem:[#allocation6 + $0x1f8] sm:$0xff] }
  0x72   : > { %5669 = vmatprep.subr.bf16.mxu1 %v5668_v17  ;;  %v5704_v32 = vpack.c.bf16 %v505_v31, %v504_v30  ;;  %v410_v33 = vld [vmem:[#allocation6 + $0x178] sm:$0xff]  ;;  %v411_v34 = vld [vmem:[#allocation6 + $0x180] sm:$0xff]  ;;  %v507_v37 = vld [vmem:[#allocation6 + $0x208] sm:$0xff] }
  0x73   : > { %5659 = vmatpush3.bf16.msra.mxu0 %v5656_v5  ;;  %5671 = vmatpush3.bf16.msra.mxu1 %v5668_v17  ;;  %v5676_v35 = vpack.c.bf16 %v411_v34, %v410_v33  ;;  %v506_v36 = vld [vmem:[#allocation6 + $0x200] sm:$0xff]  ;;  %v412_v39 = vld [vmem:[#allocation6 + $0x188] sm:$0xff]  ;;  %v413_v40 = vld [vmem:[#allocation6 + $0x190] sm:$0xff] }
  0x74   : > { %5661 = vmatprep.subr.bf16.mxu0 %v5660_v9  ;;  %5673 = vmatprep.subr.bf16.mxu1 %v5672_v29  ;;  %v5708_v38 = vpack.c.bf16 %v507_v37, %v506_v36  ;;  %v5680_v41 = vpack.c.bf16 %v413_v40, %v412_v39  ;;  %v508_v42 = vld [vmem:[#allocation6 + $0x210] sm:$0xff]  ;;  %v509_v43 = vld [vmem:[#allocation6 + $0x218] sm:$0xff]  ;;  %v415_v46 = vld [vmem:[#allocation6 + $0x1a0] sm:$0xff] }
  0x75   : > { %v5712_v44 = vpack.c.bf16 %v509_v43, %v508_v42  ;;  %v414_v45 = vld [vmem:[#allocation6 + $0x198] sm:$0xff]  ;;  %v510_v48 = vld [vmem:[#allocation6 + $0x220] sm:$0xff]  ;;  %v511_v49 = vld [vmem:[#allocation6 + $0x228] sm:$0xff] }
  0x76   : > { %v5684_v47 = vpack.c.bf16 %v415_v46, %v414_v45  ;;  %v5716_v50 = vpack.c.bf16 %v511_v49, %v510_v48  ;;  %v416_v51 = vld [vmem:[#allocation6 + $0x1a8] sm:$0xff]  ;;  %v417_v52 = vld [vmem:[#allocation6 + $0x1b0] sm:$0xff]  ;;  %v513_v55 = vld [vmem:[#allocation6 + $0x238] sm:$0xff] }
  0x77   : > { %5663 = vmatpush3.bf16.msra.mxu0 %v5660_v9  ;;  %5675 = vmatpush3.bf16.msra.mxu1 %v5672_v29  ;;  %v512_v53 = vld [vmem:[#allocation6 + $0x230] sm:$0xff]  ;;  %v5688_v54 = vpack.c.bf16 %v417_v52, %v416_v51  ;;  %v418_v56 = vld [vmem:[#allocation6 + $0x1b8] sm:$0xff]  ;;  %v419_v57 = vld [vmem:[#allocation6 + $0x1c0] sm:$0xff] }
  0x78   : > { %5665 = vmatprep.subr.bf16.mxu0 %v5664_v12  ;;  %5677 = vmatprep.subr.bf16.mxu1 %v5676_v35  ;;  %v5720_v58 = vpack.c.bf16 %v513_v55, %v512_v53  ;;  %v5692_v59 = vpack.c.bf16 %v419_v57, %v418_v56  ;;  %v514_v60 = vld [vmem:[#allocation6 + $0x240] sm:$0xff]  ;;  %v515_v61 = vld [vmem:[#allocation6 + $0x248] sm:$0xff]  ;;  %v421_v0 = vld [vmem:[#allocation6 + $0x1d0] sm:$0xff] }
  0x79   : > { %v5724_v62 = vpack.c.bf16 %v515_v61, %v514_v60  ;;  %v420_v63 = vld [vmem:[#allocation6 + $0x1c8] sm:$0xff]  ;;  %v516_v2 = vld [vmem:[#allocation6 + $0x250] sm:$0xff]  ;;  %v517_v3 = vld [vmem:[#allocation6 + $0x258] sm:$0xff] }
  0x7a   : > { %v5696_v1 = vpack.c.bf16 %v421_v0, %v420_v63  ;;  %v5728_v4 = vpack.c.bf16 %v517_v3, %v516_v2  ;;  %v598_v5 = vld [vmem:[#allocation6 + $0x268] sm:$0xff]  ;;  %v599_v6 = vld [vmem:[#allocation6 + $0x270] sm:$0xff]  ;;  %v600_v37 = vld [vmem:[#allocation6 + $0x278] sm:$0xff] }
  0x7b   : > { %5667 = vmatpush3.bf16.msra.mxu0 %v5664_v12  ;;  %5679 = vmatpush3.bf16.msra.mxu1 %v5676_v35  ;;  %v5732_v7 = vpack.c.bf16 %v599_v6, %v598_v5  ;;  %v237_v8 = vld [vmem:[#allocation6 + $0x48] sm:$0xff]  ;;  %v238_v9 = vld [vmem:[#allocation6 + $0x50] sm:$0xff]  ;;  %v239_v40 = vld [vmem:[#allocation6 + $0x58] sm:$0xff] }
  0x7c   : > { %5701 = vmatprep.subr.bf16.mxu0 %v5700_v19  ;;  %5681 = vmatprep.subr.bf16.mxu1 %v5680_v41  ;;  %v7171_v10 = vpack.c.bf16 %v238_v9, %v237_v8  ;;  %v3840_v29 = vld [vmem:[#allocation6 + $0x148] ss:$0 sm:$0xff]  ;;  %v3841_v31 = vld [vmem:[#allocation6 + $0x150] ss:$0 sm:$0xff]  ;;  %v605_v51 = vld [vmem:[#allocation6 + $0x2a0] sm:$0xff] }
  0x7d   : > { %v603_v45 = vld [vmem:[#allocation6 + $0x290] sm:$0xff]  ;;  %v243_v53 = vld [vmem:[#allocation6 + $0x78] sm:$0xff]  ;;  %v606_v56 = vld [vmem:[#allocation6 + $0x2a8] sm:$0xff] }
  0x7e   : > { %4495 = vmatmul.mubr.msk.f32.vlgmr.msra.gmra.mrb[0].mxu0 %vm284_vm0, %v270_v13  ;;  %v242_v48 = vld [vmem:[#allocation6 + $0x70] sm:$0xff]  ;;  %v609_v63 = vld [vmem:[#allocation6 + $0x2c0] sm:$0xff] }
  0x7f   : > { %5703 = vmatpush3.bf16.msra.mxu0 %v5700_v19  ;;  %5683 = vmatpush3.bf16.msra.mxu1 %v5680_v41  ;;  %v240_v41 = vld [vmem:[#allocation6 + $0x60] sm:$0xff]  ;;  %v607_v57 = vld [vmem:[#allocation6 + $0x2b0] sm:$0xff] }
  0x80   : > { %5705 = vmatprep.subr.bf16.mxu0 %v5704_v32  ;;  %5685 = vmatprep.subr.bf16.mxu1 %v5684_v47  ;;  %v7178_v46 = vpack.c.bf16 %v240_v41, %v239_v40  ;;  %v246_v60 = vld [vmem:[#allocation6 + $0x90] sm:$0xff]  ;;  %v5748_v61 = vpack.c.bf16 %v607_v57, %v606_v56  ;;  %v248_v2 = vld [vmem:[#allocation6 + $0xa0] sm:$0xff]  ;;  %v265_v56 = vld [vmem:[#allocation6 + $0x128] sm:$0xff] }
  0x81   : > { %v611_v5 = vld [vmem:[#allocation6 + $0x2d0] sm:$0xff]  ;;  %v256_v40 = vld [vmem:[#allocation6 + $0xe0] sm:$0xff] }
  0x82   : > { %v250_v8 = vld [vmem:[#allocation6 + $0xb0] sm:$0xff] }
  0x83   : > { %5707 = vmatpush3.bf16.msra.mxu0 %v5704_v32  ;;  %5687 = vmatpush3.bf16.msra.mxu1 %v5684_v47  ;;  %v241_v47 = vld [vmem:[#allocation6 + $0x68] sm:$0xff]  ;;  %v266_v57 = vld [vmem:[#allocation6 + $0x130] sm:$0xff] }
  0x84   : > { %5709 = vmatprep.subr.bf16.mxu0 %v5708_v38  ;;  %5689 = vmatprep.subr.bf16.mxu1 %v5688_v54  ;;  %v7184_v52 = vpack.c.bf16 %v242_v48, %v241_v47  ;;  %v260_v47 = vld [vmem:[#allocation6 + $0x100] sm:$0xff] }
  0x87   : > { %5711 = vmatpush3.bf16.msra.mxu0 %v5708_v38  ;;  %5691 = vmatpush3.bf16.msra.mxu1 %v5688_v54  ;;  %v601_v38 = vld [vmem:[#allocation6 + $0x280] sm:$0xff] }
  0x88   : > { %5713 = vmatprep.subr.bf16.mxu0 %v5712_v44  ;;  %5693 = vmatprep.subr.bf16.mxu1 %v5692_v59  ;;  %v5736_v43 = vpack.c.bf16 %v601_v38, %v600_v37  ;;  %v244_v54 = vld [vmem:[#allocation6 + $0x80] sm:$0xff]  ;;  %v254_v37 = vld [vmem:[#allocation6 + $0xd0] sm:$0xff] }
  0x8b   : > { %5715 = vmatpush3.bf16.msra.mxu0 %v5712_v44  ;;  %5695 = vmatpush3.bf16.msra.mxu1 %v5692_v59  ;;  %v602_v44 = vld [vmem:[#allocation6 + $0x288] sm:$0xff] }
  0x8c   : > { %5717 = vmatprep.subr.bf16.mxu0 %v5716_v50  ;;  %5697 = vmatprep.subr.bf16.mxu1 %v5696_v1  ;;  %v5740_v49 = vpack.c.bf16 %v603_v45, %v602_v44  ;;  %v245_v59 = vld [vmem:[#allocation6 + $0x88] sm:$0xff]  ;;  %v259_v45 = vld [vmem:[#allocation6 + $0xf8] sm:$0xff] }
  0x8d   : > { %v7192_v0 = vpack.c.bf16 %v246_v60, %v245_v59  ;;  %v7248_v48 = vpack.c.bf16 %v260_v47, %v259_v45  ;;  %v7262_v59 = vpack.c.bf16 %v266_v57, %v265_v56  ;;  %v267_v60 = vld [vmem:[#allocation6 + $0x138] sm:$0xff]  ;;  %v1032_v47 = vld [vmem:[#allocation6 + $0x320] sm:$0xff] }
  0x8e   : > { %v1036_v57 = vld [vmem:[#allocation6 + $0x340] sm:$0xff] }
  0x8f   : > { %5719 = vmatpush3.bf16.msra.mxu0 %v5716_v50  ;;  %5699 = vmatpush3.bf16.msra.mxu1 %v5696_v1  ;;  %v604_v50 = vld [vmem:[#allocation6 + $0x298] sm:$0xff] }
  0x90   : > { %5721 = vmatprep.subr.bf16.mxu0 %v5720_v58  ;;  %5733 = vmatprep.subr.bf16.mxu1 %v5732_v7  ;;  %v5744_v55 = vpack.c.bf16 %v605_v51, %v604_v50  ;;  %v247_v1 = vld [vmem:[#allocation6 + $0x98] sm:$0xff]  ;;  %v262_v50 = vld [vmem:[#allocation6 + $0x110] sm:$0xff] }
  0x91   : > { %v7196_v6 = vpack.c.bf16 %v248_v2, %v247_v1  ;;  %v1027_v1 = vld [vmem:[#allocation6 + $0x2f8] sm:$0xff] }
  0x93   : > { %5723 = vmatpush3.bf16.msra.mxu0 %v5720_v58  ;;  %v7188_v58 = vpack.c.bf16 %v244_v54, %v243_v53  ;;  %v263_v53 = vld [vmem:[#allocation6 + $0x118] sm:$0xff]  ;;  %v264_v54 = vld [vmem:[#allocation6 + $0x120] sm:$0xff] }
  0x94   : > { %5725 = vmatprep.subr.bf16.mxu0 %v5724_v62 }
  0x97   : > { %5727 = vmatpush3.bf16.msra.mxu0 %v5724_v62  ;;  %v608_v62 = vld [vmem:[#allocation6 + $0x2b8] sm:$0xff] }
  0x98   : > { %5729 = vmatprep.subr.bf16.mxu0 %v5728_v4  ;;  %v5752_v3 = vpack.c.bf16 %v609_v63, %v608_v62  ;;  %v1026_v63 = vld [vmem:[#allocation6 + $0x2f0] sm:$0xff] }
  0x99   : > { %v5892_v2 = vpack.c.bf16 %v1027_v1, %v1026_v63  ;;  %v1038_v63 = vld [vmem:[#allocation6 + $0x350] sm:$0xff]  ;;  %v1039_v1 = vld [vmem:[#allocation6 + $0x358] sm:$0xff] }
  0x9b   : > { %5731 = vmatpush3.bf16.msra.mxu0 %v5728_v4  ;;  %v610_v4 = vld [vmem:[#allocation6 + $0x2c8] sm:$0xff] }
  0x9c   : > { %5765 = vmatprep.subr.bf16.mxu0 %v7171_v10  ;;  %v5756_v9 = vpack.c.bf16 %v611_v5, %v610_v4 }
 0x151   : > { %v4496_v21 = vpop.f32.mrb[0].mxu0 }
 0x152   : > { %v357_v22 = vpop.f32.mrb[1].mxu0  ;;  %v7163_v24 = vadd.f32 %v4496_v21, %v3837_v20 }
 0x153   : > { %v7161_v23 = vadd.f32 %v3837_v20, %v357_v22 }
 0x154   : > { %v373_v26 = vmul.f32 %v7163_v24, %v7163_v24 }
 0x155   : > { %366 = vadd.xlane.f32.xlu0 %v7161_v23  ;;  %v372_v25 = vmul.f32 %v7161_v23, %v7161_v23 }
 0x157   : > { %374 = vadd.xlane.f32.xlu1 %v372_v25 }
 0x159   : > { %368 = vadd.xlane.f32.xlu0 %v7163_v24 }
 0x15b   : > { %376 = vadd.xlane.f32.xlu1 %v373_v26 }
 0x1e2   : > { %v367_v11 = vpop.xlane.xlu0 %366 }
 0x1e3   : > { %v370_v12 = vmul.f32 0.03125, %v367_v11  ;;  %v612_v11 = vld [vmem:[#allocation6 + $0x2d8] sm:$0xff] }
 0x1e4   : > { %v375_v13 = vpop.xlane.xlu1 %374 }
 0x1e5   : > { %v380_v14 = vmul.f32 %v370_v12, %v370_v12  ;;  %v378_v15 = vmul.f32 0.03125, %v375_v13  ;;  %v384_v27 = vsub.f32 %v7161_v23, %v370_v12  ;;  %v613_v12 = vld [vmem:[#allocation6 + $0x2e0] sm:$0xff] }
 0x1e6   : > { %v369_v16 = vpop.xlane.xlu0 %368 }
 0x1e7   : > { %v382_v17 = vsub.f32 %v378_v15, %v380_v14  ;;  %v371_v18 = vmul.f32 0.03125, %v369_v16  ;;  %v5760_v14 = vpack.c.bf16 %v613_v12, %v612_v11  ;;  %v251_v15 = vld [vmem:[#allocation6 + $0xb8] sm:$0xff]  ;;  %v252_v16 = vld [vmem:[#allocation6 + $0xc0] sm:$0xff] }
 0x1e8   : > { %v377_v19 = vpop.xlane.xlu1 %376 }
 0x1e9   : > { %v386_v20 = vadd.f32 1e-05, %v382_v17  ;;  %v381_v21 = vmul.f32 %v371_v18, %v371_v18  ;;  %v379_v22 = vmul.f32 0.03125, %v377_v19  ;;  %v385_v32 = vsub.f32 %v7163_v24, %v371_v18  ;;  %v3842_v18 = vld [vmem:[#allocation6 + $0x1d8] ss:$0 sm:$0xff] }
 0x1ea   : > { %v7220_v17 = vpack.c.bf16 %v252_v16, %v251_v15  ;;  %v3843_v19 = vld [vmem:[#allocation6 + $0x260] ss:$0 sm:$0xff] }
 0x1eb   : > { %6760 = vrsqrt.f32 %v386_v20  ;;  %v383_v25 = vsub.f32 %v379_v22, %v381_v21 }
 0x1ed   : > { %v387_v26 = vadd.f32 1e-05, %v383_v25 }
 0x1ef   : > { %6762 = vrsqrt.f32 %v387_v26 }
 0x1f5   : > { %v6761_v28 = vpop.eup %6760 }
 0x1f6   : > { %v390_v30 = vmul.f32 %v6761_v28, %v384_v27 }
 0x1f8   : > { %v397_v33 = vmul.f32 %v3840_v29, %v390_v30 }
 0x1f9   : > { %v6763_v34 = vpop.eup %6762 }
 0x1fa   : > { %v404_v35 = vadd.f32 %v3841_v31, %v397_v33  ;;  %v391_v36 = vmul.f32 %v6763_v34, %v385_v32 }
 0x1fc   : > { %4529 = vmatprep.mubr.f32.mxu1 %v404_v35  ;;  %4564 = vmatprep.mubr.f32.mxu0 %v404_v35  ;;  %v398_v39 = vmul.f32 %v3840_v29, %v391_v36  ;;  %v253_v36 = vld [vmem:[#allocation6 + $0xc8] sm:$0xff] }
 0x1fd   : > { %v7230_v38 = vpack.c.bf16 %v254_v37, %v253_v36 }
 0x1fe   : > { %v7176_v42 = vadd.f32 %v3841_v31, %v398_v39  ;;  %v255_v39 = vld [vmem:[#allocation6 + $0xd8] sm:$0xff] }
 0x1ff   : > { %v7236_v41 = vpack.c.bf16 %v256_v40, %v255_v39 }
 0x200   : > { %4530 = vmatmul.mubr.f32.vlgmr.msra.gmra.mrb[0].mxu1 %v7176_v42  ;;  %4565 = vmatmul.mubr.f32.vlgmr.msra.gmra.mrb[2].mxu0 %v7176_v42 }
 0x201   : > { %5735 = vmatpush3.bf16.msra.mxu1 %v5732_v7  ;;  %4599 = vmatprep.mubr.f32.mxu1 %v404_v35  ;;  %v249_v7 = vld [vmem:[#allocation6 + $0xa8] sm:$0xff] }
 0x202   : > { %5737 = vmatprep.subr.bf16.mxu1 %v5736_v43  ;;  %5767 = vmatpush3.bf16.msra.mxu0 %v7171_v10  ;;  %v7200_v13 = vpack.c.bf16 %v250_v8, %v249_v7 }
 0x203   : > { %5769 = vmatprep.subr.bf16.mxu0 %v7178_v46 }
 0x205   : > { %5739 = vmatpush3.bf16.msra.mxu1 %v5736_v43  ;;  %v258_v43 = vld [vmem:[#allocation6 + $0xf0] sm:$0xff] }
 0x206   : > { %5741 = vmatprep.subr.bf16.mxu1 %v5740_v49  ;;  %5771 = vmatpush3.bf16.msra.mxu0 %v7178_v46 }
 0x207   : > { %5773 = vmatprep.subr.bf16.mxu0 %v7184_v52 }
 0x209   : > { %5743 = vmatpush3.bf16.msra.mxu1 %v5740_v49  ;;  %v261_v49 = vld [vmem:[#allocation6 + $0x108] sm:$0xff] }
 0x20a   : > { %5745 = vmatprep.subr.bf16.mxu1 %v5744_v55  ;;  %5775 = vmatpush3.bf16.msra.mxu0 %v7184_v52  ;;  %v7254_v51 = vpack.c.bf16 %v262_v50, %v261_v49  ;;  %v1033_v49 = vld [vmem:[#allocation6 + $0x328] sm:$0xff] }
 0x20b   : > { %5777 = vmatprep.subr.bf16.mxu0 %v7188_v58  ;;  %v5904_v50 = vpack.c.bf16 %v1033_v49, %v1032_v47  ;;  %v1174_v49 = vld [vmem:[#allocation6 + $0x3c8] sm:$0xff] }
 0x20d   : > { %5747 = vmatpush3.bf16.msra.mxu1 %v5744_v55  ;;  %v7260_v55 = vpack.c.bf16 %v264_v54, %v263_v53  ;;  %v1034_v53 = vld [vmem:[#allocation6 + $0x330] sm:$0xff]  ;;  %v1035_v54 = vld [vmem:[#allocation6 + $0x338] sm:$0xff] }
 0x20e   : > { %5749 = vmatprep.subr.bf16.mxu1 %v5748_v61  ;;  %5779 = vmatpush3.bf16.msra.mxu0 %v7188_v58  ;;  %v5908_v56 = vpack.c.bf16 %v1035_v54, %v1034_v53  ;;  %v1176_v54 = vld [vmem:[#allocation6 + $0x3d8] sm:$0xff] }
 0x20f   : > { %5781 = vmatprep.subr.bf16.mxu0 %v7192_v0 }
 0x211   : > { %5751 = vmatpush3.bf16.msra.mxu1 %v5748_v61  ;;  %v268_v61 = vld [vmem:[#allocation6 + $0x140] sm:$0xff] }
 0x212   : > { %5753 = vmatprep.subr.bf16.mxu1 %v5752_v3  ;;  %5783 = vmatpush3.bf16.msra.mxu0 %v7192_v0  ;;  %v7270_v62 = vpack.c.bf16 %v268_v61, %v267_v60  ;;  %v1037_v60 = vld [vmem:[#allocation6 + $0x348] sm:$0xff] }
 0x213   : > { %5785 = vmatprep.subr.bf16.mxu0 %v7196_v6  ;;  %v5912_v61 = vpack.c.bf16 %v1037_v60, %v1036_v57  ;;  %v1178_v60 = vld [vmem:[#allocation6 + $0x3e8] sm:$0xff] }
 0x215   : > { %5755 = vmatpush3.bf16.msra.mxu1 %v5752_v3 }
 0x216   : > { %5757 = vmatprep.subr.bf16.mxu1 %v5756_v9  ;;  %5787 = vmatpush3.bf16.msra.mxu0 %v7196_v6 }
 0x217   : > { %5789 = vmatprep.subr.bf16.mxu0 %v7200_v13 }
 0x219   : > { %5759 = vmatpush3.bf16.msra.mxu1 %v5756_v9 }
 0x21a   : > { %5761 = vmatprep.subr.bf16.mxu1 %v5760_v14  ;;  %5791 = vmatpush3.bf16.msra.mxu0 %v7200_v13 }
 0x21b   : > { %5793 = vmatprep.subr.bf16.mxu0 %v7220_v17 }
 0x21d   : > { %5763 = vmatpush3.bf16.msra.mxu1 %v5760_v14 }
 0x21e   : > { %5797 = vmatprep.subr.bf16.mxu1 %v7171_v10  ;;  %5795 = vmatpush3.bf16.msra.mxu0 %v7220_v17 }
 0x21f   : > { %5829 = vmatprep.subr.bf16.mxu0 %v7230_v38 }
 0x220   : > { %4600 = vmatmul.mubr.f32.vlgmr.msra.gmra.mrb[2].mxu1 %v7176_v42  ;;  %v257_v42 = vld [vmem:[#allocation6 + $0xe8] sm:$0xff] }
 0x221   : > { %5799 = vmatpush3.bf16.msra.mxu1 %v7171_v10  ;;  %v7242_v44 = vpack.c.bf16 %v258_v43, %v257_v42  ;;  %v1030_v42 = vld [vmem:[#allocation6 + $0x310] sm:$0xff]  ;;  %v1031_v43 = vld [vmem:[#allocation6 + $0x318] sm:$0xff] }
 0x222   : > { %5801 = vmatprep.subr.bf16.mxu1 %v7178_v46  ;;  %v5900_v45 = vpack.c.bf16 %v1031_v43, %v1030_v42  ;;  %v1172_v43 = vld [vmem:[#allocation6 + $0x3b8] sm:$0xff] }
 0x225   : > { %5803 = vmatpush3.bf16.msra.mxu1 %v7178_v46 }
 0x226   : > { %5805 = vmatprep.subr.bf16.mxu1 %v7184_v52 }
 0x229   : > { %5807 = vmatpush3.bf16.msra.mxu1 %v7184_v52 }
 0x22a   : > { %5809 = vmatprep.subr.bf16.mxu1 %v7188_v58 }
 0x22d   : > { %5811 = vmatpush3.bf16.msra.mxu1 %v7188_v58 }
 0x22e   : > { %5813 = vmatprep.subr.bf16.mxu1 %v7192_v0 }
 0x231   : > { %5815 = vmatpush3.bf16.msra.mxu1 %v7192_v0 }
 0x232   : > { %5817 = vmatprep.subr.bf16.mxu1 %v7196_v6 }
 0x235   : > { %5819 = vmatpush3.bf16.msra.mxu1 %v7196_v6 }
 0x236   : > { %5821 = vmatprep.subr.bf16.mxu1 %v7200_v13 }
 0x239   : > { %5823 = vmatpush3.bf16.msra.mxu1 %v7200_v13 }
 0x23a   : > { %5825 = vmatprep.subr.bf16.mxu1 %v7220_v17 }
 0x23d   : > { %5827 = vmatpush3.bf16.msra.mxu1 %v7220_v17 }
 0x23e   : > { %5861 = vmatprep.subr.bf16.mxu1 %v7230_v38 }
 0x2d3   : > { %v4531_v20 = vpop.f32.mrb[0].mxu1  ;;  %v4566_v21 = vpop.f32.mrb[2].mxu0 }
 0x2d4   : > { %v499_v22 = vadd.f32 %v4531_v20, %v3842_v18  ;;  %v595_v25 = vadd.f32 %v4566_v21, %v3843_v19  ;;  %v493_v26 = vpop.f32.mrb[1].mxu1  ;;  %v589_v27 = vpop.f32.mrb[3].mxu0 }
 0x2d5   : > { %v494_v28 = vadd.f32 %v3842_v18, %v493_v26  ;;  %v590_v29 = vadd.f32 %v3843_v19, %v589_v27 }
 0x2d6   : > { %v695_v30 = vmul.f32 %v595_v25, %v499_v22 }
 0x2d7   : > { %v771_v31 = vmul.f32 %v595_v25, %v494_v28  ;;  %v694_v32 = vmul.f32 %v590_v29, %v494_v28  ;;  %v772_v33 = vmul.f32 %v590_v29, %v499_v22 }
 0x2d9   : > { %4634 = vmatprep.mubr.f32.mxu0 %v694_v32  ;;  %4669 = vmatprep.mubr.f32.mxu1 %v771_v31  ;;  %v1028_v32 = vld [vmem:[#allocation6 + $0x300] sm:$0xff] }
 0x2da   : > { %4635 = vmatmul.mubr.f32.vlgmr.msra.gmra.mrb[4].mxu0 %v695_v30  ;;  %4670 = vmatmul.mubr.f32.vlgmr.msra.gmra.mrb[4].mxu1 %v772_v33  ;;  %v1029_v33 = vld [vmem:[#allocation6 + $0x308] sm:$0xff] }
 0x2db   : > { %5831 = vmatpush3.bf16.msra.mxu0 %v7230_v38  ;;  %5863 = vmatpush3.bf16.msra.mxu1 %v7230_v38  ;;  %v5896_v40 = vpack.c.bf16 %v1029_v33, %v1028_v32 }
 0x2dc   : > { %5833 = vmatprep.subr.bf16.mxu0 %v7236_v41  ;;  %5865 = vmatprep.subr.bf16.mxu1 %v7236_v41 }
 0x2df   : > { %5835 = vmatpush3.bf16.msra.mxu0 %v7236_v41  ;;  %5867 = vmatpush3.bf16.msra.mxu1 %v7236_v41 }
 0x2e0   : > { %5837 = vmatprep.subr.bf16.mxu0 %v7242_v44  ;;  %5869 = vmatprep.subr.bf16.mxu1 %v7242_v44 }
 0x2e3   : > { %5839 = vmatpush3.bf16.msra.mxu0 %v7242_v44  ;;  %5871 = vmatpush3.bf16.msra.mxu1 %v7242_v44 }
 0x2e4   : > { %5841 = vmatprep.subr.bf16.mxu0 %v7248_v48  ;;  %5873 = vmatprep.subr.bf16.mxu1 %v7248_v48 }
 0x2e7   : > { %5843 = vmatpush3.bf16.msra.mxu0 %v7248_v48  ;;  %5875 = vmatpush3.bf16.msra.mxu1 %v7248_v48 }
 0x2e8   : > { %5845 = vmatprep.subr.bf16.mxu0 %v7254_v51  ;;  %5877 = vmatprep.subr.bf16.mxu1 %v7254_v51 }
 0x2eb   : > { %5847 = vmatpush3.bf16.msra.mxu0 %v7254_v51  ;;  %5879 = vmatpush3.bf16.msra.mxu1 %v7254_v51 }
 0x2ec   : > { %5849 = vmatprep.subr.bf16.mxu0 %v7260_v55  ;;  %5881 = vmatprep.subr.bf16.mxu1 %v7260_v55 }
 0x2ef   : > { %5851 = vmatpush3.bf16.msra.mxu0 %v7260_v55  ;;  %5883 = vmatpush3.bf16.msra.mxu1 %v7260_v55 }
 0x2f0   : > { %5853 = vmatprep.subr.bf16.mxu0 %v7262_v59  ;;  %5885 = vmatprep.subr.bf16.mxu1 %v7262_v59 }
 0x2f3   : > { %v7226_v34 = vpop.f32.mrb[2].mxu1  ;;  %5855 = vmatpush3.bf16.msra.mxu0 %v7262_v59  ;;  %5887 = vmatpush3.bf16.msra.mxu1 %v7262_v59 }
 0x2f4   : > { %v7228_v35 = vpop.f32.mrb[3].mxu1  ;;  %5857 = vmatprep.subr.bf16.mxu0 %v7270_v62  ;;  %5889 = vmatprep.subr.bf16.mxu1 %v7270_v62 }
 0x2f7   : > { %5859 = vmatpush3.bf16.msra.mxu0 %v7270_v62  ;;  %5891 = vmatpush3.bf16.msra.mxu1 %v7270_v62 }
 0x2f8   : > { %5893 = vmatprep.subr.bf16.mxu0 %v5892_v2 }
 0x3ad   : > { %v4636_v3 = vpop.f32.mrb[4].mxu0  ;;  %v4671_v4 = vpop.f32.mrb[4].mxu1 }
 0x3ae   : > { %v849_v5 = vmax.f32 %v4636_v3, %v4671_v4  ;;  %v762_v7 = vpop.f32.mrb[5].mxu0  ;;  %v839_v8 = vpop.f32.mrb[5].mxu1 }
 0x3af   : > { %v848_v9 = vmax.f32 %v762_v7, %v839_v8 }
 0x3b0   : > { %v851_v11 = vsub.f32 %v4636_v3, %v849_v5  ;;  %v857_v12 = vsub.f32 %v4671_v4, %v849_v5  ;;  %v1040_v3 = vld [vmem:[#allocation6 + $0x360] sm:$0xff]  ;;  %v1041_v4 = vld [vmem:[#allocation6 + $0x368] sm:$0xff] }
 0x3b1   : > { %v850_v14 = vsub.f32 %v762_v7, %v848_v9  ;;  %v856_v15 = vsub.f32 %v839_v8, %v848_v9  ;;  %v5920_v5 = vpack.c.bf16 %v1041_v4, %v1040_v3  ;;  %v3844_v7 = vld [vmem:[#allocation6 + $0x2e8] ss:$0 sm:$0xff]  ;;  %v1280_v4 = vld [vmem:[#allocation6 + $0x410] sm:$0xff] }
 0x3b2   : > { %v854_v16 = vmul.f32 1.442695, %v851_v11  ;;  %v860_v18 = vmul.f32 1.442695, %v857_v12  ;;  %v691_v8 = vadd.f32 %v7226_v34, %v3844_v7  ;;  %v686_v9 = vadd.f32 %v3844_v7, %v7228_v35 }
 0x3b3   : > { %v852_v19 = vmul.f32 1.442695, %v850_v14  ;;  %v858_v20 = vmul.f32 1.442695, %v856_v15 }
 0x3b4   : > { %6764 = vpow2.f32 %v854_v16 }
 0x3b5   : > { %6766 = vpow2.f32 %v860_v18 }
 0x3b6   : > { %6768 = vpow2.f32 %v852_v19 }
 0x3b7   : > { %6770 = vpow2.f32 %v858_v20 }
 0x3be   : > { %v6765_v21 = vpop.eup %6764 }
 0x3bf   : > { %v6767_v22 = vpop.eup %6766 }
 0x3c0   : > { %v6769_v25 = vpop.eup %6768  ;;  %v863_v26 = vadd.f32 %v6767_v22, %v6765_v21 }
 0x3c1   : > { %v6771_v27 = vpop.eup %6770 }
 0x3c2   : > { %6772 = vrcp.f32 %v863_v26  ;;  %v862_v28 = vadd.f32 %v6771_v27, %v6769_v25  ;;  %v1167_v26 = vld [vmem:[#allocation6 + $0x390] sm:$0xff] }
 0x3c4   : > { %6774 = vrcp.f32 %v862_v28  ;;  %v3845_v28 = vld [vmem:[#allocation6 + $0x370] ss:$0 sm:$0xff] }
 0x3cc   : > { %v6773_v29 = vpop.eup %6772 }
 0x3cd   : > { %v867_v30 = vmul.f32 %v6773_v29, %v6765_v21  ;;  %v944_v31 = vmul.f32 %v6773_v29, %v6767_v22 }
 0x3ce   : > { %v6775_v36 = vpop.eup %6774 }
 0x3cf   : > { %v866_v37 = vmul.f32 %v6775_v36, %v6769_v25  ;;  %v943_v39 = vmul.f32 %v6775_v36, %v6771_v27  ;;  %v1166_v25 = vld [vmem:[#allocation6 + $0x388] sm:$0xff] }
 0x3d0   : > { %v5924_v27 = vpack.c.bf16 %v1167_v26, %v1166_v25 }
 0x3d1   : > { %4704 = vmatprep.mubr.f32.mxu0 %v866_v37  ;;  %4739 = vmatprep.mubr.f32.mxu1 %v943_v39  ;;  %v1169_v37 = vld [vmem:[#allocation6 + $0x3a0] sm:$0xff] }
 0x3d2   : > { %4705 = vmatmul.mubr.f32.vlgmr.msra.gmra.mrb[6].mxu0 %v867_v30  ;;  %4740 = vmatmul.mubr.f32.vlgmr.msra.gmra.mrb[6].mxu1 %v944_v31 }
 0x3d3   : > { %5895 = vmatpush3.bf16.msra.mxu0 %v5892_v2  ;;  %v5916_v2 = vpack.c.bf16 %v1039_v1, %v1038_v63  ;;  %5925 = vmatprep.subr.bf16.mxu1 %v5924_v27  ;;  %v1180_v1 = vld [vmem:[#allocation6 + $0x3f8] sm:$0xff] }
 0x3d4   : > { %5897 = vmatprep.subr.bf16.mxu0 %v5896_v40  ;;  %5927 = vmatpush3.bf16.msra.mxu1 %v5924_v27 }
 0x3d7   : > { %5899 = vmatpush3.bf16.msra.mxu0 %v5896_v40  ;;  %v1171_v40 = vld [vmem:[#allocation6 + $0x3b0] sm:$0xff] }
 0x3d8   : > { %5901 = vmatprep.subr.bf16.mxu0 %v5900_v45 }
 0x3db   : > { %5903 = vmatpush3.bf16.msra.mxu0 %v5900_v45  ;;  %v1173_v45 = vld [vmem:[#allocation6 + $0x3c0] sm:$0xff] }
 0x3dc   : > { %5905 = vmatprep.subr.bf16.mxu0 %v5904_v50  ;;  %v5936_v47 = vpack.c.bf16 %v1173_v45, %v1172_v43  ;;  %v1284_v45 = vld [vmem:[#allocation6 + $0x430] sm:$0xff] }
 0x3df   : > { %5907 = vmatpush3.bf16.msra.mxu0 %v5904_v50  ;;  %v1175_v50 = vld [vmem:[#allocation6 + $0x3d0] sm:$0xff] }
 0x3e0   : > { %5909 = vmatprep.subr.bf16.mxu0 %v5908_v56  ;;  %v5940_v53 = vpack.c.bf16 %v1175_v50, %v1174_v49  ;;  %v1286_v50 = vld [vmem:[#allocation6 + $0x440] sm:$0xff] }
 0x3e3   : > { %5911 = vmatpush3.bf16.msra.mxu0 %v5908_v56  ;;  %v1177_v56 = vld [vmem:[#allocation6 + $0x3e0] sm:$0xff] }
 0x3e4   : > { %5913 = vmatprep.subr.bf16.mxu0 %v5912_v61  ;;  %v5944_v57 = vpack.c.bf16 %v1177_v56, %v1176_v54  ;;  %v1288_v56 = vld [vmem:[#allocation6 + $0x450] sm:$0xff] }
 0x3e7   : > { %5915 = vmatpush3.bf16.msra.mxu0 %v5912_v61  ;;  %v1179_v61 = vld [vmem:[#allocation6 + $0x3f0] sm:$0xff] }
 0x3e8   : > { %5917 = vmatprep.subr.bf16.mxu0 %v5916_v2  ;;  %v5948_v63 = vpack.c.bf16 %v1179_v61, %v1178_v60  ;;  %v1290_v60 = vld [vmem:[#allocation6 + $0x460] sm:$0xff] }
 0x3eb   : > { %5919 = vmatpush3.bf16.msra.mxu0 %v5916_v2  ;;  %v1181_v2 = vld [vmem:[#allocation6 + $0x400] sm:$0xff] }
 0x3ec   : > { %5921 = vmatprep.subr.bf16.mxu0 %v5920_v5  ;;  %v5952_v3 = vpack.c.bf16 %v1181_v2, %v1180_v1  ;;  %v1292_v2 = vld [vmem:[#allocation6 + $0x470] sm:$0xff] }
 0x3ef   : > { %5923 = vmatpush3.bf16.msra.mxu0 %v5920_v5  ;;  %v1281_v5 = vld [vmem:[#allocation6 + $0x418] sm:$0xff] }
 0x3f0   : > { %v5956_v7 = vpack.c.bf16 %v1281_v5, %v1280_v4  ;;  %v1294_v5 = vld [vmem:[#allocation6 + $0x480] sm:$0xff] }
 0x3f2   : > { %5957 = vmatprep.subr.bf16.mxu0 %v5956_v7 }
 0x4a5   : > { %v4706_v11 = vpop.f32.mrb[6].mxu0  ;;  %v4741_v12 = vpop.f32.mrb[6].mxu1 }
 0x4a6   : > { %v1021_v14 = vmul.f32 %v4706_v11, %v691_v8  ;;  %v1023_v15 = vmul.f32 %v4741_v12, %v686_v9  ;;  %v934_v16 = vpop.f32.mrb[7].mxu0  ;;  %v1011_v18 = vpop.f32.mrb[7].mxu1 }
 0x4a7   : > { %v1020_v19 = vmul.f32 %v934_v16, %v686_v9  ;;  %v1022_v20 = vmul.f32 %v1011_v18, %v691_v8 }
 0x4a8   : > { %v1025_v21 = vadd.f32 %v1023_v15, %v1021_v14 }
 0x4a9   : > { %v1024_v22 = vadd.f32 %v1022_v20, %v1020_v19 }
 0x4ab   : > { %4774 = vmatprep.mubr.f32.mxu0 %v1024_v22 }
 0x4ac   : > { %4775 = vmatmul.mubr.f32.vlgmr.msra.gmra.mrb[8].mxu0 %v1025_v21 }
 0x4ad   : > { %5959 = vmatpush3.bf16.msra.mxu0 %v5956_v7  ;;  %v1295_v7 = vld [vmem:[#allocation6 + $0x488] sm:$0xff] }
 0x57f   : > { %v4776_v34 = vpop.f32.mrb[8].mxu0 }
 0x580   : > { %v1118_v35 = vadd.f32 %v4776_v34, %v7163_v24  ;;  %v1108_v29 = vpop.f32.mrb[9].mxu0  ;;  %v1168_v24 = vld [vmem:[#allocation6 + $0x398] sm:$0xff] }
 0x581   : > { %v1117_v30 = vadd.f32 %v1108_v29, %v7161_v23  ;;  %v5928_v39 = vpack.c.bf16 %v1169_v37, %v1168_v24  ;;  %v1170_v23 = vld [vmem:[#allocation6 + $0x3a8] sm:$0xff]  ;;  %v3847_v24 = vld [vmem:[#allocation6 + $0x380] ss:$0 sm:$0xff] }
 0x582   : > { %v7282_v31 = vadd.f32 %v3845_v28, %v1118_v35  ;;  %v5932_v42 = vpack.c.bf16 %v1171_v40, %v1170_v23  ;;  %v3846_v35 = vld [vmem:[#allocation6 + $0x378] ss:$0 sm:$0xff]  ;;  %v1282_v40 = vld [vmem:[#allocation6 + $0x420] sm:$0xff] }
 0x583   : > { %v7284_v32 = vadd.f32 %v3845_v28, %v1117_v30  ;;  %5929 = vmatprep.subr.bf16.mxu1 %v5928_v39 }
 0x584   : > { %1128 = vadd.xlane.f32.xlu1 %v7282_v31  ;;  %v1133_v33 = vmul.f32 %v7282_v31, %v7282_v31  ;;  %5931 = vmatpush3.bf16.msra.mxu1 %v5928_v39 }
 0x585   : > { %1126 = vadd.xlane.f32.xlu0 %v7284_v32  ;;  %v1132_v36 = vmul.f32 %v7284_v32, %v7284_v32  ;;  %5933 = vmatprep.subr.bf16.mxu1 %v5932_v42 }
 0x588   : > { %1136 = vadd.xlane.f32.xlu1 %v1133_v33  ;;  %5935 = vmatpush3.bf16.msra.mxu1 %v5932_v42  ;;  %v1283_v42 = vld [vmem:[#allocation6 + $0x428] sm:$0xff] }
 0x589   : > { %1134 = vadd.xlane.f32.xlu0 %v1132_v36  ;;  %5937 = vmatprep.subr.bf16.mxu1 %v5936_v47  ;;  %v5960_v43 = vpack.c.bf16 %v1283_v42, %v1282_v40  ;;  %v1516_v40 = vld [vmem:[#allocation6 + $0x530] sm:$0xff] }
 0x58b   : > { %5961 = vmatprep.subr.bf16.mxu0 %v5960_v43 }
 0x58c   : > { %5939 = vmatpush3.bf16.msra.mxu1 %v5936_v47  ;;  %5963 = vmatpush3.bf16.msra.mxu0 %v5960_v43  ;;  %v1285_v47 = vld [vmem:[#allocation6 + $0x438] sm:$0xff] }
 0x58d   : > { %5941 = vmatprep.subr.bf16.mxu1 %v5940_v53  ;;  %v5964_v49 = vpack.c.bf16 %v1285_v47, %v1284_v45  ;;  %v1517_v43 = vld [vmem:[#allocation6 + $0x538] sm:$0xff] }
 0x58e   : > { %v6020_v45 = vpack.c.bf16 %v1517_v43, %v1516_v40  ;;  %v1435_v43 = vld [vmem:[#allocation6 + $0x520] sm:$0xff] }
 0x58f   : > { %5965 = vmatprep.subr.bf16.mxu0 %v5964_v49 }
 0x590   : > { %5943 = vmatpush3.bf16.msra.mxu1 %v5940_v53  ;;  %5967 = vmatpush3.bf16.msra.mxu0 %v5964_v49  ;;  %v1287_v53 = vld [vmem:[#allocation6 + $0x448] sm:$0xff]  ;;  %v3849_v49 = vld [vmem:[#allocation6 + $0x490] ss:$0 sm:$0xff] }
 0x591   : > { %5945 = vmatprep.subr.bf16.mxu1 %v5944_v57  ;;  %v5968_v54 = vpack.c.bf16 %v1287_v53, %v1286_v50 }
 0x593   : > { %5969 = vmatprep.subr.bf16.mxu0 %v5968_v54 }
 0x594   : > { %5947 = vmatpush3.bf16.msra.mxu1 %v5944_v57  ;;  %v1289_v57 = vld [vmem:[#allocation6 + $0x458] sm:$0xff]  ;;  %5971 = vmatpush3.bf16.msra.mxu0 %v5968_v54 }
 0x595   : > { %5949 = vmatprep.subr.bf16.mxu1 %v5948_v63  ;;  %v5972_v61 = vpack.c.bf16 %v1289_v57, %v1288_v56 }
 0x597   : > { %5973 = vmatprep.subr.bf16.mxu0 %v5972_v61 }
 0x598   : > { %5951 = vmatpush3.bf16.msra.mxu1 %v5948_v63  ;;  %v1291_v63 = vld [vmem:[#allocation6 + $0x468] sm:$0xff]  ;;  %5975 = vmatpush3.bf16.msra.mxu0 %v5972_v61 }
 0x599   : > { %5953 = vmatprep.subr.bf16.mxu1 %v5952_v3  ;;  %v5976_v1 = vpack.c.bf16 %v1291_v63, %v1290_v60  ;;  %v1423_v63 = vld [vmem:[#allocation6 + $0x4c0] sm:$0xff] }
 0x59b   : > { %5977 = vmatprep.subr.bf16.mxu0 %v5976_v1 }
 0x59c   : > { %5955 = vmatpush3.bf16.msra.mxu1 %v5952_v3  ;;  %v1293_v3 = vld [vmem:[#allocation6 + $0x478] sm:$0xff]  ;;  %5979 = vmatpush3.bf16.msra.mxu0 %v5976_v1 }
 0x59d   : > { %v5980_v4 = vpack.c.bf16 %v1293_v3, %v1292_v2  ;;  %v1519_v2 = vld [vmem:[#allocation6 + $0x548] sm:$0xff] }
 0x59f   : > { %5981 = vmatprep.subr.bf16.mxu0 %v5980_v4 }
 0x5a0   : > { %5983 = vmatpush3.bf16.msra.mxu0 %v5980_v4  ;;  %v1424_v4 = vld [vmem:[#allocation6 + $0x4c8] sm:$0xff] }
 0x611   : > { %v1129_v8 = vpop.xlane.xlu1 %1128 }
 0x612   : > { %v1131_v9 = vmul.f32 0.03125, %v1129_v8  ;;  %v1127_v11 = vpop.xlane.xlu0 %1126  ;;  %v5984_v8 = vpack.c.bf16 %v1295_v7, %v1294_v5  ;;  %v1425_v5 = vld [vmem:[#allocation6 + $0x4d0] sm:$0xff] }
 0x613   : > { %v1130_v12 = vmul.f32 0.03125, %v1127_v11  ;;  %v5996_v7 = vpack.c.bf16 %v1425_v5, %v1424_v4 }
 0x614   : > { %v1141_v15 = vmul.f32 %v1131_v9, %v1131_v9  ;;  %v1145_v27 = vsub.f32 %v7282_v31, %v1131_v9  ;;  %5985 = vmatprep.subr.bf16.mxu0 %v5984_v8  ;;  %v3848_v9 = vld [vmem:[#allocation6 + $0x408] ss:$0 sm:$0xff] }
 0x615   : > { %v1137_v14 = vpop.xlane.xlu1 %1136  ;;  %v1140_v19 = vmul.f32 %v1130_v12, %v1130_v12  ;;  %v1144_v28 = vsub.f32 %v7284_v32, %v1130_v12  ;;  %5987 = vmatpush3.bf16.msra.mxu0 %v5984_v8  ;;  %v1520_v8 = vld [vmem:[#allocation6 + $0x550] sm:$0xff] }
 0x616   : > { %v1139_v16 = vmul.f32 0.03125, %v1137_v14  ;;  %v1135_v18 = vpop.xlane.xlu0 %1134  ;;  %6021 = vmatprep.subr.bf16.mxu0 %v6020_v45 }
 0x617   : > { %v1138_v20 = vmul.f32 0.03125, %v1135_v18 }
 0x618   : > { %v1143_v21 = vsub.f32 %v1139_v16, %v1141_v15 }
 0x619   : > { %v1142_v22 = vsub.f32 %v1138_v20, %v1140_v19 }
 0x61a   : > { %v1147_v25 = vadd.f32 1e-05, %v1143_v21 }
 0x61b   : > { %v1146_v26 = vadd.f32 1e-05, %v1142_v22 }
 0x61c   : > { %6776 = vrsqrt.f32 %v1147_v25 }
 0x61d   : > { %6778 = vrsqrt.f32 %v1146_v26 }
 0x626   : > { %v6777_v34 = vpop.eup %6776 }
 0x627   : > { %v6779_v29 = vpop.eup %6778  ;;  %v1151_v30 = vmul.f32 %v6777_v34, %v1145_v27 }
 0x628   : > { %v1150_v33 = vmul.f32 %v6779_v29, %v1144_v28 }
 0x629   : > { %v1158_v36 = vmul.f32 %v3846_v35, %v1151_v30 }
 0x62a   : > { %v1157_v37 = vmul.f32 %v3846_v35, %v1150_v33 }
 0x62b   : > { %v1165_v23 = vadd.f32 %v3847_v24, %v1158_v36 }
 0x62c   : > { %v1164_v39 = vadd.f32 %v3847_v24, %v1157_v37 }
 0x62e   : > { %4809 = vmatprep.mubr.f32.mxu1 %v1164_v39  ;;  %v1420_v39 = vld [vmem:[#allocation6 + $0x4a8] sm:$0xff] }
 0x62f   : > { %4810 = vmatmul.mubr.f32.vlgmr.msra.gmra.mrb[8].mxu1 %v1165_v23  ;;  %v1421_v23 = vld [vmem:[#allocation6 + $0x4b0] sm:$0xff] }
 0x630   : > { %v5988_v42 = vpack.c.bf16 %v1421_v23, %v1420_v39  ;;  %v1529_v39 = vld [vmem:[#allocation6 + $0x598] sm:$0xff] }
 0x632   : > { %5989 = vmatprep.subr.bf16.mxu1 %v5988_v42 }
 0x633   : > { %5991 = vmatpush3.bf16.msra.mxu1 %v5988_v42  ;;  %v1434_v42 = vld [vmem:[#allocation6 + $0x518] sm:$0xff] }
 0x702   : > { %v4811_v11 = vpop.f32.mrb[8].mxu1 }
 0x703   : > { %v1259_v12 = vadd.f32 %v4811_v11, %v3848_v9  ;;  %v1253_v14 = vpop.f32.mrb[9].mxu1 }
 0x704   : > { %v1254_v15 = vadd.f32 %v3848_v9, %v1253_v14  ;;  %v1521_v9 = vld [vmem:[#allocation6 + $0x558] sm:$0xff]  ;;  %v1427_v14 = vld [vmem:[#allocation6 + $0x4e0] sm:$0xff] }
 0x705   : > { %v1265_v16 = vmul.f32 0.044715, %v1259_v12  ;;  %v1263_v36 = vmul.f32 0.5, %v1259_v12  ;;  %v6028_v11 = vpack.c.bf16 %v1521_v9, %v1520_v8 }
 0x706   : > { %v1264_v18 = vmul.f32 0.044715, %v1254_v15  ;;  %v1262_v30 = vmul.f32 0.5, %v1254_v15 }
 0x707   : > { %v1267_v19 = vmul.f32 %v1265_v16, %v1259_v12  ;;  %v1522_v16 = vld [vmem:[#allocation6 + $0x560] sm:$0xff] }
 0x708   : > { %v1266_v20 = vmul.f32 %v1264_v18, %v1254_v15  ;;  %v1523_v18 = vld [vmem:[#allocation6 + $0x568] sm:$0xff] }
 0x709   : > { %v1269_v21 = vmul.f32 %v1267_v19, %v1259_v12  ;;  %v6032_v19 = vpack.c.bf16 %v1523_v18, %v1522_v16  ;;  %v3850_v18 = vld [vmem:[#allocation6 + $0x498] ss:$0 sm:$0xff] }
 0x70a   : > { %v1268_v22 = vmul.f32 %v1266_v20, %v1254_v15  ;;  %v1428_v20 = vld [vmem:[#allocation6 + $0x4e8] sm:$0xff] }
 0x70b   : > { %v1271_v25 = vadd.f32 %v1269_v21, %v1259_v12  ;;  %v1426_v12 = vld [vmem:[#allocation6 + $0x4d8] sm:$0xff]  ;;  %v1429_v21 = vld [vmem:[#allocation6 + $0x4f0] sm:$0xff] }
 0x70c   : > { %v1270_v26 = vadd.f32 %v1268_v22, %v1254_v15  ;;  %v6000_v15 = vpack.c.bf16 %v1427_v14, %v1426_v12  ;;  %v6004_v22 = vpack.c.bf16 %v1429_v21, %v1428_v20 }
 0x70d   : > { %v1273_v27 = vmul.f32 0.7978846, %v1271_v25  ;;  %v1524_v25 = vld [vmem:[#allocation6 + $0x570] sm:$0xff] }
 0x70e   : > { %v1272_v34 = vmul.f32 0.7978846, %v1270_v26  ;;  %v1525_v26 = vld [vmem:[#allocation6 + $0x578] sm:$0xff] }
 0x70f   : > { %6780 = vtanh.f32 %v1273_v27  ;;  %v6036_v27 = vpack.c.bf16 %v1525_v26, %v1524_v25  ;;  %v3851_v25 = vld [vmem:[#allocation6 + $0x4a0] ss:$0 sm:$0xff] }
 0x710   : > { %6782 = vtanh.f32 %v1272_v34  ;;  %v1430_v34 = vld [vmem:[#allocation6 + $0x4f8] sm:$0xff] }
 0x719   : > { %v6781_v28 = vpop.eup %6780 }
 0x71a   : > { %v6783_v35 = vpop.eup %6782  ;;  %v1277_v29 = vadd.f32 1.0, %v6781_v28  ;;  %v1431_v28 = vld [vmem:[#allocation6 + $0x500] sm:$0xff] }
 0x71b   : > { %v1276_v33 = vadd.f32 1.0, %v6783_v35  ;;  %v1526_v35 = vld [vmem:[#allocation6 + $0x580] sm:$0xff] }
 0x71c   : > { %v1279_v37 = vmul.f32 %v1277_v29, %v1263_v36  ;;  %v6008_v29 = vpack.c.bf16 %v1431_v28, %v1430_v34  ;;  %v1433_v36 = vld [vmem:[#allocation6 + $0x510] sm:$0xff] }
 0x71d   : > { %v1278_v24 = vmul.f32 %v1276_v33, %v1262_v30  ;;  %v1527_v30 = vld [vmem:[#allocation6 + $0x588] sm:$0xff]  ;;  %v1615_v34 = vld [vmem:[#allocation6 + $0x5d0] sm:$0xff] }
 0x71e   : > { %v1432_v33 = vld [vmem:[#allocation6 + $0x508] sm:$0xff] }
 0x71f   : > { %4844 = vmatprep.mubr.f32.mxu0 %v1278_v24  ;;  %v6040_v24 = vpack.c.bf16 %v1527_v30, %v1526_v35  ;;  %v6012_v23 = vpack.c.bf16 %v1433_v36, %v1432_v33  ;;  %v1616_v30 = vld [vmem:[#allocation6 + $0x5d8] sm:$0xff]  ;;  %v1617_v33 = vld [vmem:[#allocation6 + $0x5e0] sm:$0xff] }
 0x720   : > { %4845 = vmatmul.mubr.f32.vlgmr.msra.gmra.mrb[10].mxu0 %v1279_v37  ;;  %v1528_v37 = vld [vmem:[#allocation6 + $0x590] sm:$0xff]  ;;  %v6060_v36 = vpack.c.bf16 %v1617_v33, %v1616_v30 }
 0x721   : > { %6023 = vmatpush3.bf16.msra.mxu0 %v6020_v45  ;;  %v6044_v40 = vpack.c.bf16 %v1529_v39, %v1528_v37  ;;  %v1530_v45 = vld [vmem:[#allocation6 + $0x5a0] sm:$0xff]  ;;  %v1619_v37 = vld [vmem:[#allocation6 + $0x5f0] sm:$0xff] }
 0x7f3   : > { %v4846_v47 = vpop.f32.mrb[10].mxu0 }
 0x7f4   : > { %v1372_v50 = vadd.f32 %v4846_v47, %v7282_v31  ;;  %v1362_v53 = vpop.f32.mrb[11].mxu0  ;;  %v1422_v31 = vld [vmem:[#allocation6 + $0x4b8] sm:$0xff]  ;;  %v1531_v47 = vld [vmem:[#allocation6 + $0x5a8] sm:$0xff] }
 0x7f5   : > { %v1371_v54 = vadd.f32 %v1362_v53, %v7284_v32  ;;  %v5992_v1 = vpack.c.bf16 %v1423_v63, %v1422_v31  ;;  %v1518_v32 = vld [vmem:[#allocation6 + $0x540] sm:$0xff]  ;;  %v1612_v53 = vld [vmem:[#allocation6 + $0x5b8] sm:$0xff] }
 0x7f6   : > { %v7296_v56 = vadd.f32 %v3849_v49, %v1372_v50  ;;  %v6024_v3 = vpack.c.bf16 %v1519_v2, %v1518_v32  ;;  %v6048_v50 = vpack.c.bf16 %v1531_v47, %v1530_v45  ;;  %v1623_v45 = vld [vmem:[#allocation6 + $0x610] sm:$0xff] }
 0x7f7   : > { %v7298_v57 = vadd.f32 %v3849_v49, %v1371_v54  ;;  %5993 = vmatprep.subr.bf16.mxu1 %v5992_v1  ;;  %v6016_v49 = vpack.c.bf16 %v1435_v43, %v1434_v42  ;;  %v1613_v54 = vld [vmem:[#allocation6 + $0x5c0] sm:$0xff]  ;;  %v1622_v43 = vld [vmem:[#allocation6 + $0x608] sm:$0xff] }
 0x7f8   : > { %1382 = vadd.xlane.f32.xlu1 %v7296_v56  ;;  %v1387_v60 = vmul.f32 %v7296_v56, %v7296_v56  ;;  %5995 = vmatpush3.bf16.msra.mxu1 %v5992_v1  ;;  %v6072_v47 = vpack.c.bf16 %v1623_v45, %v1622_v43 }
 0x7f9   : > { %1380 = vadd.xlane.f32.xlu0 %v7298_v57  ;;  %v1386_v61 = vmul.f32 %v7298_v57, %v7298_v57  ;;  %6025 = vmatprep.subr.bf16.mxu0 %v6024_v3 }
 0x7fa   : > { %6027 = vmatpush3.bf16.msra.mxu0 %v6024_v3  ;;  %5997 = vmatprep.subr.bf16.mxu1 %v5996_v7 }
 0x7fb   : > { %6029 = vmatprep.subr.bf16.mxu0 %v6028_v11 }
 0x7fc   : > { %1390 = vadd.xlane.f32.xlu1 %v1387_v60  ;;  %5999 = vmatpush3.bf16.msra.mxu1 %v5996_v7  ;;  %v6052_v60 = vpack.c.bf16 %v1613_v54, %v1612_v53  ;;  %v1626_v54 = vld [vmem:[#allocation6 + $0x628] sm:$0xff] }
 0x7fd   : > { %1388 = vadd.xlane.f32.xlu0 %v1386_v61  ;;  %6001 = vmatprep.subr.bf16.mxu1 %v6000_v15 }
 0x7fe   : > { %6031 = vmatpush3.bf16.msra.mxu0 %v6028_v11 }
 0x7ff   : > { %6033 = vmatprep.subr.bf16.mxu0 %v6032_v19 }
 0x800   : > { %6003 = vmatpush3.bf16.msra.mxu1 %v6000_v15 }
 0x801   : > { %6005 = vmatprep.subr.bf16.mxu1 %v6004_v22 }
 0x802   : > { %6035 = vmatpush3.bf16.msra.mxu0 %v6032_v19 }
 0x803   : > { %6037 = vmatprep.subr.bf16.mxu0 %v6036_v27 }
 0x804   : > { %6007 = vmatpush3.bf16.msra.mxu1 %v6004_v22 }
 0x805   : > { %6009 = vmatprep.subr.bf16.mxu1 %v6008_v29 }
 0x806   : > { %6039 = vmatpush3.bf16.msra.mxu0 %v6036_v27  ;;  %v1614_v27 = vld [vmem:[#allocation6 + $0x5c8] sm:$0xff] }
 0x807   : > { %6041 = vmatprep.subr.bf16.mxu0 %v6040_v24 }
 0x808   : > { %6011 = vmatpush3.bf16.msra.mxu1 %v6008_v29  ;;  %v6056_v29 = vpack.c.bf16 %v1615_v34, %v1614_v27 }
 0x809   : > { %6013 = vmatprep.subr.bf16.mxu1 %v6012_v23 }
 0x80a   : > { %6043 = vmatpush3.bf16.msra.mxu0 %v6040_v24  ;;  %v1618_v24 = vld [vmem:[#allocation6 + $0x5e8] sm:$0xff] }
 0x80b   : > { %6045 = vmatprep.subr.bf16.mxu0 %v6044_v40  ;;  %v6064_v39 = vpack.c.bf16 %v1619_v37, %v1618_v24 }
 0x80c   : > { %6015 = vmatpush3.bf16.msra.mxu1 %v6012_v23  ;;  %v1620_v23 = vld [vmem:[#allocation6 + $0x5f8] sm:$0xff] }
 0x80d   : > { %6017 = vmatprep.subr.bf16.mxu1 %v6016_v49 }
 0x80e   : > { %6047 = vmatpush3.bf16.msra.mxu0 %v6044_v40  ;;  %v1621_v40 = vld [vmem:[#allocation6 + $0x600] sm:$0xff] }
 0x80f   : > { %6049 = vmatprep.subr.bf16.mxu0 %v6048_v50  ;;  %v6068_v42 = vpack.c.bf16 %v1621_v40, %v1620_v23 }
 0x810   : > { %6019 = vmatpush3.bf16.msra.mxu1 %v6016_v49  ;;  %v1624_v49 = vld [vmem:[#allocation6 + $0x618] sm:$0xff] }
 0x811   : > { %6053 = vmatprep.subr.bf16.mxu1 %v6052_v60 }
 0x812   : > { %6051 = vmatpush3.bf16.msra.mxu0 %v6048_v50  ;;  %v1625_v50 = vld [vmem:[#allocation6 + $0x620] sm:$0xff] }
 0x813   : > { %6085 = vmatprep.subr.bf16.mxu0 %v7171_v10  ;;  %v6076_v53 = vpack.c.bf16 %v1625_v50, %v1624_v49 }
 0x885   : > { %v1383_v61 = vpop.xlane.xlu1 %1382 }
 0x886   : > { %v1385_v31 = vmul.f32 0.03125, %v1383_v61  ;;  %v1381_v63 = vpop.xlane.xlu0 %1380 }
 0x887   : > { %v1384_v1 = vmul.f32 0.03125, %v1381_v63  ;;  %v3853_v63 = vld [vmem:[#allocation6 + $0x5b0] ss:$0 sm:$0xff] }
 0x888   : > { %v1395_v2 = vmul.f32 %v1385_v31, %v1385_v31  ;;  %v1399_v14 = vsub.f32 %v7296_v56, %v1385_v31  ;;  %v3852_v31 = vld [vmem:[#allocation6 + $0x528] ss:$0 sm:$0xff] }
 0x889   : > { %v1391_v32 = vpop.xlane.xlu1 %1390  ;;  %v1394_v5 = vmul.f32 %v1384_v1, %v1384_v1  ;;  %v1398_v16 = vsub.f32 %v7298_v57, %v1384_v1 }
 0x88a   : > { %v1393_v3 = vmul.f32 0.03125, %v1391_v32  ;;  %v1389_v4 = vpop.xlane.xlu0 %1388 }
 0x88b   : > { %v1392_v7 = vmul.f32 0.03125, %v1389_v4 }
 0x88c   : > { %v1397_v8 = vsub.f32 %v1393_v3, %v1395_v2 }
 0x88d   : > { %v1396_v9 = vsub.f32 %v1392_v7, %v1394_v5 }
 0x88e   : > { %v1401_v11 = vadd.f32 1e-05, %v1397_v8 }
 0x88f   : > { %v1400_v12 = vadd.f32 1e-05, %v1396_v9 }
 0x890   : > { %6784 = vrsqrt.f32 %v1401_v11 }
 0x891   : > { %6786 = vrsqrt.f32 %v1400_v12 }
 0x89a   : > { %v6785_v15 = vpop.eup %6784 }
 0x89b   : > { %v6787_v19 = vpop.eup %6786  ;;  %v1405_v20 = vmul.f32 %v6785_v15, %v1399_v14 }
 0x89c   : > { %v1404_v21 = vmul.f32 %v6787_v19, %v1398_v16  ;;  %v2041_v19 = vld [vmem:[#allocation6 + $0x648] sm:$0xff] }
 0x89d   : > { %v1412_v22 = vmul.f32 %v3850_v18, %v1405_v20 }
 0x89e   : > { %v1411_v26 = vmul.f32 %v3850_v18, %v1404_v21  ;;  %v2040_v18 = vld [vmem:[#allocation6 + $0x640] sm:$0xff] }
 0x89f   : > { %v1419_v35 = vadd.f32 %v3851_v25, %v1412_v22  ;;  %v6212_v20 = vpack.c.bf16 %v2041_v19, %v2040_v18  ;;  %v2052_v18 = vld [vmem:[#allocation6 + $0x6a0] sm:$0xff]  ;;  %v2053_v19 = vld [vmem:[#allocation6 + $0x6a8] sm:$0xff] }
 0x8a0   : > { %v1418_v28 = vadd.f32 %v3851_v25, %v1411_v26 }
 0x8a2   : > { %4879 = vmatprep.mubr.f32.mxu1 %v1418_v28  ;;  %4914 = vmatprep.mubr.f32.mxu0 %v1418_v28 }
 0x8a3   : > { %4880 = vmatmul.mubr.f32.vlgmr.msra.gmra.mrb[10].mxu1 %v1419_v35  ;;  %4915 = vmatmul.mubr.f32.vlgmr.msra.gmra.mrb[12].mxu0 %v1419_v35 }
 0x8a4   : > { %6055 = vmatpush3.bf16.msra.mxu1 %v6052_v60  ;;  %4949 = vmatprep.mubr.f32.mxu1 %v1418_v28  ;;  %v1627_v60 = vld [vmem:[#allocation6 + $0x630] sm:$0xff] }
 0x8a5   : > { %6057 = vmatprep.subr.bf16.mxu1 %v6056_v29  ;;  %6087 = vmatpush3.bf16.msra.mxu0 %v7171_v10  ;;  %v6080_v61 = vpack.c.bf16 %v1627_v60, %v1626_v54  ;;  %v2043_v54 = vld [vmem:[#allocation6 + $0x658] sm:$0xff] }
 0x8a6   : > { %6089 = vmatprep.subr.bf16.mxu0 %v7178_v46 }
 0x8a8   : > { %6059 = vmatpush3.bf16.msra.mxu1 %v6056_v29 }
 0x8a9   : > { %6061 = vmatprep.subr.bf16.mxu1 %v6060_v36  ;;  %6091 = vmatpush3.bf16.msra.mxu0 %v7178_v46 }
 0x8aa   : > { %6093 = vmatprep.subr.bf16.mxu0 %v7184_v52 }
 0x8ac   : > { %6063 = vmatpush3.bf16.msra.mxu1 %v6060_v36 }
 0x8ad   : > { %6065 = vmatprep.subr.bf16.mxu1 %v6064_v39  ;;  %6095 = vmatpush3.bf16.msra.mxu0 %v7184_v52 }
 0x8ae   : > { %6097 = vmatprep.subr.bf16.mxu0 %v7188_v58 }
 0x8b0   : > { %6067 = vmatpush3.bf16.msra.mxu1 %v6064_v39 }
 0x8b1   : > { %6069 = vmatprep.subr.bf16.mxu1 %v6068_v42  ;;  %6099 = vmatpush3.bf16.msra.mxu0 %v7188_v58 }
 0x8b2   : > { %6101 = vmatprep.subr.bf16.mxu0 %v7192_v0 }
 0x8b4   : > { %6071 = vmatpush3.bf16.msra.mxu1 %v6068_v42 }
 0x8b5   : > { %6073 = vmatprep.subr.bf16.mxu1 %v6072_v47  ;;  %6103 = vmatpush3.bf16.msra.mxu0 %v7192_v0 }
 0x8b6   : > { %6105 = vmatprep.subr.bf16.mxu0 %v7196_v6 }
 0x8b8   : > { %6075 = vmatpush3.bf16.msra.mxu1 %v6072_v47 }
 0x8b9   : > { %6077 = vmatprep.subr.bf16.mxu1 %v6076_v53  ;;  %6107 = vmatpush3.bf16.msra.mxu0 %v7196_v6 }
 0x8ba   : > { %6109 = vmatprep.subr.bf16.mxu0 %v7200_v13 }
 0x8bc   : > { %6079 = vmatpush3.bf16.msra.mxu1 %v6076_v53  ;;  %v2042_v53 = vld [vmem:[#allocation6 + $0x650] sm:$0xff] }
 0x8bd   : > { %6081 = vmatprep.subr.bf16.mxu1 %v6080_v61  ;;  %6111 = vmatpush3.bf16.msra.mxu0 %v7200_v13 }
 0x8be   : > { %6113 = vmatprep.subr.bf16.mxu0 %v7220_v17 }
 0x8c0   : > { %6083 = vmatpush3.bf16.msra.mxu1 %v6080_v61 }
 0x8c1   : > { %6117 = vmatprep.subr.bf16.mxu1 %v7171_v10  ;;  %6115 = vmatpush3.bf16.msra.mxu0 %v7220_v17 }
 0x8c2   : > { %6149 = vmatprep.subr.bf16.mxu0 %v7230_v38 }
 0x8c3   : > { %4950 = vmatmul.mubr.f32.vlgmr.msra.gmra.mrb[12].mxu1 %v1419_v35 }
 0x8c4   : > { %6119 = vmatpush3.bf16.msra.mxu1 %v7171_v10 }
 0x8c5   : > { %6121 = vmatprep.subr.bf16.mxu1 %v7178_v46 }
 0x8c8   : > { %6123 = vmatpush3.bf16.msra.mxu1 %v7178_v46 }
 0x8c9   : > { %6125 = vmatprep.subr.bf16.mxu1 %v7184_v52 }
 0x8cc   : > { %6127 = vmatpush3.bf16.msra.mxu1 %v7184_v52 }
 0x8cd   : > { %6129 = vmatprep.subr.bf16.mxu1 %v7188_v58 }
 0x8d0   : > { %6131 = vmatpush3.bf16.msra.mxu1 %v7188_v58 }
 0x8d1   : > { %6133 = vmatprep.subr.bf16.mxu1 %v7192_v0 }
 0x8d4   : > { %6135 = vmatpush3.bf16.msra.mxu1 %v7192_v0 }
 0x8d5   : > { %6137 = vmatprep.subr.bf16.mxu1 %v7196_v6 }
 0x8d8   : > { %6139 = vmatpush3.bf16.msra.mxu1 %v7196_v6 }
 0x8d9   : > { %6141 = vmatprep.subr.bf16.mxu1 %v7200_v13 }
 0x8dc   : > { %6143 = vmatpush3.bf16.msra.mxu1 %v7200_v13 }
 0x8dd   : > { %6145 = vmatprep.subr.bf16.mxu1 %v7220_v17 }
 0x8e0   : > { %6147 = vmatpush3.bf16.msra.mxu1 %v7220_v17 }
 0x8e1   : > { %6181 = vmatprep.subr.bf16.mxu1 %v7230_v38 }
 0x976   : > { %v4881_v1 = vpop.f32.mrb[10].mxu1  ;;  %v4916_v32 = vpop.f32.mrb[12].mxu0 }
 0x977   : > { %v1513_v2 = vadd.f32 %v4881_v1, %v3852_v31  ;;  %v1609_v3 = vadd.f32 %v4916_v32, %v3853_v63  ;;  %v1507_v4 = vpop.f32.mrb[11].mxu1  ;;  %v1603_v5 = vpop.f32.mrb[13].mxu0  ;;  %v2044_v1 = vld [vmem:[#allocation6 + $0x660] sm:$0xff]  ;;  %v2045_v32 = vld [vmem:[#allocation6 + $0x668] sm:$0xff] }
 0x978   : > { %v1508_v7 = vadd.f32 %v3852_v31, %v1507_v4  ;;  %v1604_v8 = vadd.f32 %v3853_v63, %v1603_v5  ;;  %v6216_v63 = vpack.c.bf16 %v2043_v54, %v2042_v53  ;;  %v2047_v4 = vld [vmem:[#allocation6 + $0x678] sm:$0xff] }
 0x979   : > { %v1709_v9 = vmul.f32 %v1609_v3, %v1513_v2 }
 0x97a   : > { %v1785_v11 = vmul.f32 %v1609_v3, %v1508_v7  ;;  %v1708_v12 = vmul.f32 %v1604_v8, %v1508_v7  ;;  %v1786_v14 = vmul.f32 %v1604_v8, %v1513_v2  ;;  %v6220_v2 = vpack.c.bf16 %v2045_v32, %v2044_v1  ;;  %v2046_v3 = vld [vmem:[#allocation6 + $0x670] sm:$0xff]  ;;  %v2048_v7 = vld [vmem:[#allocation6 + $0x680] sm:$0xff]  ;;  %v2049_v8 = vld [vmem:[#allocation6 + $0x688] sm:$0xff] }
 0x97b   : > { %v6224_v5 = vpack.c.bf16 %v2047_v4, %v2046_v3  ;;  %v2186_v32 = vld [vmem:[#allocation6 + $0x708] sm:$0xff]  ;;  %v2188_v4 = vld [vmem:[#allocation6 + $0x718] sm:$0xff] }
 0x97c   : > { %4984 = vmatprep.mubr.f32.mxu0 %v1708_v12  ;;  %5019 = vmatprep.mubr.f32.mxu1 %v1785_v11  ;;  %v2050_v11 = vld [vmem:[#allocation6 + $0x690] sm:$0xff]  ;;  %v2051_v12 = vld [vmem:[#allocation6 + $0x698] sm:$0xff] }
 0x97d   : > { %4985 = vmatmul.mubr.f32.vlgmr.msra.gmra.mrb[14].mxu0 %v1709_v9  ;;  %5020 = vmatmul.mubr.f32.vlgmr.msra.gmra.mrb[14].mxu1 %v1786_v14  ;;  %v6228_v9 = vpack.c.bf16 %v2049_v8, %v2048_v7  ;;  %v6232_v14 = vpack.c.bf16 %v2051_v12, %v2050_v11  ;;  %v2190_v8 = vld [vmem:[#allocation6 + $0x728] sm:$0xff]  ;;  %v2192_v12 = vld [vmem:[#allocation6 + $0x738] sm:$0xff] }
 0x97e   : > { %6151 = vmatpush3.bf16.msra.mxu0 %v7230_v38  ;;  %6183 = vmatpush3.bf16.msra.mxu1 %v7230_v38 }
 0x97f   : > { %6153 = vmatprep.subr.bf16.mxu0 %v7236_v41  ;;  %6185 = vmatprep.subr.bf16.mxu1 %v7236_v41 }
 0x982   : > { %6155 = vmatpush3.bf16.msra.mxu0 %v7236_v41  ;;  %6187 = vmatpush3.bf16.msra.mxu1 %v7236_v41 }
 0x983   : > { %6157 = vmatprep.subr.bf16.mxu0 %v7242_v44  ;;  %6189 = vmatprep.subr.bf16.mxu1 %v7242_v44 }
 0x986   : > { %6159 = vmatpush3.bf16.msra.mxu0 %v7242_v44  ;;  %6191 = vmatpush3.bf16.msra.mxu1 %v7242_v44 }
 0x987   : > { %6161 = vmatprep.subr.bf16.mxu0 %v7248_v48  ;;  %6193 = vmatprep.subr.bf16.mxu1 %v7248_v48 }
 0x98a   : > { %6163 = vmatpush3.bf16.msra.mxu0 %v7248_v48  ;;  %6195 = vmatpush3.bf16.msra.mxu1 %v7248_v48 }
 0x98b   : > { %6165 = vmatprep.subr.bf16.mxu0 %v7254_v51  ;;  %6197 = vmatprep.subr.bf16.mxu1 %v7254_v51 }
 0x98e   : > { %6167 = vmatpush3.bf16.msra.mxu0 %v7254_v51  ;;  %6199 = vmatpush3.bf16.msra.mxu1 %v7254_v51 }
 0x98f   : > { %6169 = vmatprep.subr.bf16.mxu0 %v7260_v55  ;;  %6201 = vmatprep.subr.bf16.mxu1 %v7260_v55 }
 0x992   : > { %6171 = vmatpush3.bf16.msra.mxu0 %v7260_v55  ;;  %6203 = vmatpush3.bf16.msra.mxu1 %v7260_v55 }
 0x993   : > { %6173 = vmatprep.subr.bf16.mxu0 %v7262_v59  ;;  %6205 = vmatprep.subr.bf16.mxu1 %v7262_v59 }
 0x996   : > { %v7366_v15 = vpop.f32.mrb[12].mxu1  ;;  %6175 = vmatpush3.bf16.msra.mxu0 %v7262_v59  ;;  %6207 = vmatpush3.bf16.msra.mxu1 %v7262_v59 }
 0x997   : > { %v7370_v16 = vpop.f32.mrb[13].mxu1  ;;  %6177 = vmatprep.subr.bf16.mxu0 %v7270_v62  ;;  %6209 = vmatprep.subr.bf16.mxu1 %v7270_v62 }
 0x99a   : > { %6179 = vmatpush3.bf16.msra.mxu0 %v7270_v62  ;;  %6211 = vmatpush3.bf16.msra.mxu1 %v7270_v62 }
 0x99b   : > { %6213 = vmatprep.subr.bf16.mxu0 %v6212_v20 }
 0xa50   : > { %v4986_v21 = vpop.f32.mrb[14].mxu0  ;;  %v5021_v22 = vpop.f32.mrb[14].mxu1 }
 0xa51   : > { %v1863_v25 = vmax.f32 %v4986_v21, %v5021_v22  ;;  %v1776_v26 = vpop.f32.mrb[15].mxu0  ;;  %v1853_v27 = vpop.f32.mrb[15].mxu1 }
 0xa52   : > { %v1862_v34 = vmax.f32 %v1776_v26, %v1853_v27 }
 0xa53   : > { %v1865_v28 = vsub.f32 %v4986_v21, %v1863_v25  ;;  %v1871_v35 = vsub.f32 %v5021_v22, %v1863_v25  ;;  %v2054_v21 = vld [vmem:[#allocation6 + $0x6b0] sm:$0xff]  ;;  %v2055_v22 = vld [vmem:[#allocation6 + $0x6b8] sm:$0xff] }
 0xa54   : > { %v1864_v29 = vsub.f32 %v1776_v26, %v1862_v34  ;;  %v1870_v30 = vsub.f32 %v1853_v27, %v1862_v34  ;;  %v6240_v25 = vpack.c.bf16 %v2055_v22, %v2054_v21  ;;  %v3854_v26 = vld [vmem:[#allocation6 + $0x638] ss:$0 sm:$0xff]  ;;  %v2294_v22 = vld [vmem:[#allocation6 + $0x760] sm:$0xff] }
 0xa55   : > { %v1868_v33 = vmul.f32 1.442695, %v1865_v28  ;;  %v1874_v36 = vmul.f32 1.442695, %v1871_v35  ;;  %v1705_v27 = vadd.f32 %v7366_v15, %v3854_v26  ;;  %v1700_v34 = vadd.f32 %v3854_v26, %v7370_v16 }
 0xa56   : > { %v1866_v24 = vmul.f32 1.442695, %v1864_v29  ;;  %v1872_v37 = vmul.f32 1.442695, %v1870_v30 }
 0xa57   : > { %6788 = vpow2.f32 %v1868_v33 }
 0xa58   : > { %6790 = vpow2.f32 %v1874_v36 }
 0xa59   : > { %6792 = vpow2.f32 %v1866_v24 }
 0xa5a   : > { %6794 = vpow2.f32 %v1872_v37 }
 0xa61   : > { %v6789_v39 = vpop.eup %6788 }
 0xa62   : > { %v6791_v23 = vpop.eup %6790 }
 0xa63   : > { %v6793_v40 = vpop.eup %6792  ;;  %v1877_v42 = vadd.f32 %v6791_v23, %v6789_v39 }
 0xa64   : > { %v6795_v43 = vpop.eup %6794 }
 0xa65   : > { %6796 = vrcp.f32 %v1877_v42  ;;  %v1876_v45 = vadd.f32 %v6795_v43, %v6793_v40  ;;  %v2181_v42 = vld [vmem:[#allocation6 + $0x6e0] sm:$0xff] }
 0xa67   : > { %6798 = vrcp.f32 %v1876_v45  ;;  %v3855_v45 = vld [vmem:[#allocation6 + $0x6c0] ss:$0 sm:$0xff] }
 0xa6f   : > { %v6797_v47 = vpop.eup %6796 }
 0xa70   : > { %v1881_v49 = vmul.f32 %v6797_v47, %v6789_v39  ;;  %v1958_v50 = vmul.f32 %v6797_v47, %v6791_v23 }
 0xa71   : > { %v6799_v60 = vpop.eup %6798 }
 0xa72   : > { %v1880_v61 = vmul.f32 %v6799_v60, %v6793_v40  ;;  %v1957_v31 = vmul.f32 %v6799_v60, %v6795_v43  ;;  %v2180_v40 = vld [vmem:[#allocation6 + $0x6d8] sm:$0xff] }
 0xa73   : > { %v6244_v43 = vpack.c.bf16 %v2181_v42, %v2180_v40 }
 0xa74   : > { %5054 = vmatprep.mubr.f32.mxu0 %v1880_v61  ;;  %5089 = vmatprep.mubr.f32.mxu1 %v1957_v31  ;;  %v2183_v61 = vld [vmem:[#allocation6 + $0x6f0] sm:$0xff] }
 0xa75   : > { %5055 = vmatmul.mubr.f32.vlgmr.msra.gmra.mrb[16].mxu0 %v1881_v49  ;;  %5090 = vmatmul.mubr.f32.vlgmr.msra.gmra.mrb[16].mxu1 %v1958_v50 }
 0xa76   : > { %6215 = vmatpush3.bf16.msra.mxu0 %v6212_v20  ;;  %v6236_v20 = vpack.c.bf16 %v2053_v19, %v2052_v18  ;;  %6245 = vmatprep.subr.bf16.mxu1 %v6244_v43  ;;  %v2194_v19 = vld [vmem:[#allocation6 + $0x748] sm:$0xff] }
 0xa77   : > { %6217 = vmatprep.subr.bf16.mxu0 %v6216_v63  ;;  %6247 = vmatpush3.bf16.msra.mxu1 %v6244_v43 }
 0xa7a   : > { %6219 = vmatpush3.bf16.msra.mxu0 %v6216_v63  ;;  %v2185_v63 = vld [vmem:[#allocation6 + $0x700] sm:$0xff] }
 0xa7b   : > { %6221 = vmatprep.subr.bf16.mxu0 %v6220_v2 }
 0xa7e   : > { %6223 = vmatpush3.bf16.msra.mxu0 %v6220_v2  ;;  %v2187_v2 = vld [vmem:[#allocation6 + $0x710] sm:$0xff] }
 0xa7f   : > { %6225 = vmatprep.subr.bf16.mxu0 %v6224_v5  ;;  %v6256_v3 = vpack.c.bf16 %v2187_v2, %v2186_v32  ;;  %v2298_v2 = vld [vmem:[#allocation6 + $0x780] sm:$0xff] }
 0xa82   : > { %6227 = vmatpush3.bf16.msra.mxu0 %v6224_v5  ;;  %v2189_v5 = vld [vmem:[#allocation6 + $0x720] sm:$0xff] }
 0xa83   : > { %6229 = vmatprep.subr.bf16.mxu0 %v6228_v9  ;;  %v6260_v7 = vpack.c.bf16 %v2189_v5, %v2188_v4  ;;  %v2300_v5 = vld [vmem:[#allocation6 + $0x790] sm:$0xff] }
 0xa86   : > { %6231 = vmatpush3.bf16.msra.mxu0 %v6228_v9  ;;  %v2191_v9 = vld [vmem:[#allocation6 + $0x730] sm:$0xff] }
 0xa87   : > { %6233 = vmatprep.subr.bf16.mxu0 %v6232_v14  ;;  %v6264_v11 = vpack.c.bf16 %v2191_v9, %v2190_v8  ;;  %v2302_v9 = vld [vmem:[#allocation6 + $0x7a0] sm:$0xff] }
 0xa8a   : > { %6235 = vmatpush3.bf16.msra.mxu0 %v6232_v14  ;;  %v2193_v14 = vld [vmem:[#allocation6 + $0x740] sm:$0xff] }
 0xa8b   : > { %6237 = vmatprep.subr.bf16.mxu0 %v6236_v20  ;;  %v6268_v18 = vpack.c.bf16 %v2193_v14, %v2192_v12  ;;  %v2304_v12 = vld [vmem:[#allocation6 + $0x7b0] sm:$0xff] }
 0xa8e   : > { %6239 = vmatpush3.bf16.msra.mxu0 %v6236_v20  ;;  %v2195_v20 = vld [vmem:[#allocation6 + $0x750] sm:$0xff] }
 0xa8f   : > { %6241 = vmatprep.subr.bf16.mxu0 %v6240_v25  ;;  %v6272_v21 = vpack.c.bf16 %v2195_v20, %v2194_v19  ;;  %v2306_v20 = vld [vmem:[#allocation6 + $0x7c0] sm:$0xff] }
 0xa92   : > { %6243 = vmatpush3.bf16.msra.mxu0 %v6240_v25  ;;  %v2295_v25 = vld [vmem:[#allocation6 + $0x768] sm:$0xff] }
 0xa93   : > { %v6276_v26 = vpack.c.bf16 %v2295_v25, %v2294_v22  ;;  %v2308_v25 = vld [vmem:[#allocation6 + $0x7d0] sm:$0xff] }
 0xa95   : > { %6277 = vmatprep.subr.bf16.mxu0 %v6276_v26 }
 0xb48   : > { %v5056_v28 = vpop.f32.mrb[16].mxu0  ;;  %v5091_v35 = vpop.f32.mrb[16].mxu1 }
 0xb49   : > { %v2035_v29 = vmul.f32 %v5056_v28, %v1705_v27  ;;  %v2037_v30 = vmul.f32 %v5091_v35, %v1700_v34  ;;  %v1948_v33 = vpop.f32.mrb[17].mxu0  ;;  %v2025_v36 = vpop.f32.mrb[17].mxu1 }
 0xb4a   : > { %v2034_v24 = vmul.f32 %v1948_v33, %v1700_v34  ;;  %v2036_v37 = vmul.f32 %v2025_v36, %v1705_v27 }
 0xb4b   : > { %v2039_v39 = vadd.f32 %v2037_v30, %v2035_v29 }
 0xb4c   : > { %v2038_v23 = vadd.f32 %v2036_v37, %v2034_v24 }
 0xb4e   : > { %5124 = vmatprep.mubr.f32.mxu0 %v2038_v23 }
 0xb4f   : > { %5125 = vmatmul.mubr.f32.vlgmr.msra.gmra.mrb[18].mxu0 %v2039_v39 }
 0xb50   : > { %6279 = vmatpush3.bf16.msra.mxu0 %v6276_v26  ;;  %v2309_v26 = vld [vmem:[#allocation6 + $0x7d8] sm:$0xff] }
 0xc22   : > { %v5126_v15 = vpop.f32.mrb[18].mxu0 }
 0xc23   : > { %v2132_v16 = vadd.f32 %v5126_v15, %v7296_v56  ;;  %v2122_v47 = vpop.f32.mrb[19].mxu0  ;;  %v2182_v56 = vld [vmem:[#allocation6 + $0x6e8] sm:$0xff] }
 0xc24   : > { %v2131_v49 = vadd.f32 %v2122_v47, %v7298_v57  ;;  %v6248_v31 = vpack.c.bf16 %v2183_v61, %v2182_v56  ;;  %v2184_v57 = vld [vmem:[#allocation6 + $0x6f8] sm:$0xff]  ;;  %v3857_v56 = vld [vmem:[#allocation6 + $0x6d0] ss:$0 sm:$0xff] }
 0xc25   : > { %v7380_v50 = vadd.f32 %v3855_v45, %v2132_v16  ;;  %v6252_v1 = vpack.c.bf16 %v2185_v63, %v2184_v57  ;;  %v3856_v16 = vld [vmem:[#allocation6 + $0x6c8] ss:$0 sm:$0xff]  ;;  %v2296_v63 = vld [vmem:[#allocation6 + $0x770] sm:$0xff] }
 0xc26   : > { %v7382_v53 = vadd.f32 %v3855_v45, %v2131_v49  ;;  %6249 = vmatprep.subr.bf16.mxu1 %v6248_v31 }
 0xc27   : > { %2142 = vadd.xlane.f32.xlu1 %v7380_v50  ;;  %v2147_v54 = vmul.f32 %v7380_v50, %v7380_v50  ;;  %6251 = vmatpush3.bf16.msra.mxu1 %v6248_v31 }
 0xc28   : > { %2140 = vadd.xlane.f32.xlu0 %v7382_v53  ;;  %v2146_v60 = vmul.f32 %v7382_v53, %v7382_v53  ;;  %6253 = vmatprep.subr.bf16.mxu1 %v6252_v1 }
 0xc2b   : > { %2150 = vadd.xlane.f32.xlu1 %v2147_v54  ;;  %6255 = vmatpush3.bf16.msra.mxu1 %v6252_v1  ;;  %v2297_v1 = vld [vmem:[#allocation6 + $0x778] sm:$0xff] }
 0xc2c   : > { %2148 = vadd.xlane.f32.xlu0 %v2146_v60  ;;  %6257 = vmatprep.subr.bf16.mxu1 %v6256_v3  ;;  %v6280_v32 = vpack.c.bf16 %v2297_v1, %v2296_v63  ;;  %v2530_v63 = vld [vmem:[#allocation6 + $0x880] sm:$0xff] }
 0xc2e   : > { %6281 = vmatprep.subr.bf16.mxu0 %v6280_v32 }
 0xc2f   : > { %6259 = vmatpush3.bf16.msra.mxu1 %v6256_v3  ;;  %6283 = vmatpush3.bf16.msra.mxu0 %v6280_v32  ;;  %v2299_v3 = vld [vmem:[#allocation6 + $0x788] sm:$0xff] }
 0xc30   : > { %6261 = vmatprep.subr.bf16.mxu1 %v6260_v7  ;;  %v6284_v4 = vpack.c.bf16 %v2299_v3, %v2298_v2  ;;  %v2531_v32 = vld [vmem:[#allocation6 + $0x888] sm:$0xff] }
 0xc31   : > { %v6340_v2 = vpack.c.bf16 %v2531_v32, %v2530_v63  ;;  %v2449_v32 = vld [vmem:[#allocation6 + $0x870] sm:$0xff] }
 0xc32   : > { %6285 = vmatprep.subr.bf16.mxu0 %v6284_v4 }
 0xc33   : > { %6263 = vmatpush3.bf16.msra.mxu1 %v6260_v7  ;;  %6287 = vmatpush3.bf16.msra.mxu0 %v6284_v4  ;;  %v2301_v7 = vld [vmem:[#allocation6 + $0x798] sm:$0xff]  ;;  %v3859_v4 = vld [vmem:[#allocation6 + $0x7e0] ss:$0 sm:$0xff] }
 0xc34   : > { %6265 = vmatprep.subr.bf16.mxu1 %v6264_v11  ;;  %v6288_v8 = vpack.c.bf16 %v2301_v7, %v2300_v5 }
 0xc36   : > { %6289 = vmatprep.subr.bf16.mxu0 %v6288_v8 }
 0xc37   : > { %6267 = vmatpush3.bf16.msra.mxu1 %v6264_v11  ;;  %v2303_v11 = vld [vmem:[#allocation6 + $0x7a8] sm:$0xff]  ;;  %6291 = vmatpush3.bf16.msra.mxu0 %v6288_v8 }
 0xc38   : > { %6269 = vmatprep.subr.bf16.mxu1 %v6268_v18  ;;  %v6292_v14 = vpack.c.bf16 %v2303_v11, %v2302_v9 }
 0xc3a   : > { %6293 = vmatprep.subr.bf16.mxu0 %v6292_v14 }
 0xc3b   : > { %6271 = vmatpush3.bf16.msra.mxu1 %v6268_v18  ;;  %v2305_v18 = vld [vmem:[#allocation6 + $0x7b8] sm:$0xff]  ;;  %6295 = vmatpush3.bf16.msra.mxu0 %v6292_v14 }
 0xc3c   : > { %6273 = vmatprep.subr.bf16.mxu1 %v6272_v21  ;;  %v6296_v19 = vpack.c.bf16 %v2305_v18, %v2304_v12  ;;  %v2437_v18 = vld [vmem:[#allocation6 + $0x810] sm:$0xff] }
 0xc3e   : > { %6297 = vmatprep.subr.bf16.mxu0 %v6296_v19 }
 0xc3f   : > { %6275 = vmatpush3.bf16.msra.mxu1 %v6272_v21  ;;  %v2307_v21 = vld [vmem:[#allocation6 + $0x7c8] sm:$0xff]  ;;  %6299 = vmatpush3.bf16.msra.mxu0 %v6296_v19 }
 0xc40   : > { %v6300_v22 = vpack.c.bf16 %v2307_v21, %v2306_v20  ;;  %v2533_v20 = vld [vmem:[#allocation6 + $0x898] sm:$0xff] }
 0xc42   : > { %6301 = vmatprep.subr.bf16.mxu0 %v6300_v22 }
 0xc43   : > { %6303 = vmatpush3.bf16.msra.mxu0 %v6300_v22  ;;  %v2438_v22 = vld [vmem:[#allocation6 + $0x818] sm:$0xff] }
 0xcb4   : > { %v2143_v27 = vpop.xlane.xlu1 %2142 }
 0xcb5   : > { %v2145_v34 = vmul.f32 0.03125, %v2143_v27  ;;  %v2141_v28 = vpop.xlane.xlu0 %2140  ;;  %v6304_v27 = vpack.c.bf16 %v2309_v26, %v2308_v25  ;;  %v2439_v25 = vld [vmem:[#allocation6 + $0x820] sm:$0xff] }
 0xcb6   : > { %v2144_v35 = vmul.f32 0.03125, %v2141_v28  ;;  %v6316_v26 = vpack.c.bf16 %v2439_v25, %v2438_v22 }
 0xcb7   : > { %v2155_v30 = vmul.f32 %v2145_v34, %v2145_v34  ;;  %v2159_v43 = vsub.f32 %v7380_v50, %v2145_v34  ;;  %6305 = vmatprep.subr.bf16.mxu0 %v6304_v27  ;;  %v3858_v34 = vld [vmem:[#allocation6 + $0x758] ss:$0 sm:$0xff] }
 0xcb8   : > { %v2151_v29 = vpop.xlane.xlu1 %2150  ;;  %v2154_v24 = vmul.f32 %v2144_v35, %v2144_v35  ;;  %v2158_v45 = vsub.f32 %v7382_v53, %v2144_v35  ;;  %6307 = vmatpush3.bf16.msra.mxu0 %v6304_v27  ;;  %v2534_v27 = vld [vmem:[#allocation6 + $0x8a0] sm:$0xff] }
 0xcb9   : > { %v2153_v33 = vmul.f32 0.03125, %v2151_v29  ;;  %v2149_v36 = vpop.xlane.xlu0 %2148  ;;  %6341 = vmatprep.subr.bf16.mxu0 %v6340_v2 }
 0xcba   : > { %v2152_v37 = vmul.f32 0.03125, %v2149_v36 }
 0xcbb   : > { %v2157_v39 = vsub.f32 %v2153_v33, %v2155_v30 }
 0xcbc   : > { %v2156_v23 = vsub.f32 %v2152_v37, %v2154_v24 }
 0xcbd   : > { %v2161_v40 = vadd.f32 1e-05, %v2157_v39 }
 0xcbe   : > { %v2160_v42 = vadd.f32 1e-05, %v2156_v23 }
 0xcbf   : > { %6800 = vrsqrt.f32 %v2161_v40 }
 0xcc0   : > { %6802 = vrsqrt.f32 %v2160_v42 }
 0xcc9   : > { %v6801_v15 = vpop.eup %6800 }
 0xcca   : > { %v6803_v47 = vpop.eup %6802  ;;  %v2165_v49 = vmul.f32 %v6801_v15, %v2159_v43 }
 0xccb   : > { %v2164_v54 = vmul.f32 %v6803_v47, %v2158_v45 }
 0xccc   : > { %v2172_v60 = vmul.f32 %v3856_v16, %v2165_v49 }
 0xccd   : > { %v2171_v61 = vmul.f32 %v3856_v16, %v2164_v54 }
 0xcce   : > { %v2179_v57 = vadd.f32 %v3857_v56, %v2172_v60 }
 0xccf   : > { %v2178_v31 = vadd.f32 %v3857_v56, %v2171_v61 }
 0xcd1   : > { %5159 = vmatprep.mubr.f32.mxu1 %v2178_v31  ;;  %v2434_v31 = vld [vmem:[#allocation6 + $0x7f8] sm:$0xff] }
 0xcd2   : > { %5160 = vmatmul.mubr.f32.vlgmr.msra.gmra.mrb[18].mxu1 %v2179_v57  ;;  %v2435_v57 = vld [vmem:[#allocation6 + $0x800] sm:$0xff] }
 0xcd3   : > { %v6308_v1 = vpack.c.bf16 %v2435_v57, %v2434_v31  ;;  %v2543_v31 = vld [vmem:[#allocation6 + $0x8e8] sm:$0xff] }
 0xcd5   : > { %6309 = vmatprep.subr.bf16.mxu1 %v6308_v1 }
 0xcd6   : > { %6311 = vmatpush3.bf16.msra.mxu1 %v6308_v1  ;;  %v2448_v1 = vld [vmem:[#allocation6 + $0x868] sm:$0xff] }
 0xda5   : > { %v5161_v28 = vpop.f32.mrb[18].mxu1 }
 0xda6   : > { %v2273_v35 = vadd.f32 %v5161_v28, %v3858_v34  ;;  %v2267_v29 = vpop.f32.mrb[19].mxu1 }
 0xda7   : > { %v2268_v30 = vadd.f32 %v3858_v34, %v2267_v29  ;;  %v2535_v34 = vld [vmem:[#allocation6 + $0x8a8] sm:$0xff]  ;;  %v2441_v29 = vld [vmem:[#allocation6 + $0x830] sm:$0xff] }
 0xda8   : > { %v2279_v33 = vmul.f32 0.044715, %v2273_v35  ;;  %v2277_v60 = vmul.f32 0.5, %v2273_v35  ;;  %v6348_v28 = vpack.c.bf16 %v2535_v34, %v2534_v27 }
 0xda9   : > { %v2278_v36 = vmul.f32 0.044715, %v2268_v30  ;;  %v2276_v49 = vmul.f32 0.5, %v2268_v30 }
 0xdaa   : > { %v2281_v24 = vmul.f32 %v2279_v33, %v2273_v35  ;;  %v2536_v33 = vld [vmem:[#allocation6 + $0x8b0] sm:$0xff] }
 0xdab   : > { %v2280_v37 = vmul.f32 %v2278_v36, %v2268_v30  ;;  %v2537_v36 = vld [vmem:[#allocation6 + $0x8b8] sm:$0xff] }
 0xdac   : > { %v2283_v39 = vmul.f32 %v2281_v24, %v2273_v35  ;;  %v6352_v24 = vpack.c.bf16 %v2537_v36, %v2536_v33  ;;  %v3860_v36 = vld [vmem:[#allocation6 + $0x7e8] ss:$0 sm:$0xff] }
 0xdad   : > { %v2282_v23 = vmul.f32 %v2280_v37, %v2268_v30  ;;  %v2442_v37 = vld [vmem:[#allocation6 + $0x838] sm:$0xff] }
 0xdae   : > { %v2285_v40 = vadd.f32 %v2283_v39, %v2273_v35  ;;  %v2440_v35 = vld [vmem:[#allocation6 + $0x828] sm:$0xff]  ;;  %v2443_v39 = vld [vmem:[#allocation6 + $0x840] sm:$0xff] }
 0xdaf   : > { %v2284_v42 = vadd.f32 %v2282_v23, %v2268_v30  ;;  %v6320_v30 = vpack.c.bf16 %v2441_v29, %v2440_v35  ;;  %v6324_v23 = vpack.c.bf16 %v2443_v39, %v2442_v37 }
 0xdb0   : > { %v2287_v43 = vmul.f32 0.7978846, %v2285_v40  ;;  %v2538_v40 = vld [vmem:[#allocation6 + $0x8c0] sm:$0xff] }
 0xdb1   : > { %v2286_v15 = vmul.f32 0.7978846, %v2284_v42  ;;  %v2539_v42 = vld [vmem:[#allocation6 + $0x8c8] sm:$0xff] }
 0xdb2   : > { %6804 = vtanh.f32 %v2287_v43  ;;  %v6356_v43 = vpack.c.bf16 %v2539_v42, %v2538_v40  ;;  %v3861_v40 = vld [vmem:[#allocation6 + $0x7f0] ss:$0 sm:$0xff] }
 0xdb3   : > { %6806 = vtanh.f32 %v2286_v15  ;;  %v2444_v15 = vld [vmem:[#allocation6 + $0x848] sm:$0xff] }
 0xdbc   : > { %v6805_v45 = vpop.eup %6804 }
 0xdbd   : > { %v6807_v16 = vpop.eup %6806  ;;  %v2291_v47 = vadd.f32 1.0, %v6805_v45  ;;  %v2445_v45 = vld [vmem:[#allocation6 + $0x850] sm:$0xff] }
 0xdbe   : > { %v2290_v54 = vadd.f32 1.0, %v6807_v16  ;;  %v2540_v16 = vld [vmem:[#allocation6 + $0x8d0] sm:$0xff] }
 0xdbf   : > { %v2293_v61 = vmul.f32 %v2291_v47, %v2277_v60  ;;  %v6328_v47 = vpack.c.bf16 %v2445_v45, %v2444_v15  ;;  %v2447_v60 = vld [vmem:[#allocation6 + $0x860] sm:$0xff] }
 0xdc0   : > { %v2292_v56 = vmul.f32 %v2290_v54, %v2276_v49  ;;  %v2541_v49 = vld [vmem:[#allocation6 + $0x8d8] sm:$0xff]  ;;  %v2629_v15 = vld [vmem:[#allocation6 + $0x920] sm:$0xff] }
 0xdc1   : > { %v2446_v54 = vld [vmem:[#allocation6 + $0x858] sm:$0xff] }
 0xdc2   : > { %5194 = vmatprep.mubr.f32.mxu0 %v2292_v56  ;;  %v6360_v56 = vpack.c.bf16 %v2541_v49, %v2540_v16  ;;  %v6332_v57 = vpack.c.bf16 %v2447_v60, %v2446_v54  ;;  %v2630_v49 = vld [vmem:[#allocation6 + $0x928] sm:$0xff]  ;;  %v2631_v54 = vld [vmem:[#allocation6 + $0x930] sm:$0xff] }
 0xdc3   : > { %5195 = vmatmul.mubr.f32.vlgmr.msra.gmra.mrb[20].mxu0 %v2293_v61  ;;  %v2542_v61 = vld [vmem:[#allocation6 + $0x8e0] sm:$0xff]  ;;  %v6380_v60 = vpack.c.bf16 %v2631_v54, %v2630_v49 }
 0xdc4   : > { %6343 = vmatpush3.bf16.msra.mxu0 %v6340_v2  ;;  %v6364_v63 = vpack.c.bf16 %v2543_v31, %v2542_v61  ;;  %v2544_v2 = vld [vmem:[#allocation6 + $0x8f0] sm:$0xff]  ;;  %v2633_v61 = vld [vmem:[#allocation6 + $0x940] sm:$0xff] }
 0xe96   : > { %v5196_v3 = vpop.f32.mrb[20].mxu0 }
 0xe97   : > { %v2386_v5 = vadd.f32 %v5196_v3, %v7380_v50  ;;  %v2376_v7 = vpop.f32.mrb[21].mxu0  ;;  %v2436_v50 = vld [vmem:[#allocation6 + $0x808] sm:$0xff]  ;;  %v2545_v3 = vld [vmem:[#allocation6 + $0x8f8] sm:$0xff] }
 0xe98   : > { %v2385_v8 = vadd.f32 %v2376_v7, %v7382_v53  ;;  %v6312_v19 = vpack.c.bf16 %v2437_v18, %v2436_v50  ;;  %v2532_v53 = vld [vmem:[#allocation6 + $0x890] sm:$0xff]  ;;  %v2626_v7 = vld [vmem:[#allocation6 + $0x908] sm:$0xff] }
 0xe99   : > { %v7394_v9 = vadd.f32 %v3859_v4, %v2386_v5  ;;  %v6344_v21 = vpack.c.bf16 %v2533_v20, %v2532_v53  ;;  %v6368_v5 = vpack.c.bf16 %v2545_v3, %v2544_v2  ;;  %v2637_v2 = vld [vmem:[#allocation6 + $0x960] sm:$0xff] }
 0xe9a   : > { %v7396_v11 = vadd.f32 %v3859_v4, %v2385_v8  ;;  %6313 = vmatprep.subr.bf16.mxu1 %v6312_v19  ;;  %v6336_v4 = vpack.c.bf16 %v2449_v32, %v2448_v1  ;;  %v2627_v8 = vld [vmem:[#allocation6 + $0x910] sm:$0xff]  ;;  %v2636_v32 = vld [vmem:[#allocation6 + $0x958] sm:$0xff] }
 0xe9b   : > { %2396 = vadd.xlane.f32.xlu1 %v7394_v9  ;;  %v2401_v12 = vmul.f32 %v7394_v9, %v7394_v9  ;;  %6315 = vmatpush3.bf16.msra.mxu1 %v6312_v19  ;;  %v6392_v3 = vpack.c.bf16 %v2637_v2, %v2636_v32  ;;  %v3062_v2 = vld [vmem:[#allocation6 + $0x9d0] sm:$0xff] }
 0xe9c   : > { %2394 = vadd.xlane.f32.xlu0 %v7396_v11  ;;  %v2400_v14 = vmul.f32 %v7396_v11, %v7396_v11  ;;  %6345 = vmatprep.subr.bf16.mxu0 %v6344_v21 }
 0xe9d   : > { %6347 = vmatpush3.bf16.msra.mxu0 %v6344_v21  ;;  %6317 = vmatprep.subr.bf16.mxu1 %v6316_v26 }
 0xe9e   : > { %6349 = vmatprep.subr.bf16.mxu0 %v6348_v28 }
 0xe9f   : > { %2404 = vadd.xlane.f32.xlu1 %v2401_v12  ;;  %6319 = vmatpush3.bf16.msra.mxu1 %v6316_v26  ;;  %v6372_v12 = vpack.c.bf16 %v2627_v8, %v2626_v7  ;;  %v2640_v8 = vld [vmem:[#allocation6 + $0x978] sm:$0xff] }
 0xea0   : > { %2402 = vadd.xlane.f32.xlu0 %v2400_v14  ;;  %6321 = vmatprep.subr.bf16.mxu1 %v6320_v30 }
 0xea1   : > { %6351 = vmatpush3.bf16.msra.mxu0 %v6348_v28 }
 0xea2   : > { %6353 = vmatprep.subr.bf16.mxu0 %v6352_v24 }
 0xea3   : > { %6323 = vmatpush3.bf16.msra.mxu1 %v6320_v30 }
 0xea4   : > { %6325 = vmatprep.subr.bf16.mxu1 %v6324_v23 }
 0xea5   : > { %6355 = vmatpush3.bf16.msra.mxu0 %v6352_v24 }
 0xea6   : > { %6357 = vmatprep.subr.bf16.mxu0 %v6356_v43 }
 0xea7   : > { %6327 = vmatpush3.bf16.msra.mxu1 %v6324_v23 }
 0xea8   : > { %6329 = vmatprep.subr.bf16.mxu1 %v6328_v47 }
 0xea9   : > { %6359 = vmatpush3.bf16.msra.mxu0 %v6356_v43  ;;  %v2628_v43 = vld [vmem:[#allocation6 + $0x918] sm:$0xff] }
 0xeaa   : > { %6361 = vmatprep.subr.bf16.mxu0 %v6360_v56 }
 0xeab   : > { %6331 = vmatpush3.bf16.msra.mxu1 %v6328_v47  ;;  %v6376_v47 = vpack.c.bf16 %v2629_v15, %v2628_v43 }
 0xeac   : > { %6333 = vmatprep.subr.bf16.mxu1 %v6332_v57 }
 0xead   : > { %6363 = vmatpush3.bf16.msra.mxu0 %v6360_v56  ;;  %v2632_v56 = vld [vmem:[#allocation6 + $0x938] sm:$0xff] }
 0xeae   : > { %6365 = vmatprep.subr.bf16.mxu0 %v6364_v63  ;;  %v6384_v31 = vpack.c.bf16 %v2633_v61, %v2632_v56  ;;  %v3058_v61 = vld [vmem:[#allocation6 + $0x9b0] sm:$0xff] }
 0xeaf   : > { %6335 = vmatpush3.bf16.msra.mxu1 %v6332_v57  ;;  %v2634_v57 = vld [vmem:[#allocation6 + $0x948] sm:$0xff] }
 0xeb0   : > { %6337 = vmatprep.subr.bf16.mxu1 %v6336_v4 }
 0xeb1   : > { %6367 = vmatpush3.bf16.msra.mxu0 %v6364_v63  ;;  %v2635_v63 = vld [vmem:[#allocation6 + $0x950] sm:$0xff] }
 0xeb2   : > { %6369 = vmatprep.subr.bf16.mxu0 %v6368_v5  ;;  %v6388_v1 = vpack.c.bf16 %v2635_v63, %v2634_v57  ;;  %v3060_v63 = vld [vmem:[#allocation6 + $0x9c0] sm:$0xff] }
 0xeb3   : > { %6339 = vmatpush3.bf16.msra.mxu1 %v6336_v4  ;;  %v2638_v4 = vld [vmem:[#allocation6 + $0x968] sm:$0xff] }
 0xeb4   : > { %6373 = vmatprep.subr.bf16.mxu1 %v6372_v12 }
 0xeb5   : > { %6371 = vmatpush3.bf16.msra.mxu0 %v6368_v5  ;;  %v2639_v5 = vld [vmem:[#allocation6 + $0x970] sm:$0xff] }
 0xeb6   : > { %6405 = vmatprep.subr.bf16.mxu0 %v7171_v10  ;;  %v6396_v7 = vpack.c.bf16 %v2639_v5, %v2638_v4  ;;  %v3064_v5 = vld [vmem:[#allocation6 + $0x9e0] sm:$0xff] }
 0xf28   : > { %v2397_v14 = vpop.xlane.xlu1 %2396 }
 0xf29   : > { %v2399_v50 = vmul.f32 0.03125, %v2397_v14  ;;  %v2395_v18 = vpop.xlane.xlu0 %2394 }
 0xf2a   : > { %v2398_v19 = vmul.f32 0.03125, %v2395_v18 }
 0xf2b   : > { %v2409_v20 = vmul.f32 %v2399_v50, %v2399_v50  ;;  %v2413_v29 = vsub.f32 %v7394_v9, %v2399_v50 }
 0xf2c   : > { %v2405_v53 = vpop.xlane.xlu1 %2404  ;;  %v2408_v25 = vmul.f32 %v2398_v19, %v2398_v19  ;;  %v2412_v33 = vsub.f32 %v7396_v11, %v2398_v19 }
 0xf2d   : > { %v2407_v21 = vmul.f32 0.03125, %v2405_v53  ;;  %v2403_v22 = vpop.xlane.xlu0 %2402 }
 0xf2e   : > { %v2406_v26 = vmul.f32 0.03125, %v2403_v22 }
 0xf2f   : > { %v2411_v27 = vsub.f32 %v2407_v21, %v2409_v20 }
 0xf30   : > { %v2410_v34 = vsub.f32 %v2406_v26, %v2408_v25 }
 0xf31   : > { %v2415_v28 = vadd.f32 1e-05, %v2411_v27 }
 0xf32   : > { %v2414_v35 = vadd.f32 1e-05, %v2410_v34 }
 0xf33   : > { %6808 = vrsqrt.f32 %v2415_v28 }
 0xf34   : > { %6810 = vrsqrt.f32 %v2414_v35 }
 0xf3d   : > { %v6809_v30 = vpop.eup %6808 }
 0xf3e   : > { %v6811_v24 = vpop.eup %6810  ;;  %v2419_v37 = vmul.f32 %v6809_v30, %v2413_v29 }
 0xf3f   : > { %v2418_v39 = vmul.f32 %v6811_v24, %v2412_v33 }
 0xf40   : > { %v2426_v23 = vmul.f32 %v3860_v36, %v2419_v37 }
 0xf41   : > { %v2425_v42 = vmul.f32 %v3860_v36, %v2418_v39 }
 0xf42   : > { %v2433_v16 = vadd.f32 %v3861_v40, %v2426_v23 }
 0xf43   : > { %v2432_v45 = vadd.f32 %v3861_v40, %v2425_v42 }
 0xf45   : > { %5229 = vmatprep.mubr.f32.mxu1 %v2432_v45  ;;  %5264 = vmatprep.mubr.f32.mxu0 %v2432_v45 }
 0xf46   : > { %5230 = vmatmul.mubr.f32.vlgmr.msra.gmra.mrb[20].mxu1 %v2433_v16  ;;  %5265 = vmatmul.mubr.f32.vlgmr.msra.gmra.mrb[22].mxu0 %v2433_v16 }
 0xf47   : > { %6375 = vmatpush3.bf16.msra.mxu1 %v6372_v12  ;;  %5299 = vmatprep.mubr.f32.mxu1 %v2432_v45  ;;  %v2641_v12 = vld [vmem:[#allocation6 + $0x980] sm:$0xff] }
 0xf48   : > { %6377 = vmatprep.subr.bf16.mxu1 %v6376_v47  ;;  %6407 = vmatpush3.bf16.msra.mxu0 %v7171_v10  ;;  %v6400_v14 = vpack.c.bf16 %v2641_v12, %v2640_v8  ;;  %v3066_v12 = vld [vmem:[#allocation6 + $0x9f0] sm:$0xff] }
 0xf49   : > { %6409 = vmatprep.subr.bf16.mxu0 %v7178_v46 }
 0xf4b   : > { %6379 = vmatpush3.bf16.msra.mxu1 %v6376_v47  ;;  %v3057_v47 = vld [vmem:[#allocation6 + $0x9a8] sm:$0xff] }
 0xf4c   : > { %6381 = vmatprep.subr.bf16.mxu1 %v6380_v60  ;;  %6411 = vmatpush3.bf16.msra.mxu0 %v7178_v46 }
 0xf4d   : > { %6413 = vmatprep.subr.bf16.mxu0 %v7184_v52 }
 0xf4f   : > { %6383 = vmatpush3.bf16.msra.mxu1 %v6380_v60 }
 0xf50   : > { %6385 = vmatprep.subr.bf16.mxu1 %v6384_v31  ;;  %6415 = vmatpush3.bf16.msra.mxu0 %v7184_v52 }
 0xf51   : > { %6417 = vmatprep.subr.bf16.mxu0 %v7188_v58 }
 0xf53   : > { %6387 = vmatpush3.bf16.msra.mxu1 %v6384_v31  ;;  %v3059_v31 = vld [vmem:[#allocation6 + $0x9b8] sm:$0xff] }
 0xf54   : > { %6389 = vmatprep.subr.bf16.mxu1 %v6388_v1  ;;  %6419 = vmatpush3.bf16.msra.mxu0 %v7188_v58  ;;  %v6540_v57 = vpack.c.bf16 %v3059_v31, %v3058_v61  ;;  %v3308_v61 = vld [vmem:[#allocation6 + $0xab0] sm:$0xff]  ;;  %v3309_v31 = vld [vmem:[#allocation6 + $0xab8] sm:$0xff] }
 0xf55   : > { %6421 = vmatprep.subr.bf16.mxu0 %v7192_v0 }
 0xf57   : > { %6391 = vmatpush3.bf16.msra.mxu1 %v6388_v1  ;;  %v3061_v1 = vld [vmem:[#allocation6 + $0x9c8] sm:$0xff] }
 0xf58   : > { %6393 = vmatprep.subr.bf16.mxu1 %v6392_v3  ;;  %6423 = vmatpush3.bf16.msra.mxu0 %v7192_v0  ;;  %v6544_v32 = vpack.c.bf16 %v3061_v1, %v3060_v63 }
 0xf59   : > { %6425 = vmatprep.subr.bf16.mxu0 %v7196_v6 }
 0xf5b   : > { %6395 = vmatpush3.bf16.msra.mxu1 %v6392_v3  ;;  %v3063_v3 = vld [vmem:[#allocation6 + $0x9d8] sm:$0xff] }
 0xf5c   : > { %6397 = vmatprep.subr.bf16.mxu1 %v6396_v7  ;;  %6427 = vmatpush3.bf16.msra.mxu0 %v7196_v6  ;;  %v6548_v4 = vpack.c.bf16 %v3063_v3, %v3062_v2 }
 0xf5d   : > { %6429 = vmatprep.subr.bf16.mxu0 %v7200_v13 }
 0xf5f   : > { %6399 = vmatpush3.bf16.msra.mxu1 %v6396_v7  ;;  %v3065_v7 = vld [vmem:[#allocation6 + $0x9e8] sm:$0xff] }
 0xf60   : > { %6401 = vmatprep.subr.bf16.mxu1 %v6400_v14  ;;  %6431 = vmatpush3.bf16.msra.mxu0 %v7200_v13  ;;  %v6552_v8 = vpack.c.bf16 %v3065_v7, %v3064_v5 }
 0xf61   : > { %6433 = vmatprep.subr.bf16.mxu0 %v7220_v17 }
 0xf63   : > { %6403 = vmatpush3.bf16.msra.mxu1 %v6400_v14  ;;  %v3067_v14 = vld [vmem:[#allocation6 + $0x9f8] sm:$0xff] }
 0xf64   : > { %6437 = vmatprep.subr.bf16.mxu1 %v7171_v10  ;;  %6435 = vmatpush3.bf16.msra.mxu0 %v7220_v17 }
 0xf65   : > { %6469 = vmatprep.subr.bf16.mxu0 %v7230_v38 }
 0xf66   : > { %5300 = vmatmul.mubr.f32.vlgmr.msra.gmra.mrb[22].mxu1 %v2433_v16  ;;  %v3056_v16 = vld [vmem:[#allocation6 + $0x9a0] sm:$0xff] }
 0xf67   : > { %6439 = vmatpush3.bf16.msra.mxu1 %v7171_v10  ;;  %v3862_v10 = vld [vmem:[#allocation6 + $0x878] ss:$0 sm:$0xff]  ;;  %v6536_v56 = vpack.c.bf16 %v3057_v47, %v3056_v16  ;;  %v3206_v16 = vld [vmem:[#allocation6 + $0xa88] sm:$0xff]  ;;  %v3207_v47 = vld [vmem:[#allocation6 + $0xa90] sm:$0xff] }
 0xf68   : > { %6441 = vmatprep.subr.bf16.mxu1 %v7178_v46 }
 0xf6b   : > { %6443 = vmatpush3.bf16.msra.mxu1 %v7178_v46  ;;  %v3863_v46 = vld [vmem:[#allocation6 + $0x900] ss:$0 sm:$0xff] }
 0xf6c   : > { %6445 = vmatprep.subr.bf16.mxu1 %v7184_v52 }
 0xf6f   : > { %6447 = vmatpush3.bf16.msra.mxu1 %v7184_v52 }
 0xf70   : > { %6449 = vmatprep.subr.bf16.mxu1 %v7188_v58 }
 0xf73   : > { %6451 = vmatpush3.bf16.msra.mxu1 %v7188_v58 }
 0xf74   : > { %6453 = vmatprep.subr.bf16.mxu1 %v7192_v0 }
 0xf77   : > { %6455 = vmatpush3.bf16.msra.mxu1 %v7192_v0 }
 0xf78   : > { %6457 = vmatprep.subr.bf16.mxu1 %v7196_v6 }
 0xf7b   : > { %6459 = vmatpush3.bf16.msra.mxu1 %v7196_v6 }
 0xf7c   : > { %6461 = vmatprep.subr.bf16.mxu1 %v7200_v13 }
 0xf7f   : > { %6463 = vmatpush3.bf16.msra.mxu1 %v7200_v13 }
 0xf80   : > { %6465 = vmatprep.subr.bf16.mxu1 %v7220_v17 }
 0xf83   : > { %6467 = vmatpush3.bf16.msra.mxu1 %v7220_v17 }
 0xf84   : > { %6501 = vmatprep.subr.bf16.mxu1 %v7230_v38 }
0x1019   : > { %v5231_v52 = vpop.f32.mrb[20].mxu1  ;;  %v5266_v58 = vpop.f32.mrb[22].mxu0 }
0x101a   : > { %v2527_v50 = vadd.f32 %v5231_v52, %v3862_v10  ;;  %v2623_v0 = vadd.f32 %v5266_v58, %v3863_v46  ;;  %v2521_v18 = vpop.f32.mrb[21].mxu1  ;;  %v2617_v19 = vpop.f32.mrb[23].mxu0  ;;  %v3069_v52 = vld [vmem:[#allocation6 + $0xa08] sm:$0xff] }
0x101b   : > { %v2522_v53 = vadd.f32 %v3862_v10, %v2521_v18  ;;  %v2618_v6 = vadd.f32 %v3863_v46, %v2617_v19  ;;  %v6556_v10 = vpack.c.bf16 %v3067_v14, %v3066_v12  ;;  %v3068_v46 = vld [vmem:[#allocation6 + $0xa00] sm:$0xff] }
0x101c   : > { %v2723_v20 = vmul.f32 %v2623_v0, %v2527_v50  ;;  %v6560_v58 = vpack.c.bf16 %v3069_v52, %v3068_v46 }
0x101d   : > { %v2799_v21 = vmul.f32 %v2623_v0, %v2522_v53  ;;  %v2722_v22 = vmul.f32 %v2618_v6, %v2522_v53  ;;  %v2800_v13 = vmul.f32 %v2618_v6, %v2527_v50  ;;  %v3864_v50 = vld [vmem:[#allocation6 + $0x988] ss:$0 sm:$0xff] }
0x101f   : > { %5334 = vmatprep.mubr.f32.mxu0 %v2722_v22  ;;  %5369 = vmatprep.mubr.f32.mxu1 %v2799_v21 }
0x1020   : > { %5335 = vmatmul.mubr.f32.vlgmr.msra.gmra.mrb[24].mxu0 %v2723_v20  ;;  %5370 = vmatmul.mubr.f32.vlgmr.msra.gmra.mrb[24].mxu1 %v2800_v13 }
0x1021   : > { %6471 = vmatpush3.bf16.msra.mxu0 %v7230_v38  ;;  %6503 = vmatpush3.bf16.msra.mxu1 %v7230_v38 }
0x1022   : > { %6473 = vmatprep.subr.bf16.mxu0 %v7236_v41  ;;  %6505 = vmatprep.subr.bf16.mxu1 %v7236_v41 }
0x1025   : > { %6475 = vmatpush3.bf16.msra.mxu0 %v7236_v41  ;;  %6507 = vmatpush3.bf16.msra.mxu1 %v7236_v41  ;;  %v3054_v41 = vld [vmem:[#allocation6 + $0x990] sm:$0xff] }
0x1026   : > { %6477 = vmatprep.subr.bf16.mxu0 %v7242_v44  ;;  %6509 = vmatprep.subr.bf16.mxu1 %v7242_v44 }
0x1029   : > { %6479 = vmatpush3.bf16.msra.mxu0 %v7242_v44  ;;  %6511 = vmatpush3.bf16.msra.mxu1 %v7242_v44  ;;  %v3055_v44 = vld [vmem:[#allocation6 + $0x998] sm:$0xff] }
0x102a   : > { %6481 = vmatprep.subr.bf16.mxu0 %v7248_v48  ;;  %6513 = vmatprep.subr.bf16.mxu1 %v7248_v48 }
0x102d   : > { %6483 = vmatpush3.bf16.msra.mxu0 %v7248_v48  ;;  %6515 = vmatpush3.bf16.msra.mxu1 %v7248_v48  ;;  %v6532_v48 = vpack.c.bf16 %v3055_v44, %v3054_v41 }
0x102e   : > { %6485 = vmatprep.subr.bf16.mxu0 %v7254_v51  ;;  %6517 = vmatprep.subr.bf16.mxu1 %v7254_v51 }
0x1031   : > { %6487 = vmatpush3.bf16.msra.mxu0 %v7254_v51  ;;  %6519 = vmatpush3.bf16.msra.mxu1 %v7254_v51 }
0x1032   : > { %6489 = vmatprep.subr.bf16.mxu0 %v7260_v55  ;;  %6521 = vmatprep.subr.bf16.mxu1 %v7260_v55 }
0x1035   : > { %6491 = vmatpush3.bf16.msra.mxu0 %v7260_v55  ;;  %6523 = vmatpush3.bf16.msra.mxu1 %v7260_v55 }
0x1036   : > { %6493 = vmatprep.subr.bf16.mxu0 %v7262_v59  ;;  %6525 = vmatprep.subr.bf16.mxu1 %v7262_v59 }
0x1039   : > { %v7464_v17 = vpop.f32.mrb[22].mxu1  ;;  %6495 = vmatpush3.bf16.msra.mxu0 %v7262_v59  ;;  %6527 = vmatpush3.bf16.msra.mxu1 %v7262_v59 }
0x103a   : > { %v7468_v38 = vpop.f32.mrb[23].mxu1  ;;  %6497 = vmatprep.subr.bf16.mxu0 %v7270_v62  ;;  %6529 = vmatprep.subr.bf16.mxu1 %v7270_v62  ;;  %v2719_v0 = vadd.f32 %v7464_v17, %v3864_v50 }
0x103b   : > { %v2714_v18 = vadd.f32 %v3864_v50, %v7468_v38 }
0x103d   : > { %6499 = vmatpush3.bf16.msra.mxu0 %v7270_v62  ;;  %6531 = vmatpush3.bf16.msra.mxu1 %v7270_v62 }
0x103e   : > { %6533 = vmatprep.subr.bf16.mxu0 %v6532_v48 }
0x10f3   : > { %v5336_v51 = vpop.f32.mrb[24].mxu0  ;;  %v5371_v55 = vpop.f32.mrb[24].mxu1 }
0x10f4   : > { %v2877_v25 = vmax.f32 %v5336_v51, %v5371_v55  ;;  %v2790_v26 = vpop.f32.mrb[25].mxu0  ;;  %v2867_v27 = vpop.f32.mrb[25].mxu1 }
0x10f5   : > { %v2876_v59 = vmax.f32 %v2790_v26, %v2867_v27 }
0x10f6   : > { %v2879_v34 = vsub.f32 %v5336_v51, %v2877_v25  ;;  %v2885_v28 = vsub.f32 %v5371_v55, %v2877_v25  ;;  %v3194_v51 = vld [vmem:[#allocation6 + $0xa28] sm:$0xff]  ;;  %v3195_v55 = vld [vmem:[#allocation6 + $0xa30] sm:$0xff] }
0x10f7   : > { %v2878_v35 = vsub.f32 %v2790_v26, %v2876_v59  ;;  %v2884_v29 = vsub.f32 %v2867_v27, %v2876_v59  ;;  %v6564_v25 = vpack.c.bf16 %v3195_v55, %v3194_v51  ;;  %v3865_v26 = vld [vmem:[#allocation6 + $0xa10] ss:$0 sm:$0xff] }
0x10f8   : > { %v2882_v30 = vmul.f32 1.442695, %v2879_v34  ;;  %v2888_v33 = vmul.f32 1.442695, %v2885_v28  ;;  %v3312_v55 = vld [vmem:[#allocation6 + $0xad0] sm:$0xff] }
0x10f9   : > { %v2880_v36 = vmul.f32 1.442695, %v2878_v35  ;;  %v2886_v24 = vmul.f32 1.442695, %v2884_v29  ;;  %6565 = vmatprep.subr.bf16.mxu1 %v6564_v25 }
0x10fa   : > { %6812 = vpow2.f32 %v2882_v30  ;;  %v3197_v30 = vld [vmem:[#allocation6 + $0xa40] sm:$0xff] }
0x10fb   : > { %6814 = vpow2.f32 %v2888_v33 }
0x10fc   : > { %6816 = vpow2.f32 %v2880_v36  ;;  %v3199_v36 = vld [vmem:[#allocation6 + $0xa50] sm:$0xff] }
0x10fd   : > { %6818 = vpow2.f32 %v2886_v24 }
0x1104   : > { %v6813_v62 = vpop.eup %6812 }
0x1105   : > { %v6815_v37 = vpop.eup %6814 }
0x1106   : > { %v6817_v39 = vpop.eup %6816  ;;  %v2891_v23 = vadd.f32 %v6815_v37, %v6813_v62 }
0x1107   : > { %v6819_v40 = vpop.eup %6818 }
0x1108   : > { %6820 = vrcp.f32 %v2891_v23  ;;  %v2890_v42 = vadd.f32 %v6819_v40, %v6817_v39  ;;  %v3202_v23 = vld [vmem:[#allocation6 + $0xa68] sm:$0xff] }
0x110a   : > { %6822 = vrcp.f32 %v2890_v42 }
0x1112   : > { %v6821_v43 = vpop.eup %6820 }
0x1113   : > { %v2895_v15 = vmul.f32 %v6821_v43, %v6813_v62  ;;  %v2972_v45 = vmul.f32 %v6821_v43, %v6815_v37  ;;  %v3200_v62 = vld [vmem:[#allocation6 + $0xa58] sm:$0xff]  ;;  %v3201_v37 = vld [vmem:[#allocation6 + $0xa60] sm:$0xff] }
0x1114   : > { %v6823_v49 = vpop.eup %6822  ;;  %v3204_v43 = vld [vmem:[#allocation6 + $0xa78] sm:$0xff] }
0x1115   : > { %v2894_v54 = vmul.f32 %v6823_v49, %v6817_v39  ;;  %v2971_v60 = vmul.f32 %v6823_v49, %v6819_v40  ;;  %v6576_v39 = vpack.c.bf16 %v3201_v37, %v3200_v62  ;;  %v3203_v40 = vld [vmem:[#allocation6 + $0xa70] sm:$0xff]  ;;  %v6588_v49 = vpack.c.bf16 %v3207_v47, %v3206_v16  ;;  %v3322_v62 = vld [vmem:[#allocation6 + $0xb20] sm:$0xff]  ;;  %v3323_v37 = vld [vmem:[#allocation6 + $0xb28] sm:$0xff] }
0x1116   : > { %v6580_v42 = vpack.c.bf16 %v3203_v40, %v3202_v23  ;;  %v3868_v23 = vld [vmem:[#allocation6 + $0xaa8] ss:$0 sm:$0xff] }
0x1117   : > { %5404 = vmatprep.mubr.f32.mxu0 %v2894_v54  ;;  %5439 = vmatprep.mubr.f32.mxu1 %v2971_v60  ;;  %v3208_v54 = vld [vmem:[#allocation6 + $0xa98] sm:$0xff]  ;;  %v3209_v60 = vld [vmem:[#allocation6 + $0xaa0] sm:$0xff] }
0x1118   : > { %5405 = vmatmul.mubr.f32.vlgmr.msra.gmra.mrb[26].mxu0 %v2895_v15  ;;  %5440 = vmatmul.mubr.f32.vlgmr.msra.gmra.mrb[26].mxu1 %v2972_v45  ;;  %v3205_v15 = vld [vmem:[#allocation6 + $0xa80] sm:$0xff] }
0x1119   : > { %6535 = vmatpush3.bf16.msra.mxu0 %v6532_v48  ;;  %6567 = vmatpush3.bf16.msra.mxu1 %v6564_v25  ;;  %v6584_v45 = vpack.c.bf16 %v3205_v15, %v3204_v43  ;;  %v3313_v25 = vld [vmem:[#allocation6 + $0xad8] sm:$0xff] }
0x111a   : > { %6537 = vmatprep.subr.bf16.mxu0 %v6536_v56 }
0x111d   : > { %6539 = vmatpush3.bf16.msra.mxu0 %v6536_v56  ;;  %v6592_v56 = vpack.c.bf16 %v3209_v60, %v3208_v54 }
0x111e   : > { %6541 = vmatprep.subr.bf16.mxu0 %v6540_v57 }
0x1121   : > { %6543 = vmatpush3.bf16.msra.mxu0 %v6540_v57  ;;  %v6596_v57 = vpack.c.bf16 %v3309_v31, %v3308_v61 }
0x1122   : > { %6545 = vmatprep.subr.bf16.mxu0 %v6544_v32 }
0x1125   : > { %6547 = vmatpush3.bf16.msra.mxu0 %v6544_v32 }
0x1126   : > { %6549 = vmatprep.subr.bf16.mxu0 %v6548_v4 }
0x1129   : > { %6551 = vmatpush3.bf16.msra.mxu0 %v6548_v4 }
0x112a   : > { %6553 = vmatprep.subr.bf16.mxu0 %v6552_v8 }
0x112d   : > { %6555 = vmatpush3.bf16.msra.mxu0 %v6552_v8 }
0x112e   : > { %6557 = vmatprep.subr.bf16.mxu0 %v6556_v10 }
0x1131   : > { %6559 = vmatpush3.bf16.msra.mxu0 %v6556_v10 }
0x1132   : > { %6561 = vmatprep.subr.bf16.mxu0 %v6560_v58 }
0x1135   : > { %6563 = vmatpush3.bf16.msra.mxu0 %v6560_v58 }
0x1136   : > { %6597 = vmatprep.subr.bf16.mxu0 %v6596_v57 }
0x11eb   : > { %v5406_v19 = vpop.f32.mrb[26].mxu0  ;;  %v5441_v53 = vpop.f32.mrb[26].mxu1 }
0x11ec   : > { %v3049_v6 = vmul.f32 %v5406_v19, %v2719_v0  ;;  %v3051_v20 = vmul.f32 %v5441_v53, %v2714_v18  ;;  %v2962_v21 = vpop.f32.mrb[27].mxu0  ;;  %v3039_v22 = vpop.f32.mrb[27].mxu1 }
0x11ed   : > { %v3048_v13 = vmul.f32 %v2962_v21, %v2714_v18  ;;  %v3050_v41 = vmul.f32 %v3039_v22, %v2719_v0  ;;  %v3866_v18 = vld [vmem:[#allocation6 + $0xa18] ss:$0 sm:$0xff]  ;;  %v3867_v21 = vld [vmem:[#allocation6 + $0xa20] ss:$0 sm:$0xff] }
0x11ee   : > { %v3053_v44 = vadd.f32 %v3051_v20, %v3049_v6 }
0x11ef   : > { %v3052_v48 = vadd.f32 %v3050_v41, %v3048_v13 }
0x11f1   : > { %5474 = vmatprep.mubr.f32.mxu0 %v3052_v48  ;;  %v3311_v48 = vld [vmem:[#allocation6 + $0xac8] sm:$0xff] }
0x11f2   : > { %5475 = vmatmul.mubr.f32.vlgmr.msra.gmra.mrb[28].mxu0 %v3053_v44  ;;  %v3310_v44 = vld [vmem:[#allocation6 + $0xac0] sm:$0xff] }
0x11f3   : > { %6599 = vmatpush3.bf16.msra.mxu0 %v6596_v57  ;;  %v6600_v51 = vpack.c.bf16 %v3311_v48, %v3310_v44  ;;  %v3440_v44 = vld [vmem:[#allocation6 + $0xb70] sm:$0xff] }
0x11f5   : > { %6601 = vmatprep.subr.bf16.mxu0 %v6600_v51 }
0x11f7   : > { %6603 = vmatpush3.bf16.msra.mxu0 %v6600_v51  ;;  %v3441_v51 = vld [vmem:[#allocation6 + $0xb78] sm:$0xff] }
0x12c5   : > { %v5476_v17 = vpop.f32.mrb[28].mxu0 }
0x12c6   : > { %v3146_v38 = vadd.f32 %v5476_v17, %v7394_v9  ;;  %v3136_v27 = vpop.f32.mrb[29].mxu0  ;;  %v3196_v9 = vld [vmem:[#allocation6 + $0xa38] sm:$0xff]  ;;  %v6604_v17 = vpack.c.bf16 %v3313_v25, %v3312_v55  ;;  %v3442_v55 = vld [vmem:[#allocation6 + $0xb80] sm:$0xff] }
0x12c7   : > { %v3145_v59 = vadd.f32 %v3136_v27, %v7396_v11  ;;  %v6568_v33 = vpack.c.bf16 %v3197_v30, %v3196_v9  ;;  %v3198_v11 = vld [vmem:[#allocation6 + $0xa48] sm:$0xff]  ;;  %v6638_v25 = vpack.c.bf16 %v3442_v55, %v3441_v51 }
0x12c8   : > { %v7478_v34 = vadd.f32 %v3865_v26, %v3146_v38  ;;  %v6572_v24 = vpack.c.bf16 %v3199_v36, %v3198_v11  ;;  %6605 = vmatprep.subr.bf16.mxu0 %v6604_v17  ;;  %v3315_v38 = vld [vmem:[#allocation6 + $0xae8] sm:$0xff]  ;;  %v3320_v11 = vld [vmem:[#allocation6 + $0xb10] sm:$0xff]  ;;  %v3321_v36 = vld [vmem:[#allocation6 + $0xb18] sm:$0xff] }
0x12c9   : > { %v7480_v28 = vadd.f32 %v3865_v26, %v3145_v59  ;;  %6569 = vmatprep.subr.bf16.mxu1 %v6568_v33  ;;  %6607 = vmatpush3.bf16.msra.mxu0 %v6604_v17  ;;  %v3314_v26 = vld [vmem:[#allocation6 + $0xae0] sm:$0xff]  ;;  %v3316_v59 = vld [vmem:[#allocation6 + $0xaf0] sm:$0xff]  ;;  %v3319_v30 = vld [vmem:[#allocation6 + $0xb08] sm:$0xff] }
0x12ca   : > { %3156 = vadd.xlane.f32.xlu1 %v7478_v34  ;;  %v3161_v35 = vmul.f32 %v7478_v34, %v7478_v34  ;;  %6571 = vmatpush3.bf16.msra.mxu1 %v6568_v33  ;;  %v6608_v27 = vpack.c.bf16 %v3315_v38, %v3314_v26  ;;  %v3445_v26 = vld [vmem:[#allocation6 + $0xb98] sm:$0xff]  ;;  %v3446_v38 = vld [vmem:[#allocation6 + $0xba0] sm:$0xff] }
0x12cb   : > { %3154 = vadd.xlane.f32.xlu0 %v7480_v28  ;;  %v3160_v29 = vmul.f32 %v7480_v28, %v7480_v28  ;;  %6573 = vmatprep.subr.bf16.mxu1 %v6572_v24 }
0x12cc   : > { %6609 = vmatprep.subr.bf16.mxu0 %v6608_v27 }
0x12cd   : > { %6611 = vmatpush3.bf16.msra.mxu0 %v6608_v27  ;;  %v6977_v27 = vmov 0.0  }
0x12ce   : > { %3164 = vadd.xlane.f32.xlu1 %v3161_v35  ;;  %6575 = vmatpush3.bf16.msra.mxu1 %v6572_v24  ;;  %v3317_v35 = vld [vmem:[#allocation6 + $0xaf8] sm:$0xff]  ;;  %v6620_v24 = vpack.c.bf16 %v3321_v36, %v3320_v11  ;;  %v3535_v36 = vld [vmem:[#allocation6 + $0xbd0] sm:$0xff] }
0x12cf   : > { %3162 = vadd.xlane.f32.xlu0 %v3160_v29  ;;  %6577 = vmatprep.subr.bf16.mxu1 %v6576_v39  ;;  %v3318_v29 = vld [vmem:[#allocation6 + $0xb00] sm:$0xff]  ;;  %v6612_v9 = vpack.c.bf16 %v3317_v35, %v3316_v59  ;;  %v6644_v59 = vpack.c.bf16 %v3446_v38, %v3445_v26  ;;  %v3447_v35 = vld [vmem:[#allocation6 + $0xba8] sm:$0xff] }
0x12d0   : > { %v6616_v33 = vpack.c.bf16 %v3319_v30, %v3318_v29  ;;  %v3448_v29 = vld [vmem:[#allocation6 + $0xbb0] sm:$0xff]  ;;  %v3449_v30 = vld [vmem:[#allocation6 + $0xbb8] sm:$0xff]  ;;  %v3637_v38 = vld [vmem:[#allocation6 + $0xc68] sm:$0xff] }
0x12d1   : > { %6613 = vmatprep.subr.bf16.mxu0 %v6612_v9 }
0x12d2   : > { %6579 = vmatpush3.bf16.msra.mxu1 %v6576_v39  ;;  %6615 = vmatpush3.bf16.msra.mxu0 %v6612_v9  ;;  %v6624_v39 = vpack.c.bf16 %v3323_v37, %v3322_v62  ;;  %v6647_v9 = vpack.c.bf16 %v3448_v29, %v3447_v35  ;;  %v3639_v35 = vld [vmem:[#allocation6 + $0xc78] sm:$0xff]  ;;  %v3640_v29 = vld [vmem:[#allocation6 + $0xc80] sm:$0xff] }
0x12d3   : > { %6581 = vmatprep.subr.bf16.mxu1 %v6580_v42  ;;  %6617 = vmatprep.subr.bf16.mxu0 %v6616_v33 }
0x12d6   : > { %6583 = vmatpush3.bf16.msra.mxu1 %v6580_v42  ;;  %6619 = vmatpush3.bf16.msra.mxu0 %v6616_v33  ;;  %v3450_v33 = vld [vmem:[#allocation6 + $0xbc0] sm:$0xff] }
0x12d7   : > { %6585 = vmatprep.subr.bf16.mxu1 %v6584_v45  ;;  %6621 = vmatprep.subr.bf16.mxu0 %v6620_v24  ;;  %v6650_v11 = vpack.c.bf16 %v3450_v33, %v3449_v30  ;;  %v3641_v30 = vld [vmem:[#allocation6 + $0xc88] sm:$0xff]  ;;  %v3642_v33 = vld [vmem:[#allocation6 + $0xc90] sm:$0xff] }
0x12da   : > { %6587 = vmatpush3.bf16.msra.mxu1 %v6584_v45  ;;  %6623 = vmatpush3.bf16.msra.mxu0 %v6620_v24  ;;  %v3536_v24 = vld [vmem:[#allocation6 + $0xbd8] sm:$0xff] }
0x12db   : > { %6589 = vmatprep.subr.bf16.mxu1 %v6588_v49  ;;  %6625 = vmatprep.subr.bf16.mxu0 %v6624_v39  ;;  %v6653_v62 = vpack.c.bf16 %v3536_v24, %v3535_v36  ;;  %v3643_v36 = vld [vmem:[#allocation6 + $0xc98] sm:$0xff]  ;;  %v3644_v24 = vld [vmem:[#allocation6 + $0xca0] sm:$0xff] }
0x12de   : > { %6591 = vmatpush3.bf16.msra.mxu1 %v6588_v49  ;;  %6627 = vmatpush3.bf16.msra.mxu0 %v6624_v39 }
0x12df   : > { %6593 = vmatprep.subr.bf16.mxu1 %v6592_v56 }
0x12e2   : > { %6595 = vmatpush3.bf16.msra.mxu1 %v6592_v56 }
0x1357   : > { %v3157_v63 = vpop.xlane.xlu1 %3156 }
0x1358   : > { %v3159_v1 = vmul.f32 0.03125, %v3157_v63  ;;  %v3155_v32 = vpop.xlane.xlu0 %3154 }
0x1359   : > { %v3158_v2 = vmul.f32 0.03125, %v3155_v32 }
0x135a   : > { %v3169_v4 = vmul.f32 %v3159_v1, %v3159_v1  ;;  %v3173_v58 = vsub.f32 %v7478_v34, %v3159_v1 }
0x135b   : > { %v3165_v3 = vpop.xlane.xlu1 %3164  ;;  %v3168_v8 = vmul.f32 %v3158_v2, %v3158_v2  ;;  %v3172_v0 = vsub.f32 %v7480_v28, %v3158_v2 }
0x135c   : > { %v3167_v5 = vmul.f32 0.03125, %v3165_v3  ;;  %v3163_v7 = vpop.xlane.xlu0 %3162 }
0x135d   : > { %v3166_v12 = vmul.f32 0.03125, %v3163_v7 }
0x135e   : > { %v3171_v14 = vsub.f32 %v3167_v5, %v3169_v4 }
0x135f   : > { %v3170_v10 = vsub.f32 %v3166_v12, %v3168_v8  ;;  %v3435_v8 = vld [vmem:[#allocation6 + $0xb48] sm:$0xff]  ;;  %v3436_v12 = vld [vmem:[#allocation6 + $0xb50] sm:$0xff] }
0x1360   : > { %v3175_v46 = vadd.f32 1e-05, %v3171_v14  ;;  %v3437_v14 = vld [vmem:[#allocation6 + $0xb58] sm:$0xff] }
0x1361   : > { %v3174_v52 = vadd.f32 1e-05, %v3170_v10  ;;  %v6975_v10 = vmov 0.0|0.0  }
0x1362   : > { %6824 = vrsqrt.f32 %v3175_v46  ;;  %6628 = vmatprep.subr.bf16.mxu1 %v6975_v10  ;;  %v6629_v46 = vpack.c.bf16 %v3436_v12, %v3435_v8  ;;  %6652 = vmatprep.subr.bf16.mxu0 %v6975_v10  ;;  %v3545_v12 = vld [vmem:[#allocation6 + $0xc20] sm:$0xff] }
0x1363   : > { %6826 = vrsqrt.f32 %v3174_v52  ;;  %v3438_v52 = vld [vmem:[#allocation6 + $0xb60] sm:$0xff] }
0x136c   : > { %v6825_v50 = vpop.eup %6824 }
0x136d   : > { %v6827_v19 = vpop.eup %6826  ;;  %v3179_v53 = vmul.f32 %v6825_v50, %v3173_v58  ;;  %v6632_v58 = vpack.c.bf16 %v3438_v52, %v3437_v14  ;;  %v3546_v14 = vld [vmem:[#allocation6 + $0xc28] sm:$0xff]  ;;  %v3547_v52 = vld [vmem:[#allocation6 + $0xc30] sm:$0xff] }
0x136e   : > { %v3178_v6 = vmul.f32 %v6827_v19, %v3172_v0  ;;  %v3869_v0 = vld [vmem:[#allocation6 + $0xb30] ss:$0 sm:$0xff] }
0x136f   : > { %v3186_v20 = vmul.f32 %v3866_v18, %v3179_v53 }
0x1370   : > { %v3185_v22 = vmul.f32 %v3866_v18, %v3178_v6 }
0x1371   : > { %v3193_v41 = vadd.f32 %v3867_v21, %v3186_v20 }
0x1372   : > { %v3192_v13 = vadd.f32 %v3867_v21, %v3185_v22 }
0x1374   : > { %5509 = vmatprep.mubr.f32.mxu1 %v3192_v13 }
0x1375   : > { %5510 = vmatmul.mubr.f32.vlgmr.msra.gmra.mrb[28].mxu1 %v3193_v41  ;;  %v3439_v41 = vld [vmem:[#allocation6 + $0xb68] sm:$0xff] }
0x1376   : > { %6630 = vmatpush3.bf16.msra.mxu1 %v6629_v46  ;;  %v6635_v48 = vpack.c.bf16 %v3440_v44, %v3439_v41  ;;  %5579 = vmatprep.mubr.msk.f32.mxu1 %vm6976_vm1, %v6977_v27  ;;  %v6668_v46 = vpack.c.bf16 %v3546_v14, %v3545_v12 }
0x1377   : > { %6631 = vmatprep.subr.bf16.mxu1 %v6975_v10 }
0x137a   : > { %6633 = vmatpush3.bf16.msra.mxu1 %v6632_v58  ;;  %v3548_v58 = vld [vmem:[#allocation6 + $0xc38] sm:$0xff] }
0x137b   : > { %6634 = vmatprep.subr.bf16.mxu1 %v6975_v10 }
0x137e   : > { %6636 = vmatpush3.bf16.msra.mxu1 %v6635_v48 }
0x137f   : > { %6637 = vmatprep.subr.bf16.mxu1 %v6975_v10 }
0x1382   : > { %6639 = vmatpush3.bf16.msra.mxu1 %v6638_v25 }
0x1383   : > { %6640 = vmatprep.subr.bf16.mxu1 %v6975_v10 }
0x1448   : > { %v5511_v40 = vpop.f32.mrb[28].mxu1 }
0x1449   : > { %v3287_v42 = vadd.f32 %v5511_v40, %v3868_v23  ;;  %v3281_v43 = vpop.f32.mrb[29].mxu1 }
0x144a   : > { %v3282_v15 = vadd.f32 %v3868_v23, %v3281_v43 }
0x144b   : > { %v3293_v45 = vmul.f32 0.044715, %v3287_v42  ;;  %v3291_v4 = vmul.f32 0.5, %v3287_v42 }
0x144c   : > { %v3292_v16 = vmul.f32 0.044715, %v3282_v15  ;;  %v3290_v2 = vmul.f32 0.5, %v3282_v15 }
0x144d   : > { %v3295_v47 = vmul.f32 %v3293_v45, %v3287_v42 }
0x144e   : > { %v3294_v49 = vmul.f32 %v3292_v16, %v3282_v15 }
0x144f   : > { %v3297_v54 = vmul.f32 %v3295_v47, %v3287_v42  ;;  %v3870_v47 = vld [vmem:[#allocation6 + $0xb38] ss:$0 sm:$0xff] }
0x1450   : > { %v3296_v60 = vmul.f32 %v3294_v49, %v3282_v15 }
0x1451   : > { %v3299_v56 = vadd.f32 %v3297_v54, %v3287_v42  ;;  %v3871_v54 = vld [vmem:[#allocation6 + $0xb40] ss:$0 sm:$0xff] }
0x1452   : > { %v3298_v61 = vadd.f32 %v3296_v60, %v3282_v15 }
0x1453   : > { %v3301_v31 = vmul.f32 0.7978846, %v3299_v56 }
0x1454   : > { %v3300_v57 = vmul.f32 0.7978846, %v3298_v61  ;;  %v3537_v61 = vld [vmem:[#allocation6 + $0xbe0] sm:$0xff] }
0x1455   : > { %6828 = vtanh.f32 %v3301_v31  ;;  %v3538_v31 = vld [vmem:[#allocation6 + $0xbe8] sm:$0xff] }
0x1456   : > { %6830 = vtanh.f32 %v3300_v57  ;;  %v6656_v57 = vpack.c.bf16 %v3538_v31, %v3537_v61 }
0x145f   : > { %v6829_v63 = vpop.eup %6828 }
0x1460   : > { %v6831_v1 = vpop.eup %6830  ;;  %v3305_v32 = vadd.f32 1.0, %v6829_v63  ;;  %v3539_v63 = vld [vmem:[#allocation6 + $0xbf0] sm:$0xff] }
0x1461   : > { %v3304_v3 = vadd.f32 1.0, %v6831_v1  ;;  %v3540_v1 = vld [vmem:[#allocation6 + $0xbf8] sm:$0xff] }
0x1462   : > { %v3307_v7 = vmul.f32 %v3305_v32, %v3291_v4  ;;  %v6659_v32 = vpack.c.bf16 %v3540_v1, %v3539_v63 }
0x1463   : > { %v3306_v5 = vmul.f32 %v3304_v3, %v3290_v2  ;;  %v3541_v2 = vld [vmem:[#allocation6 + $0xc00] sm:$0xff]  ;;  %v3542_v3 = vld [vmem:[#allocation6 + $0xc08] sm:$0xff] }
0x1464   : > { %v6662_v4 = vpack.c.bf16 %v3542_v3, %v3541_v2 }
0x1465   : > { %5544 = vmatprep.mubr.f32.mxu0 %v3306_v5  ;;  %v3543_v5 = vld [vmem:[#allocation6 + $0xc10] sm:$0xff] }
0x1466   : > { %5545 = vmatmul.mubr.f32.vlgmr.msra.gmra.mrb[30].mxu0 %v3307_v7  ;;  %v3544_v7 = vld [vmem:[#allocation6 + $0xc18] sm:$0xff] }
0x1467   : > { %5614 = vmatprep.mubr.msk.f32.mxu0 %vm6976_vm1, %v6977_v27  ;;  %6654 = vmatpush3.bf16.msra.mxu0 %v6653_v62  ;;  %v6665_v8 = vpack.c.bf16 %v3544_v7, %v3543_v5  ;;  %v6689_v62 = vpack.c.bf16 %v3644_v24, %v3643_v36 }
0x1468   : > { %6655 = vmatprep.subr.bf16.mxu0 %v6975_v10 }
0x146b   : > { %6657 = vmatpush3.bf16.msra.mxu0 %v6656_v57 }
0x146c   : > { %6658 = vmatprep.subr.bf16.mxu0 %v6975_v10 }
0x146f   : > { %6660 = vmatpush3.bf16.msra.mxu0 %v6659_v32 }
0x1470   : > { %6661 = vmatprep.subr.bf16.mxu0 %v6975_v10 }
0x1473   : > { %6663 = vmatpush3.bf16.msra.mxu0 %v6662_v4 }
0x1474   : > { %6664 = vmatprep.subr.bf16.mxu0 %v6975_v10 }
0x1477   : > { %6666 = vmatpush3.bf16.msra.mxu0 %v6665_v8 }
0x1478   : > { %6667 = vmatprep.subr.bf16.mxu0 %v6975_v10 }
0x147b   : > { %6669 = vmatpush3.bf16.msra.mxu0 %v6668_v46 }
0x147c   : > { %6670 = vmatprep.subr.bf16.mxu0 %v6975_v10 }
0x1539   : > { %v5546_v50 = vpop.f32.mrb[30].mxu0 }
0x153a   : > { %v3400_v18 = vadd.f32 %v5546_v50, %v7478_v34  ;;  %v3390_v19 = vpop.f32.mrb[31].mxu0  ;;  %v3443_v34 = vld [vmem:[#allocation6 + $0xb88] sm:$0xff]  ;;  %v6671_v50 = vpack.c.bf16 %v3548_v58, %v3547_v52 }
0x153b   : > { %v3399_v53 = vadd.f32 %v3390_v19, %v7480_v28  ;;  %v3444_v28 = vld [vmem:[#allocation6 + $0xb90] sm:$0xff] }
0x153c   : > { %v3407_v6 = vadd.f32 %v3869_v0, %v3400_v18  ;;  %v6641_v17 = vpack.c.bf16 %v3444_v28, %v3443_v34  ;;  %v3550_v18 = vld [vmem:[#allocation6 + $0xc48] sm:$0xff]  ;;  %6672 = vmatpush3.bf16.msra.mxu0 %v6671_v50 }
0x153d   : > { %v3406_v20 = vadd.f32 %v3869_v0, %v3399_v53  ;;  %v3549_v0 = vld [vmem:[#allocation6 + $0xc40] sm:$0xff]  ;;  %6673 = vmatprep.subr.bf16.mxu0 %v6975_v10  ;;  %v3635_v53 = vld [vmem:[#allocation6 + $0xc58] sm:$0xff] }
0x153e   : > { %6642 = vmatpush3.bf16.msra.mxu1 %v6641_v17  ;;  %v6674_v19 = vpack.c.bf16 %v3550_v18, %v3549_v0 }
0x153f   : > { %v3408_v21 = vadd.f32 %v3407_v6, %v3406_v20  ;;  %6643 = vmatprep.subr.bf16.mxu1 %v6975_v10  ;;  %v3636_v6 = vld [vmem:[#allocation6 + $0xc60] sm:$0xff] }
0x1540   : > { %6675 = vmatpush3.bf16.msra.mxu0 %v6674_v19  ;;  %v6677_v20 = vpack.c.bf16 %v3636_v6, %v3635_v53 }
0x1541   : > { %v3409_v22 = vmul.f32 0.5, %v3408_v21  ;;  %v3872_v21 = vld [vmem:[#allocation6 + $0xbc8] ss:$0 sm:$0xff] }
0x1542   : > { %6645 = vmatpush3.bf16.msra.mxu1 %v6644_v59 }
0x1543   : > { %3410 = vadd.xlane.f32.xlu0 %v3409_v22  ;;  %v3413_v13 = vmul.f32 %v3409_v22, %v3409_v22  ;;  %6646 = vmatprep.subr.bf16.mxu1 %v6975_v10 }
0x1545   : > { %3414 = vadd.xlane.f32.xlu1 %v3413_v13 }
0x1546   : > { %6648 = vmatpush3.bf16.msra.mxu1 %v6647_v9  ;;  %v6683_v9 = vpack.c.bf16 %v3640_v29, %v3639_v35 }
0x1547   : > { %6649 = vmatprep.subr.bf16.mxu1 %v6975_v10 }
0x154a   : > { %6651 = vmatpush3.bf16.msra.mxu1 %v6650_v11  ;;  %v6686_v11 = vpack.c.bf16 %v3642_v33, %v3641_v30 }
0x154b   : > { %6676 = vmatprep.subr.bf16.mxu1 %v6975_v10 }
0x15d0   : > { %v3411_v37 = vpop.xlane.xlu0 %3410 }
0x15d1   : > { %v3412_v39 = vmul.f32 0.03125, %v3411_v37  ;;  %v3645_v37 = vld [vmem:[#allocation6 + $0xca8] sm:$0xff] }
0x15d2   : > { %v3415_v23 = vpop.xlane.xlu1 %3414 }
0x15d3   : > { %v3417_v40 = vmul.f32 %v3412_v39, %v3412_v39  ;;  %v3416_v42 = vmul.f32 0.03125, %v3415_v23  ;;  %v3419_v45 = vsub.f32 %v3409_v22, %v3412_v39  ;;  %v3646_v39 = vld [vmem:[#allocation6 + $0xcb0] sm:$0xff] }
0x15d4   : > { %v6692_v23 = vpack.c.bf16 %v3646_v39, %v3645_v37 }
0x15d5   : > { %v3418_v43 = vsub.f32 %v3416_v42, %v3417_v40  ;;  %v3647_v40 = vld [vmem:[#allocation6 + $0xcb8] sm:$0xff]  ;;  %v3648_v42 = vld [vmem:[#allocation6 + $0xcc0] sm:$0xff] }
0x15d7   : > { %v3420_v15 = vadd.f32 1e-05, %v3418_v43  ;;  %v6695_v43 = vpack.c.bf16 %v3648_v42, %v3647_v40 }
0x15d9   : > { %6832 = vrsqrt.f32 %v3420_v15  ;;  %v3649_v15 = vld [vmem:[#allocation6 + $0xcc8] sm:$0xff] }
0x15e3   : > { %v6833_v16 = vpop.eup %6832 }
0x15e4   : > { %v3422_v49 = vmul.f32 %v6833_v16, %v3419_v45  ;;  %v3650_v45 = vld [vmem:[#allocation6 + $0xcd0] sm:$0xff] }
0x15e5   : > { %v6698_v16 = vpack.c.bf16 %v3650_v45, %v3649_v15 }
0x15e6   : > { %v3428_v60 = vmul.f32 %v3870_v47, %v3422_v49  ;;  %v3873_v47 = vld [vmem:[#allocation6 + $0xc50] ss:$0 sm:$0xff] }
0x15e8   : > { %v3434_v56 = vadd.f32 %v3871_v54, %v3428_v60 }
0x15ea   : > { %5580 = vmatmul.mubr.f32.vlgmr.msra.gmra.mrb[30].mxu1 %v3434_v56 }
0x15eb   : > { %5649 = vmatprep.mubr.msk.f32.mxu1 %vm6976_vm1, %v6977_v27  ;;  %6678 = vmatpush3.bf16.msra.mxu1 %v6677_v20  ;;  %v3638_v27 = vld [vmem:[#allocation6 + $0xc70] sm:$0xff] }
0x15ec   : > { %6679 = vmatprep.subr.bf16.mxu1 %v6975_v10  ;;  %v6680_v59 = vpack.c.bf16 %v3638_v27, %v3637_v38 }
0x15ef   : > { %6681 = vmatpush3.bf16.msra.mxu1 %v6680_v59 }
0x15f0   : > { %6682 = vmatprep.subr.bf16.mxu1 %v6975_v10 }
0x15f3   : > { %6684 = vmatpush3.bf16.msra.mxu1 %v6683_v9 }
0x15f4   : > { %6685 = vmatprep.subr.bf16.mxu1 %v6975_v10 }
0x15f7   : > { %6687 = vmatpush3.bf16.msra.mxu1 %v6686_v11 }
0x15f8   : > { %6688 = vmatprep.subr.bf16.mxu1 %v6975_v10 }
0x15fb   : > { %6690 = vmatpush3.bf16.msra.mxu1 %v6689_v62 }
0x15fc   : > { %6691 = vmatprep.subr.bf16.mxu1 %v6975_v10 }
0x15ff   : > { %6693 = vmatpush3.bf16.msra.mxu1 %v6692_v23 }
0x1600   : > { %6694 = vmatprep.subr.bf16.mxu1 %v6975_v10 }
0x1603   : > { %6696 = vmatpush3.bf16.msra.mxu1 %v6695_v43 }
0x1604   : > { %6697 = vmatprep.subr.bf16.mxu1 %v6975_v10  ;;  %v3874_v10 = vld [vmem:[#allocation6 + $0xcd8] ss:$0 sm:$0xff] }
0x1607   : > { %6699 = vmatpush3.bf16.msra.mxu1 %v6698_v16 }
0x16bd   : > { %v3522_v22 = vpop.f32.mrb[30].mxu1 }
0x16be   : > { %v3523_v13 = vadd.f32 %v3872_v21, %v3522_v22  ;;  %v5581_v41 = vpop.f32.mrb[31].mxu1 }
0x16c0   : > { %v3527_v44 = vmul.f32 0.044715, %v3523_v13  ;;  %v3526_v28 = vmul.f32 0.5, %v3523_v13 }
0x16c2   : > { %v3528_v48 = vmul.f32 %v3527_v44, %v3523_v13 }
0x16c4   : > { %v3529_v51 = vmul.f32 %v3528_v48, %v3523_v13 }
0x16c6   : > { %v3530_v55 = vadd.f32 %v3529_v51, %v3523_v13 }
0x16c8   : > { %v3531_v25 = vmul.f32 0.7978846, %v3530_v55 }
0x16ca   : > { %6834 = vtanh.f32 %v3531_v25 }
0x16d4   : > { %v6835_v34 = vpop.eup %6834 }
0x16d5   : > { %v3533_v17 = vadd.f32 1.0, %v6835_v34 }
0x16d7   : > { %v3534_v26 = vmul.f32 %v3533_v17, %v3526_v28 }
0x16d9   : > { %5615 = vmatmul.mubr.f32.vlgmr.msra.gmra.mrb[32].mxu0 %v3534_v26 }
0x17ac   : > { %v3622_v49 = vpop.f32.mrb[32].mxu0 }
0x17ad   : > { %v3623_v54 = vadd.f32 %v3873_v47, %v3622_v49  ;;  %v5616_v60 = vpop.f32.mrb[33].mxu0 }
0x17af   : > { %v3627_v56 = vmul.f32 0.044715, %v3623_v54  ;;  %v3626_v32 = vmul.f32 0.5, %v3623_v54 }
0x17b1   : > { %v3628_v61 = vmul.f32 %v3627_v56, %v3623_v54 }
0x17b3   : > { %v3629_v31 = vmul.f32 %v3628_v61, %v3623_v54 }
0x17b5   : > { %v3630_v57 = vadd.f32 %v3629_v31, %v3623_v54 }
0x17b7   : > { %v3631_v63 = vmul.f32 0.7978846, %v3630_v57 }
0x17b9   : > { %6836 = vtanh.f32 %v3631_v63 }
0x17c3   : > { %v6837_v1 = vpop.eup %6836 }
0x17c4   : > { %v3633_v2 = vadd.f32 1.0, %v6837_v1 }
0x17c6   : > { %v3634_v3 = vmul.f32 %v3633_v2, %v3626_v32 }
0x17c8   : > { %5650 = vmatmul.mubr.f32.vlgmr.msra.gmra.mrb[32].mxu1 %v3634_v3 }
0x189b   : > { %v3722_v4 = vpop.f32.mrb[32].mxu1 }
0x189c   : > { %v3723_v5 = vadd.f32 %v3874_v10, %v3722_v4  ;;  %v5651_v7 = vpop.f32.mrb[33].mxu1 }
0x189e   : > { %3726 = vst [vmem:[%s236_s28] sm:$0xff] %v3723_v5 }
0x189f PF: > { %p16_p9 = scmp.ge.s32.totalorder %s7042_s22, 4   ;;  %s7552_s12 = smov %s6960_s13 }
0x18a0   : > { %s7553_s13 = smov %s6964_s14  ;;  %s7554_s14 = smov %s7068_s10 }
0x18a1   : > { %s7555_s15 = smov %s7042_s22  ;;  %18 = sbr.rel (!%p16_p9) target bundleno = 5 (0x5), region = 89 }
0x18a8   :  { %3746 = vsyncpa [#allocation3], 1 }
0x18a9   :  { %3748 = vsyncpa [#allocation3 + $0x1], 1 }
0x18aa   :  { %3749 = vsyncpa [#allocation5], 1 }
0x18ab   :  { %3751 = vsyncpa [#allocation5 + $0x1], 1 }

</bundles_post_ra>
